<compile_context>
chip_gen: v7x
topology: tpu7x:2x2x1
jax: 0.10.0
libtpu: 0.0.40
codegen_flags: <defaults>
</compile_context>

<pallas_src>
import jax
import jax.numpy as jnp
from jax.experimental import pallas as pl
from jax.experimental.pallas import tpu as pltpu

IMG_SHAPE = (3, 32, 32)                                   # (C, H, W)
OUT_DIM = IMG_SHAPE[0] * IMG_SHAPE[1] * IMG_SHAPE[2]      # 3072
EPS = 0.8                                                 # nn.BatchNorm1d(n, 0.8) -> eps
SLOPE = 0.2                                               # LeakyReLU negative slope
TN = 768                                                  # layer-4 output-column tile (grid = 4)
VMEM_LIMIT = 32 << 20                                     # fits v7x (64 MiB physical)


def _bn_train(x, gamma, beta):
    # Training-mode BatchNorm1d: batch mean / biased batch variance, f32 math.
    mean = jnp.mean(x, axis=0, keepdims=True)
    var = jnp.mean((x - mean) ** 2, axis=0, keepdims=True)
    return gamma * (x - mean) * jax.lax.rsqrt(var + EPS) + beta


def _lrelu(x):
    return jnp.where(x > 0, x, SLOPE * x)


def _generator_kernel(x_ref,
                      w1_ref, g1_ref, be1_ref,
                      w2_ref, g2_ref, be2_ref,
                      w3_ref, g3_ref, be3_ref,
                      w4t_ref, b4_ref,
                      out_ref,
                      h3_ref):
    # ---- Head (layers 1-3) computed once, on the first grid step, into the
    #      persistent VMEM scratch h3_ref (requires "arbitrary" grid axis). ----
    @pl.when(pl.program_id(0) == 0)
    def _():
        x = x_ref[...].astype(jnp.bfloat16)

        h = jnp.dot(x, w1_ref[...], preferred_element_type=jnp.float32)
        h = _lrelu(_bn_train(h, g1_ref[...], be1_ref[...]))

        h = jnp.dot(h.astype(jnp.bfloat16), w2_ref[...],
                    preferred_element_type=jnp.float32)
        h = _lrelu(_bn_train(h, g2_ref[...], be2_ref[...]))

        h = jnp.dot(h.astype(jnp.bfloat16), w3_ref[...],
                    preferred_element_type=jnp.float32)
        h = _lrelu(_bn_train(h, g3_ref[...], be3_ref[...]))

        h3_ref[...] = h.astype(jnp.bfloat16)

    # ---- Layer 4, one output-column tile: (N,1024) . (TN,1024)^T + b4 -> tanh.
    #      w4 is pre-transposed so this tile is a contiguous HBM read; the MXU
    #      contracts the transposed RHS natively. ----
    acc = jax.lax.dot_general(
        h3_ref[...], w4t_ref[...],
        dimension_numbers=(((1,), (1,)), ((), ())),
        preferred_element_type=jnp.float32)
    out_ref[...] = jnp.tanh(acc + b4_ref[...]).astype(out_ref.dtype)


def init_params(key, noise_size):
    """Synthetic parameters matching the PyTorch module shapes.

    Weights in bf16 (kernel dtype); BN affine params and b4 in f32.
    w4 is stored pre-transposed as (OUT_DIM, 1024).
    Linear biases for layers 1-3 are omitted (cancel under training-mode BN).
    """
    dims = [noise_size, 256, 512, 1024, OUT_DIM]
    keys = jax.random.split(key, 12)
    ki = 0
    params = []
    for li in range(4):
        fan_in, fan_out = dims[li], dims[li + 1]
        w = jax.random.normal(keys[ki], (fan_in, fan_out), jnp.float32) * 0.02
        ki += 1
        if li < 3:
            params.append(w.astype(jnp.bfloat16))
            g = 1.0 + 0.1 * jax.random.normal(keys[ki], (1, fan_out), jnp.float32)
            ki += 1
            be = 0.1 * jax.random.normal(keys[ki], (1, fan_out), jnp.float32)
            ki += 1
            params.append(g)
            params.append(be)
        else:
            params.append(w.T.astype(jnp.bfloat16))        # (OUT_DIM, 1024)
            b4 = 0.01 * jax.random.normal(keys[ki], (1, fan_out), jnp.float32)
            ki += 1
            params.append(b4)
    return tuple(params)  # (w1,g1,be1, w2,g2,be2, w3,g3,be3, w4t,b4)


def generator_forward(x, params, out_dtype=jnp.float32):
    (w1, g1, be1, w2, g2, be2, w3, g3, be3, w4t, b4) = params
    n, noise = x.shape
    assert OUT_DIM % TN == 0
    grid = (OUT_DIM // TN,)

    # Head weights / BN params: constant index maps -> fetched once, resident.
    const = lambda j: (0, 0)
    in_specs = [
        pl.BlockSpec((n, noise), const),        # x
        pl.BlockSpec((noise, 256), const),      # w1
        pl.BlockSpec((1, 256), const),          # g1
        pl.BlockSpec((1, 256), const),          # be1
        pl.BlockSpec((256, 512), const),        # w2
        pl.BlockSpec((1, 512), const),          # g2
        pl.BlockSpec((1, 512), const),          # be2
        pl.BlockSpec((512, 1024), const),       # w3
        pl.BlockSpec((1, 1024), const),         # g3
        pl.BlockSpec((1, 1024), const),         # be3
        pl.BlockSpec((TN, 1024), lambda j: (j, 0)),   # w4^T row tile (contiguous)
        pl.BlockSpec((1, TN), lambda j: (0, j)),      # b4 tile
    ]

    bytes_accessed = (
        n * noise * 4
        + 2 * (noise * 256 + 256 * 512 + 512 * 1024 + 1024 * OUT_DIM)
        + 4 * 2 * (256 + 512 + 1024)
        + 4 * OUT_DIM
        + n * OUT_DIM * jnp.dtype(out_dtype).itemsize)
    flops = 2 * n * (noise * 256 + 256 * 512 + 512 * 1024 + 1024 * OUT_DIM)

    flat = pl.pallas_call(
        _generator_kernel,
        out_shape=jax.ShapeDtypeStruct((n, OUT_DIM), out_dtype),
        grid_spec=pltpu.PrefetchScalarGridSpec(
            num_scalar_prefetch=0,
            grid=grid,
            in_specs=in_specs,
            out_specs=pl.BlockSpec((n, TN), lambda j: (0, j)),
            scratch_shapes=[pltpu.VMEM((n, 1024), jnp.bfloat16)],  # h3, persistent
        ),
        compiler_params=pltpu.CompilerParams(
            # "arbitrary": head computed on step 0 + persistent scratch needs
            # sequential grid iteration (see header note re: v7x megacore).
            dimension_semantics=("arbitrary",),
            vmem_limit_bytes=VMEM_LIMIT),
        cost_estimate=pl.CostEstimate(
            flops=flops,
            transcendentals=(256 + 512 + 1024) + n * OUT_DIM,  # BN rsqrt + tanh
            bytes_accessed=bytes_accessed),
    )(x, w1, g1, be1, w2, g2, be2, w3, g3, be3, w4t, b4)

    # layout: NCHW, exactly PyTorch's x.view(-1, C, H, W)
    return flat.reshape(n, *IMG_SHAPE)


def reference_forward(x, params):
    """Pure-JAX reference with the same dtype policy (bf16 matmul, f32 accum)."""
    (w1, g1, be1, w2, g2, be2, w3, g3, be3, w4t, b4) = params
    h = jnp.dot(x.astype(jnp.bfloat16), w1, preferred_element_type=jnp.float32)
    h = _lrelu(_bn_train(h, g1, be1))
    h = jnp.dot(h.astype(jnp.bfloat16), w2, preferred_element_type=jnp.float32)
    h = _lrelu(_bn_train(h, g2, be2))
    h = jnp.dot(h.astype(jnp.bfloat16), w3, preferred_element_type=jnp.float32)
    h = _lrelu(_bn_train(h, g3, be3))
    h = jnp.dot(h.astype(jnp.bfloat16), w4t.T, preferred_element_type=jnp.float32)
    h = jnp.tanh(h + b4)
    return h.reshape(x.shape[0], *IMG_SHAPE)


if __name__ == "__main__":
    noise_size = 64
    batch = 8          # small demo batch; kernel is weight-DMA bound at this size

    key = jax.random.PRNGKey(0)
    k_x, k_p = jax.random.split(key)
    x = jax.random.normal(k_x, (batch, noise_size), jnp.float32)
    params = init_params(k_p, noise_size)

    out = generator_forward(x, params)
    out = jax.block_until_ready(out)

    ref = reference_forward(x, params)
    assert out.shape == (batch, *IMG_SHAPE), out.shape
    assert jnp.allclose(out, ref, atol=2e-2, rtol=2e-2), "mismatch vs reference"

    print("KERNEL_OK")
</pallas_src>

<mosaic_0001>
module attributes {stable_mosaic.version = 11 : i64} {
  func.func @_generator_kernel(%arg0: i32, %arg1: memref<8x64xf32, #tpu.memory_space<vmem>>, %arg2: memref<64x256xbf16, #tpu.memory_space<vmem>>, %arg3: memref<1x256xf32, #tpu.memory_space<vmem>>, %arg4: memref<1x256xf32, #tpu.memory_space<vmem>>, %arg5: memref<256x512xbf16, #tpu.memory_space<vmem>>, %arg6: memref<1x512xf32, #tpu.memory_space<vmem>>, %arg7: memref<1x512xf32, #tpu.memory_space<vmem>>, %arg8: memref<512x1024xbf16, #tpu.memory_space<vmem>>, %arg9: memref<1x1024xf32, #tpu.memory_space<vmem>>, %arg10: memref<1x1024xf32, #tpu.memory_space<vmem>>, %arg11: memref<768x1024xbf16, #tpu.memory_space<vmem>>, %arg12: memref<1x768xf32, #tpu.memory_space<vmem>>, %arg13: memref<8x768xf32, #tpu.memory_space<vmem>>, %arg14: memref<8x1024xbf16, #tpu.memory_space<vmem>>) attributes {dimension_semantics = [#tpu.dimension_semantics<arbitrary>], iteration_bounds = array<i64: 4>, scalar_prefetch = 0 : i64, scratch_operands = 1 : i64, tpu.core_type = #tpu.core_type<tc>, window_params = [{pipeline_mode = #tpu.pipeline_mode<synchronous>, transform_indices = @transform_0, window_bounds = array<i64: 8, 64>}, {pipeline_mode = #tpu.pipeline_mode<synchronous>, transform_indices = @transform_1, window_bounds = array<i64: 64, 256>}, {pipeline_mode = #tpu.pipeline_mode<synchronous>, transform_indices = @transform_2, window_bounds = array<i64: 1, 256>}, {pipeline_mode = #tpu.pipeline_mode<synchronous>, transform_indices = @transform_3, window_bounds = array<i64: 1, 256>}, {pipeline_mode = #tpu.pipeline_mode<synchronous>, transform_indices = @transform_4, window_bounds = array<i64: 256, 512>}, {pipeline_mode = #tpu.pipeline_mode<synchronous>, transform_indices = @transform_5, window_bounds = array<i64: 1, 512>}, {pipeline_mode = #tpu.pipeline_mode<synchronous>, transform_indices = @transform_6, window_bounds = array<i64: 1, 512>}, {pipeline_mode = #tpu.pipeline_mode<synchronous>, transform_indices = @transform_7, window_bounds = array<i64: 512, 1024>}, {pipeline_mode = #tpu.pipeline_mode<synchronous>, transform_indices = @transform_8, window_bounds = array<i64: 1, 1024>}, {pipeline_mode = #tpu.pipeline_mode<synchronous>, transform_indices = @transform_9, window_bounds = array<i64: 1, 1024>}, {transform_indices = @transform_10, window_bounds = array<i64: 768, 1024>}, {transform_indices = @transform_11, window_bounds = array<i64: 1, 768>}, {transform_indices = @transform_12, window_bounds = array<i64: 8, 768>}]} {
    %c0_i32 = arith.constant 0 : i32
    %0 = arith.cmpi eq, %arg0, %c0_i32 : i32
    %1 = arith.extui %0 : i1 to i32
    %c0_i32_0 = arith.constant 0 : i32
    %2 = arith.cmpi ne, %1, %c0_i32_0 : i32
    scf.if %2 {
      %c0_8 = arith.constant 0 : index
      %c0_9 = arith.constant 0 : index
      %11 = vector.load %arg1[%c0_8, %c0_9] : memref<8x64xf32, #tpu.memory_space<vmem>>, vector<8x64xf32>
      %12 = arith.truncf %11 : vector<8x64xf32> to vector<8x64xbf16>
      %c0_10 = arith.constant 0 : index
      %c0_11 = arith.constant 0 : index
      %13 = vector.load %arg2[%c0_10, %c0_11] : memref<64x256xbf16, #tpu.memory_space<vmem>>, vector<64x256xbf16>
      %cst_12 = arith.constant dense<0.000000e+00> : vector<8x256xf32>
      %14 = tpu.matmul %12, %13, %cst_12 {dimension_numbers = #tpu.dot_dimension_numbers<[1], [0], [0], [1], [0, 0, 1, 1], [], []>} : vector<8x64xbf16>, vector<64x256xbf16>, vector<8x256xf32> -> vector<8x256xf32>
      %c0_13 = arith.constant 0 : index
      %c0_14 = arith.constant 0 : index
      %15 = vector.load %arg3[%c0_13, %c0_14] : memref<1x256xf32, #tpu.memory_space<vmem>>, vector<1x256xf32>
      %c0_15 = arith.constant 0 : index
      %c0_16 = arith.constant 0 : index
      %16 = vector.load %arg4[%c0_15, %c0_16] : memref<1x256xf32, #tpu.memory_space<vmem>>, vector<1x256xf32>
      %cst_17 = arith.constant dense<0.000000e+00> : vector<256xf32>
      %17 = vector.multi_reduction <add>, %14, %cst_17 [0] : vector<8x256xf32> to vector<256xf32>
      %18 = vector.shape_cast %17 : vector<256xf32> to vector<1x256xf32>
      %cst_18 = arith.constant 8.000000e+00 : f32
      %19 = vector.broadcast %cst_18 : f32 to vector<1x256xf32>
      %20 = arith.divf %18, %19 : vector<1x256xf32>
      %21 = vector.broadcast %20 : vector<1x256xf32> to vector<8x256xf32>
      %22 = arith.subf %14, %21 : vector<8x256xf32>
      %23 = arith.mulf %22, %22 : vector<8x256xf32>
      %cst_19 = arith.constant dense<0.000000e+00> : vector<256xf32>
      %24 = vector.multi_reduction <add>, %23, %cst_19 [0] : vector<8x256xf32> to vector<256xf32>
      %25 = vector.shape_cast %24 : vector<256xf32> to vector<1x256xf32>
      %cst_20 = arith.constant 8.000000e+00 : f32
      %26 = vector.broadcast %cst_20 : f32 to vector<1x256xf32>
      %27 = arith.divf %25, %26 : vector<1x256xf32>
      %28 = vector.broadcast %20 : vector<1x256xf32> to vector<8x256xf32>
      %29 = arith.subf %14, %28 : vector<8x256xf32>
      %30 = vector.broadcast %15 : vector<1x256xf32> to vector<8x256xf32>
      %31 = arith.mulf %30, %29 : vector<8x256xf32>
      %cst_21 = arith.constant 8.000000e-01 : f32
      %32 = vector.broadcast %cst_21 : f32 to vector<1x256xf32>
      %33 = arith.addf %27, %32 : vector<1x256xf32>
      %34 = math.rsqrt %33 : vector<1x256xf32>
      %35 = vector.broadcast %34 : vector<1x256xf32> to vector<8x256xf32>
      %36 = arith.mulf %31, %35 : vector<8x256xf32>
      %37 = vector.broadcast %16 : vector<1x256xf32> to vector<8x256xf32>
      %38 = arith.addf %36, %37 : vector<8x256xf32>
      %cst_22 = arith.constant 0.000000e+00 : f32
      %39 = vector.broadcast %cst_22 : f32 to vector<8x256xf32>
      %40 = arith.cmpf ogt, %38, %39 : vector<8x256xf32>
      %cst_23 = arith.constant 2.000000e-01 : f32
      %41 = vector.broadcast %cst_23 : f32 to vector<8x256xf32>
      %42 = arith.mulf %41, %38 : vector<8x256xf32>
      %43 = arith.select %40, %38, %42 : vector<8x256xi1>, vector<8x256xf32>
      %44 = arith.truncf %43 : vector<8x256xf32> to vector<8x256xbf16>
      %c0_24 = arith.constant 0 : index
      %c0_25 = arith.constant 0 : index
      %45 = vector.load %arg5[%c0_24, %c0_25] : memref<256x512xbf16, #tpu.memory_space<vmem>>, vector<256x512xbf16>
      %cst_26 = arith.constant dense<0.000000e+00> : vector<8x512xf32>
      %46 = tpu.matmul %44, %45, %cst_26 {dimension_numbers = #tpu.dot_dimension_numbers<[1], [0], [0], [1], [0, 0, 1, 1], [], []>} : vector<8x256xbf16>, vector<256x512xbf16>, vector<8x512xf32> -> vector<8x512xf32>
      %c0_27 = arith.constant 0 : index
      %c0_28 = arith.constant 0 : index
      %47 = vector.load %arg6[%c0_27, %c0_28] : memref<1x512xf32, #tpu.memory_space<vmem>>, vector<1x512xf32>
      %c0_29 = arith.constant 0 : index
      %c0_30 = arith.constant 0 : index
      %48 = vector.load %arg7[%c0_29, %c0_30] : memref<1x512xf32, #tpu.memory_space<vmem>>, vector<1x512xf32>
      %cst_31 = arith.constant dense<0.000000e+00> : vector<512xf32>
      %49 = vector.multi_reduction <add>, %46, %cst_31 [0] : vector<8x512xf32> to vector<512xf32>
      %50 = vector.shape_cast %49 : vector<512xf32> to vector<1x512xf32>
      %cst_32 = arith.constant 8.000000e+00 : f32
      %51 = vector.broadcast %cst_32 : f32 to vector<1x512xf32>
      %52 = arith.divf %50, %51 : vector<1x512xf32>
      %53 = vector.broadcast %52 : vector<1x512xf32> to vector<8x512xf32>
      %54 = arith.subf %46, %53 : vector<8x512xf32>
      %55 = arith.mulf %54, %54 : vector<8x512xf32>
      %cst_33 = arith.constant dense<0.000000e+00> : vector<512xf32>
      %56 = vector.multi_reduction <add>, %55, %cst_33 [0] : vector<8x512xf32> to vector<512xf32>
      %57 = vector.shape_cast %56 : vector<512xf32> to vector<1x512xf32>
      %cst_34 = arith.constant 8.000000e+00 : f32
      %58 = vector.broadcast %cst_34 : f32 to vector<1x512xf32>
      %59 = arith.divf %57, %58 : vector<1x512xf32>
      %60 = vector.broadcast %52 : vector<1x512xf32> to vector<8x512xf32>
      %61 = arith.subf %46, %60 : vector<8x512xf32>
      %62 = vector.broadcast %47 : vector<1x512xf32> to vector<8x512xf32>
      %63 = arith.mulf %62, %61 : vector<8x512xf32>
      %cst_35 = arith.constant 8.000000e-01 : f32
      %64 = vector.broadcast %cst_35 : f32 to vector<1x512xf32>
      %65 = arith.addf %59, %64 : vector<1x512xf32>
      %66 = math.rsqrt %65 : vector<1x512xf32>
      %67 = vector.broadcast %66 : vector<1x512xf32> to vector<8x512xf32>
      %68 = arith.mulf %63, %67 : vector<8x512xf32>
      %69 = vector.broadcast %48 : vector<1x512xf32> to vector<8x512xf32>
      %70 = arith.addf %68, %69 : vector<8x512xf32>
      %cst_36 = arith.constant 0.000000e+00 : f32
      %71 = vector.broadcast %cst_36 : f32 to vector<8x512xf32>
      %72 = arith.cmpf ogt, %70, %71 : vector<8x512xf32>
      %cst_37 = arith.constant 2.000000e-01 : f32
      %73 = vector.broadcast %cst_37 : f32 to vector<8x512xf32>
      %74 = arith.mulf %73, %70 : vector<8x512xf32>
      %75 = arith.select %72, %70, %74 : vector<8x512xi1>, vector<8x512xf32>
      %76 = arith.truncf %75 : vector<8x512xf32> to vector<8x512xbf16>
      %c0_38 = arith.constant 0 : index
      %c0_39 = arith.constant 0 : index
      %77 = vector.load %arg8[%c0_38, %c0_39] : memref<512x1024xbf16, #tpu.memory_space<vmem>>, vector<512x1024xbf16>
      %cst_40 = arith.constant dense<0.000000e+00> : vector<8x1024xf32>
      %78 = tpu.matmul %76, %77, %cst_40 {dimension_numbers = #tpu.dot_dimension_numbers<[1], [0], [0], [1], [0, 0, 1, 1], [], []>} : vector<8x512xbf16>, vector<512x1024xbf16>, vector<8x1024xf32> -> vector<8x1024xf32>
      %c0_41 = arith.constant 0 : index
      %c0_42 = arith.constant 0 : index
      %79 = vector.load %arg9[%c0_41, %c0_42] : memref<1x1024xf32, #tpu.memory_space<vmem>>, vector<1x1024xf32>
      %c0_43 = arith.constant 0 : index
      %c0_44 = arith.constant 0 : index
      %80 = vector.load %arg10[%c0_43, %c0_44] : memref<1x1024xf32, #tpu.memory_space<vmem>>, vector<1x1024xf32>
      %cst_45 = arith.constant dense<0.000000e+00> : vector<1024xf32>
      %81 = vector.multi_reduction <add>, %78, %cst_45 [0] : vector<8x1024xf32> to vector<1024xf32>
      %82 = vector.shape_cast %81 : vector<1024xf32> to vector<1x1024xf32>
      %cst_46 = arith.constant 8.000000e+00 : f32
      %83 = vector.broadcast %cst_46 : f32 to vector<1x1024xf32>
      %84 = arith.divf %82, %83 : vector<1x1024xf32>
      %85 = vector.broadcast %84 : vector<1x1024xf32> to vector<8x1024xf32>
      %86 = arith.subf %78, %85 : vector<8x1024xf32>
      %87 = arith.mulf %86, %86 : vector<8x1024xf32>
      %cst_47 = arith.constant dense<0.000000e+00> : vector<1024xf32>
      %88 = vector.multi_reduction <add>, %87, %cst_47 [0] : vector<8x1024xf32> to vector<1024xf32>
      %89 = vector.shape_cast %88 : vector<1024xf32> to vector<1x1024xf32>
      %cst_48 = arith.constant 8.000000e+00 : f32
      %90 = vector.broadcast %cst_48 : f32 to vector<1x1024xf32>
      %91 = arith.divf %89, %90 : vector<1x1024xf32>
      %92 = vector.broadcast %84 : vector<1x1024xf32> to vector<8x1024xf32>
      %93 = arith.subf %78, %92 : vector<8x1024xf32>
      %94 = vector.broadcast %79 : vector<1x1024xf32> to vector<8x1024xf32>
      %95 = arith.mulf %94, %93 : vector<8x1024xf32>
      %cst_49 = arith.constant 8.000000e-01 : f32
      %96 = vector.broadcast %cst_49 : f32 to vector<1x1024xf32>
      %97 = arith.addf %91, %96 : vector<1x1024xf32>
      %98 = math.rsqrt %97 : vector<1x1024xf32>
      %99 = vector.broadcast %98 : vector<1x1024xf32> to vector<8x1024xf32>
      %100 = arith.mulf %95, %99 : vector<8x1024xf32>
      %101 = vector.broadcast %80 : vector<1x1024xf32> to vector<8x1024xf32>
      %102 = arith.addf %100, %101 : vector<8x1024xf32>
      %cst_50 = arith.constant 0.000000e+00 : f32
      %103 = vector.broadcast %cst_50 : f32 to vector<8x1024xf32>
      %104 = arith.cmpf ogt, %102, %103 : vector<8x1024xf32>
      %cst_51 = arith.constant 2.000000e-01 : f32
      %105 = vector.broadcast %cst_51 : f32 to vector<8x1024xf32>
      %106 = arith.mulf %105, %102 : vector<8x1024xf32>
      %107 = arith.select %104, %102, %106 : vector<8x1024xi1>, vector<8x1024xf32>
      %108 = arith.truncf %107 : vector<8x1024xf32> to vector<8x1024xbf16>
      %c0_52 = arith.constant 0 : index
      %c0_53 = arith.constant 0 : index
      %109 = vector.load %arg14[%c0_52, %c0_53] : memref<8x1024xbf16, #tpu.memory_space<vmem>>, vector<8x1024xbf16>
      tpu.vector_store %arg14[%c0_52, %c0_53], %108 {strides = array<i32>} : memref<8x1024xbf16, #tpu.memory_space<vmem>>, vector<8x1024xbf16>,
    } else {
    }
    %c0 = arith.constant 0 : index
    %c0_1 = arith.constant 0 : index
    %3 = vector.load %arg14[%c0, %c0_1] : memref<8x1024xbf16, #tpu.memory_space<vmem>>, vector<8x1024xbf16>
    %c0_2 = arith.constant 0 : index
    %c0_3 = arith.constant 0 : index
    %4 = vector.load %arg11[%c0_2, %c0_3] : memref<768x1024xbf16, #tpu.memory_space<vmem>>, vector<768x1024xbf16>
    %cst = arith.constant dense<0.000000e+00> : vector<8x768xf32>
    %5 = tpu.matmul %3, %4, %cst {dimension_numbers = #tpu.dot_dimension_numbers<[1], [1], [0], [0], [0, 0, 1, 0], [], []>} : vector<8x1024xbf16>, vector<768x1024xbf16>, vector<8x768xf32> -> vector<8x768xf32>
    %c0_4 = arith.constant 0 : index
    %c0_5 = arith.constant 0 : index
    %6 = vector.load %arg12[%c0_4, %c0_5] : memref<1x768xf32, #tpu.memory_space<vmem>>, vector<1x768xf32>
    %7 = vector.broadcast %6 : vector<1x768xf32> to vector<8x768xf32>
    %8 = arith.addf %5, %7 : vector<8x768xf32>
    %9 = math.tanh %8 : vector<8x768xf32>
    %c0_6 = arith.constant 0 : index
    %c0_7 = arith.constant 0 : index
    %10 = vector.load %arg13[%c0_6, %c0_7] : memref<8x768xf32, #tpu.memory_space<vmem>>, vector<8x768xf32>
    tpu.vector_store %arg13[%c0_6, %c0_7], %9 {strides = array<i32>} : memref<8x768xf32, #tpu.memory_space<vmem>>, vector<8x768xf32>,
    return
  }
  func.func @transform_0(%arg0: i32) -> (i32, i32) {
    %c0_i32 = arith.constant 0 : i32
    %c0_i32_0 = arith.constant 0 : i32
    %c0_i32_1 = arith.constant 0 : i32
    return %c0_i32, %c0_i32_0 : i32, i32
  }
  func.func @transform_1(%arg0: i32) -> (i32, i32) {
    %c0_i32 = arith.constant 0 : i32
    %c0_i32_0 = arith.constant 0 : i32
    %c0_i32_1 = arith.constant 0 : i32
    return %c0_i32, %c0_i32_0 : i32, i32
  }
  func.func @transform_2(%arg0: i32) -> (i32, i32) {
    %c0_i32 = arith.constant 0 : i32
    %c0_i32_0 = arith.constant 0 : i32
    %c0_i32_1 = arith.constant 0 : i32
    return %c0_i32, %c0_i32_0 : i32, i32
  }
  func.func @transform_3(%arg0: i32) -> (i32, i32) {
    %c0_i32 = arith.constant 0 : i32
    %c0_i32_0 = arith.constant 0 : i32
    %c0_i32_1 = arith.constant 0 : i32
    return %c0_i32, %c0_i32_0 : i32, i32
  }
  func.func @transform_4(%arg0: i32) -> (i32, i32) {
    %c0_i32 = arith.constant 0 : i32
    %c0_i32_0 = arith.constant 0 : i32
    %c0_i32_1 = arith.constant 0 : i32
    return %c0_i32, %c0_i32_0 : i32, i32
  }
  func.func @transform_5(%arg0: i32) -> (i32, i32) {
    %c0_i32 = arith.constant 0 : i32
    %c0_i32_0 = arith.constant 0 : i32
    %c0_i32_1 = arith.constant 0 : i32
    return %c0_i32, %c0_i32_0 : i32, i32
  }
  func.func @transform_6(%arg0: i32) -> (i32, i32) {
    %c0_i32 = arith.constant 0 : i32
    %c0_i32_0 = arith.constant 0 : i32
    %c0_i32_1 = arith.constant 0 : i32
    return %c0_i32, %c0_i32_0 : i32, i32
  }
  func.func @transform_7(%arg0: i32) -> (i32, i32) {
    %c0_i32 = arith.constant 0 : i32
    %c0_i32_0 = arith.constant 0 : i32
    %c0_i32_1 = arith.constant 0 : i32
    return %c0_i32, %c0_i32_0 : i32, i32
  }
  func.func @transform_8(%arg0: i32) -> (i32, i32) {
    %c0_i32 = arith.constant 0 : i32
    %c0_i32_0 = arith.constant 0 : i32
    %c0_i32_1 = arith.constant 0 : i32
    return %c0_i32, %c0_i32_0 : i32, i32
  }
  func.func @transform_9(%arg0: i32) -> (i32, i32) {
    %c0_i32 = arith.constant 0 : i32
    %c0_i32_0 = arith.constant 0 : i32
    %c0_i32_1 = arith.constant 0 : i32
    return %c0_i32, %c0_i32_0 : i32, i32
  }
  func.func @transform_10(%arg0: i32) -> (i32, i32) {
    %c0_i32 = arith.constant 0 : i32
    %c0_i32_0 = arith.constant 0 : i32
    return %arg0, %c0_i32 : i32, i32
  }
  func.func @transform_11(%arg0: i32) -> (i32, i32) {
    %c0_i32 = arith.constant 0 : i32
    %c0_i32_0 = arith.constant 0 : i32
    return %c0_i32, %arg0 : i32, i32
  }
  func.func @transform_12(%arg0: i32) -> (i32, i32) {
    %c0_i32 = arith.constant 0 : i32
    %c0_i32_0 = arith.constant 0 : i32
    return %c0_i32, %arg0 : i32, i32
  }
}

</mosaic_0001>

<bundles_post_ra>
// kernel: tpu_custom_call.1
= control target key start
LH: loop header
LB: loop body
LE: loop exit
PB: predicated region body
PF: predicated region fallthrough
CT: control target
= control target key end

     0   :  { %s9347_s0 = inlined_call_operand.hbm [shape: f32[8,64], index: 0, kind: input, shape index: {}]   ;;  %s9348_s1 = inlined_call_operand.hbm [shape: bf16[64,256], index: 1, kind: input, shape index: {}]   ;;  %s9349_s2 = inlined_call_operand.hbm [shape: f32[1,256], index: 2, kind: input, shape index: {}]   ;;  %s9350_s3 = inlined_call_operand.hbm [shape: f32[1,256], index: 3, kind: input, shape index: {}]   ;;  %s9351_s4 = inlined_call_operand.hbm [shape: bf16[256,512], index: 4, kind: input, shape index: {}]   ;;  %s9352_s5 = inlined_call_operand.hbm [shape: f32[1,512], index: 5, kind: input, shape index: {}]   ;;  %s9353_s6 = inlined_call_operand.hbm [shape: f32[1,512], index: 6, kind: input, shape index: {}]   ;;  %s9354_s7 = inlined_call_operand.hbm [shape: bf16[512,1024], index: 7, kind: input, shape index: {}]   ;;  %s9355_s8 = inlined_call_operand.hbm [shape: f32[1,1024], index: 8, kind: input, shape index: {}]   ;;  %s9356_s9 = inlined_call_operand.hbm [shape: f32[1,1024], index: 9, kind: input, shape index: {}]   ;;  %s9357_s10 = inlined_call_operand.hbm [shape: bf16[3072,1024], index: 10, kind: input, shape index: {}]   ;;  %s9358_s11 = inlined_call_operand.hbm [shape: f32[1,3072], index: 11, kind: input, shape index: {}]   ;;  %s9359_s12 = inlined_call_operand.hbm [shape: f32[8,3072], index: 12, kind: output, shape index: {}]  }
   0x1   :  { %9378 = sst [smem:[#allocation36_spill]] %s9347_s0 }
   0x2   :  { %9379 = sst [smem:[#allocation37_spill]] %s9348_s1 }
   0x3   :  { %9380 = sst [smem:[#allocation38_spill]] %s9349_s2 }
   0x4   :  { %9381 = sst [smem:[#allocation39_spill]] %s9350_s3 }
   0x5   :  { %9382 = sst [smem:[#allocation40_spill]] %s9352_s5 }
   0x6   :  { %9383 = sst [smem:[#allocation41_spill]] %s9354_s7 }
   0x7   :  { %9384 = sst [smem:[#allocation42_spill]] %s9357_s10 }
   0x8   :  { %9385 = sst [smem:[#allocation43_spill]] %s9359_s12 }
   0x9   :  { %17 = vsyncpa [#allocation4], 0 }
   0xa   :  { %18 = vsyncpa [#allocation7], 0 }
   0xb   :  { %19 = vsyncpa [#allocation10], 0 }
   0xc   :  { %20 = vsyncpa [#allocation13], 0 }
   0xd   :  { %21 = vsyncpa [#allocation16], 0 }
   0xe   :  { %22 = vsyncpa [#allocation19], 0 }
   0xf   :  { %23 = vsyncpa [#allocation5], 0 }
  0x10   :  { %25 = vsyncpa [#allocation5 + $0x1], 0  ;;  %s8291_s21 = smov 0   ;;  %s8293_s22 = smov 0  }
  0x11   :  { %s8295_s23 = smov 0   ;;  %s8297_s24 = smov 0  }
  0x12 LB: > { %9386 = sst [smem:[#allocation31_spill]] %s8192_s21  ;;  %s8206_s25 = smov [#allocation3]   ;;  %s8204_s24 = sphi %s8297_s24, %s9434_s24   ;;  %s8200_s23 = sphi %s8295_s23, %s9438_s23   ;;  %s8196_s22 = sphi %s8293_s22, %s9437_s22   ;;  %s8192_s21 = sphi %s8291_s21, %s9436_s21  }
  0x13   : > { %s337_s26 = sshll.u32 %s8206_s25, 4  ;;  %s8312_s27 = sadd.s32 4294967295, %s8204_s24   ;;  %s338_s26 = int_to_ptr.vmem [resolvable:$true] %s337_s26 }
  0x14   : > { %p6634_p0 = scmp.ge.s32.totalorder %s8204_s24, 1  ;;  %p9360_p1 = scmp.eq.s32.totalorder %s8312_s27, 0 }
  0x15   : > { %p324_p2 = scmp.lt.s32.totalorder %s8204_s24, 5  ;;  %s8207_s29 = smov [#allocation6]  }
  0x16   : > { %s347_s30 = sshll.u32 %s8207_s29, 4  ;;  %s8208_s14 = smov [#allocation9]   ;;  %s8324_s30 = int_to_ptr.vmem [resolvable:$true] %s347_s30 }
  0x17   : > { %p8318_p4 = pnand %p6634_p0, %p324_p2  ;;  %s372_s15 = sshll.u32 %s8208_s14, 4  ;;  %s8332_s15 = int_to_ptr.vmem [resolvable:$true] %s372_s15 }
  0x18   : > { %s9390_s0 = sld [smem:[#allocation36_spill]] }
  0x19   : > { %s9387_s28 = scalar_select %p8318_p4, 1, 0 }
  0x1a   : > { %p7505_p5 = pneg %p8318_p4 }
  0x1b   : > { %9388 = sst [smem:[#allocation32_spill]] %s9387_s28 }
  0x1c   : > { %p8328_p6 = pnand %p7505_p5, %p9360_p1 }
  0x1e   : > { %s9389_s13 = scalar_select %p8328_p6, 1, 0 }
  0x1f   : > { %s7774_s18 = scalar_lea.hbm %s9390_s0, 128  ;;  %p8342_p8 = pneg %p8328_p6 }
  0x20   : > { %p7775_p7 = scmp.ne.s32.totalorder %s9390_s0, %s7774_s18  ;;  %p7781_p11 = scmp.lt.u32.totalorder %s7774_s18, %s9390_s0 }
  0x22   : > { %p7777_p9 = pnand %p8342_p8, %p7775_p7 }
  0x24   : > { %p7778_p10 = pneg %p7777_p9 }
  0x26   : > { %p7783_p12 = pnand %p7781_p11, %p7778_p10 }
  0x28   : > { %7786 = shalt.err (!%p7783_p12)
}
  0x29   : > { %s7787_s16 = scalar_lea.vmem %s338_s26, 128  ;;  %p7795_p5 = scmp.lt.s32.totalorder %s338_s26, %s338_s26 }
  0x2a   : > { %p7788_p13 = scmp.ne.s32.totalorder %s338_s26, %s7787_s16  ;;  %p7796_p3 = scmp.lt.s32.totalorder %s7787_s16, %s7787_s16 }
  0x2c   : > { %p7790_p0 = pnand %p7788_p13, %p8342_p8  ;;  %p7797_p1 = por %p7796_p3, %p7795_p5 }
  0x2e   : > { %p7791_p2 = pneg %p7790_p0 }
  0x30   : > { %p7798_p4 = pnand %p7797_p1, %p7791_p2 }
  0x32   : > { %7801 = shalt.err (!%p7798_p4)
}
  0x33   : > { %7508 = dma.hbm_to_vmem [thread:$0]  (!%p8328_p6), %s9390_s0, 128, %s338_s26, [#allocation4]  }
  0x34   : > { %s9392_s1 = sld [smem:[#allocation37_spill]] }
  0x3a   : > { %s7802_s29 = scalar_lea.hbm %s9392_s1, 1024 }
  0x3b   : > { %p7803_p7 = scmp.ne.s32.totalorder %s9392_s1, %s7802_s29  ;;  %p7809_p1 = scmp.lt.u32.totalorder %s7802_s29, %s9392_s1 }
  0x3d   : > { %p7805_p9 = pnand %p7803_p7, %p8342_p8 }
  0x3f   : > { %p7806_p3 = pneg %p7805_p9 }
  0x41   : > { %p7811_p4 = pnand %p7809_p1, %p7806_p3 }
  0x43   : > { %7814 = shalt.err (!%p7811_p4)
}
  0x44   : > { %s7815_s26 = scalar_lea.vmem %s8324_s30, 1024  ;;  %p7823_p13 = scmp.lt.s32.totalorder %s8324_s30, %s8324_s30 }
  0x45   : > { %p7816_p10 = scmp.ne.s32.totalorder %s8324_s30, %s7815_s26  ;;  %p7824_p0 = scmp.lt.s32.totalorder %s7815_s26, %s7815_s26 }
  0x47   : > { %p7818_p11 = pnand %p7816_p10, %p8342_p8  ;;  %p7825_p2 = por %p7824_p0, %p7823_p13 }
  0x49   : > { %p7819_p12 = pneg %p7818_p11 }
  0x4b   : > { %p7826_p5 = pnand %p7825_p2, %p7819_p12 }
  0x4d   : > { %7829 = shalt.err (!%p7826_p5)
}
  0x4e   : > { %s8209_s12 = smov 128   ;;  %s8210_s28 = smov 8  }
  0x4f   : > { %7511 = dma.hbm_to_vmem [thread:$0]  (!%p8328_p6), %s9392_s1, 1024, %s8324_s30, [#allocation7], %s8209_s12, %s8209_s12, %s8210_s28  }
  0x50   : > { %s9393_s3 = sld [smem:[#allocation39_spill]] }
  0x56   : > { %s7830_s29 = scalar_lea.hbm %s9393_s3, 32 }
  0x57   : > { %p7831_p7 = scmp.ne.s32.totalorder %s9393_s3, %s7830_s29  ;;  %p7837_p1 = scmp.lt.u32.totalorder %s7830_s29, %s9393_s3 }
  0x59   : > { %p7833_p9 = pnand %p7831_p7, %p8342_p8 }
  0x5b   : > { %p7834_p3 = pneg %p7833_p9 }
  0x5d   : > { %p7839_p4 = pnand %p7837_p1, %p7834_p3 }
  0x5f   : > { %7842 = shalt.err (!%p7839_p4)
}
  0x60   : > { %s7843_s30 = scalar_lea.vmem %s8332_s15, 32  ;;  %p7851_p13 = scmp.lt.s32.totalorder %s8332_s15, %s8332_s15 }
  0x61   : > { %p7844_p10 = scmp.ne.s32.totalorder %s8332_s15, %s7843_s30  ;;  %p7852_p0 = scmp.lt.s32.totalorder %s7843_s30, %s7843_s30 }
  0x63   : > { %p7846_p11 = pnand %p7844_p10, %p8342_p8  ;;  %p7853_p2 = por %p7852_p0, %p7851_p13 }
  0x65   : > { %p7847_p12 = pneg %p7846_p11 }
  0x67   : > { %p7854_p5 = pnand %p7853_p2, %p7847_p12 }
  0x69   : > { %7857 = shalt.err (!%p7854_p5)
}
  0x6a   : > { %7517 = dma.hbm_to_vmem [thread:$0]  (!%p8328_p6), %s9393_s3, 32, %s8332_s15, [#allocation10]  }
  0x6b   : > { %s8211_s28 = smov [#allocation12]   ;;  %s8212_s19 = smov [#allocation15]  }
  0x6c   : > { %s396_s17 = sshll.u32 %s8211_s28, 4  ;;  %s417_s18 = sshll.u32 %s8212_s19, 4  ;;  %s397_s17 = int_to_ptr.vmem [resolvable:$true] %s396_s17  ;;  %s418_s18 = int_to_ptr.vmem [resolvable:$true] %s417_s18 }
  0x6d   : > { %s9394_s5 = sld [smem:[#allocation40_spill]] }
  0x73   : > { %s7858_s14 = scalar_lea.hbm %s9394_s5, 64 }
  0x74   : > { %p7859_p7 = scmp.ne.s32.totalorder %s9394_s5, %s7858_s14  ;;  %p7865_p1 = scmp.lt.u32.totalorder %s7858_s14, %s9394_s5 }
  0x76   : > { %p7861_p9 = pnand %p7859_p7, %p8342_p8 }
  0x78   : > { %p7862_p3 = pneg %p7861_p9 }
  0x7a   : > { %p7867_p4 = pnand %p7865_p1, %p7862_p3 }
  0x7c   : > { %7870 = shalt.err (!%p7867_p4)
}
  0x7d   : > { %s7871_s15 = scalar_lea.vmem %s397_s17, 64  ;;  %p7879_p13 = scmp.lt.s32.totalorder %s397_s17, %s397_s17 }
  0x7e   : > { %p7872_p10 = scmp.ne.s32.totalorder %s397_s17, %s7871_s15  ;;  %p7880_p0 = scmp.lt.s32.totalorder %s7871_s15, %s7871_s15 }
  0x80   : > { %p7874_p11 = pnand %p7872_p10, %p8342_p8  ;;  %p7881_p2 = por %p7880_p0, %p7879_p13 }
  0x82   : > { %p7875_p12 = pneg %p7874_p11 }
  0x84   : > { %p7882_p5 = pnand %p7881_p2, %p7875_p12 }
  0x86   : > { %7885 = shalt.err (!%p7882_p5)
}
  0x87   : > { %7523 = dma.hbm_to_vmem [thread:$0]  (!%p8328_p6), %s9394_s5, 64, %s397_s17, [#allocation13]  }
  0x88   : > { %s9395_s7 = sld [smem:[#allocation41_spill]] }
  0x8e   : > { %s7886_s29 = scalar_lea.hbm %s9395_s7, 32768 }
  0x8f   : > { %p7887_p7 = scmp.ne.s32.totalorder %s9395_s7, %s7886_s29  ;;  %p7893_p1 = scmp.lt.u32.totalorder %s7886_s29, %s9395_s7 }
  0x91   : > { %p7889_p9 = pnand %p7887_p7, %p8342_p8 }
  0x93   : > { %p7890_p3 = pneg %p7889_p9 }
  0x95   : > { %p7895_p4 = pnand %p7893_p1, %p7890_p3 }
  0x97   : > { %7898 = shalt.err (!%p7895_p4)
}
  0x98   : > { %s7899_s0 = scalar_lea.vmem %s418_s18, 32768  ;;  %p7907_p13 = scmp.lt.s32.totalorder %s418_s18, %s418_s18 }
  0x99   : > { %p7900_p10 = scmp.ne.s32.totalorder %s418_s18, %s7899_s0  ;;  %p7908_p0 = scmp.lt.s32.totalorder %s7899_s0, %s7899_s0 }
  0x9b   : > { %p7902_p11 = pnand %p7900_p10, %p8342_p8  ;;  %p7909_p2 = por %p7908_p0, %p7907_p13 }
  0x9d   : > { %p7903_p12 = pneg %p7902_p11 }
  0x9f   : > { %p7910_p5 = pnand %p7909_p2, %p7903_p12 }
  0xa1   : > { %7913 = shalt.err (!%p7910_p5)
}
  0xa2   : > { %s9364_s17 = smov 512   ;;  %s9365_s15 = smov 32  }
  0xa3   : > { %7529 = dma.hbm_to_vmem [thread:$0]  (!%p8328_p6), %s9395_s7, 32768, %s418_s18, [#allocation16], %s9364_s17, %s9364_s17, %s9365_s15  }
  0xa4   : > { %s6633_s19 = sadd.s32 4294967294, %s8204_s24   ;;  %s8445_s20 = sadd.s32 1, %s8204_s24  }
  0xa5   : > { %9396 = sst [smem:[#allocation33_spill]] %s8445_s20  ;;  %s248_s29 = sadd.s32 1, %s8200_s23 }
  0xa6   : > { %s245_s14 = ssub.s32 %s8204_s24, %s8445_s20  ;;  %p255_p7 = scmp.ne.s32.totalorder %s8200_s23, %s8196_s22 }
  0xa7   : > { %p246_p9 = scmp.eq.s32.totalorder %s245_s14, 0  ;;  %p256_p3 = scmp.eq.s32.totalorder %s8204_s24, 0 }
  0xa8   : > { %p261_p1 = scmp.ne.s32.totalorder %s8196_s22, %s8192_s21  ;;  %p311_p4 = scmp.eq.s32.totalorder %s8312_s27, 3 }
  0xa9   : > { %s8457_s16 = scalar_select %p246_p9, %s8200_s23, %s248_s29  }
  0xaa   : > { %p257_p10 = por %p256_p3, %p255_p7  ;;  %p9398_p11 = scmp.eq.s32.totalorder %s8312_s27, 0 }
  0xab   : > { %9397 = sst [smem:[#allocation34_spill]] %s8457_s16  ;;  %p8465_p13 = por %p311_p4, %p255_p7 }
  0xac   : > { %p8461_p12 = por %p9398_p11, %p261_p1  ;;  %p317_p0 = scmp.eq.s32.totalorder %s6633_s19, 3 }
  0xad   : > { %s9400_s26 = scalar_select %p8465_p13, 1, 0 }
  0xae   : > { %s9399_s18 = scalar_select %p8461_p12, 1, 0 }
  0xaf   : > { %p7557_p2 = scmp.lt.s32.totalorder %s8204_s24, 4  ;;  %s453_s30 = sand.u32 1, %s8204_s24  }
  0xb0   : > { %p8471_p5 = por %p317_p0, %p261_p1  ;;  %s9366_s12 = sand.u32 1, %s8200_s23  }
  0xb1   : > { %s7397_s28 = smul.u32 49152, %s8204_s24  ;;  %p8479_p9 = pnand %p7557_p2, %p257_p10 }
  0xb2   : > { %s9401_s0 = scalar_select %p8471_p5, 1, 0 }
  0xb3   : > { %s7454_s29 = smul.u32 3072, %s9366_s12  ;;  %s9404_s10 = sld [smem:[#allocation42_spill]] }
  0xb4   : > { %9402 = sst [smem:[#allocation35_spill]] %s9401_s0  ;;  %s8215_s5 = smov [#allocation8]  }
  0xb5   : > { %s9403_s14 = scalar_select %p8479_p9, 1, 0 }
  0xb6   : > { %s457_s1 = scalar_lea.vmem [#allocation20], %s7454_s29  ;;  %s361_s7 = sshll.u32 %s8215_s5, 4  ;;  %s8490_s7 = int_to_ptr.vmem [resolvable:$true] %s361_s7 }
  0xb7   : > { %s465_s3 = sshll.u32 %s457_s1, 4  ;;  %s8492_s12 = scalar_lea.sflag [#allocation4], %s453_s30  ;;  %s8488_s3 = int_to_ptr.vmem [resolvable:$true] %s465_s3 }
  0xb8   : > { %p9371_p3 = pneg %p8479_p9 }
  0xb9   : > { %s8486_s19 = scalar_lea.hbm %s9404_s10, %s7397_s28  ;;  %s7919_s1 = scalar_lea.hbm %s9404_s10, 196608 }
  0xba   : > { %s7914_s16 = scalar_lea.hbm %s8486_s19, 49152  ;;  %p7920_p10 = scmp.lt.u32.totalorder %s8486_s19, %s9404_s10 }
  0xbb   : > { %p7915_p7 = scmp.ne.s32.totalorder %s8486_s19, %s7914_s16  ;;  %p7921_p11 = scmp.lt.u32.totalorder %s7919_s1, %s7914_s16 }
  0xbc   : > { %p7923_p2 = scmp.lt.u32.totalorder %s7914_s16, %s8486_s19 }
  0xbd   : > { %p7917_p1 = pnand %p9371_p3, %p7915_p7  ;;  %p7922_p0 = por %p7921_p11, %p7920_p10 }
  0xbf   : > { %p7918_p4 = pneg %p7917_p1  ;;  %p7924_p5 = por %p7923_p2, %p7922_p0 }
  0xc1   : > { %p7925_p13 = pnand %p7924_p5, %p7918_p4 }
  0xc3   : > { %7928 = shalt.err (!%p7925_p13)
}
  0xc4   : > { %s7929_s30 = scalar_lea.vmem %s8488_s3, 49152  ;;  %s8216_s29 = smov [#allocation20]  }
  0xc5   : > { %p7930_p7 = scmp.ne.s32.totalorder %s8488_s3, %s7929_s30  ;;  %s7934_s17 = sshll.u32 %s8216_s29, 4  ;;  %s7935_s17 = int_to_ptr.vmem [resolvable:$false] %s7934_s17 }
  0xc6   : > { %s7936_s15 = scalar_lea.vmem %s7935_s17, 98304  ;;  %p7937_p6 = scmp.lt.s32.totalorder %s8488_s3, %s7935_s17 }
  0xc7   : > { %p7932_p1 = pnand %p7930_p7, %p9371_p3  ;;  %p7938_p10 = scmp.lt.s32.totalorder %s7936_s15, %s7929_s30 }
  0xc9   : > { %p7933_p12 = pneg %p7932_p1  ;;  %p7939_p11 = por %p7938_p10, %p7937_p6 }
  0xcb   : > { %p7940_p0 = pnand %p7939_p11, %p7933_p12 }
  0xcd   : > { %7943 = shalt.err (!%p7940_p0)
}
  0xce   : > { %s9405_s16 = smov 32   ;;  %s9406_s1 = smov 512  }
  0xcf   : > { %7539 = dma.hbm_to_vmem [thread:$0]  (!%p8479_p9), %s8486_s19, 49152, %s8488_s3, %s8492_s12, %s9406_s1, %s9406_s1, %s9405_s16  }
  0xd0   : > { %s9407_s2 = sld [smem:[#allocation38_spill]] }
  0xd6   : > { %s7944_s29 = scalar_lea.hbm %s9407_s2, 32 }
  0xd7   : > { %p7945_p6 = scmp.ne.s32.totalorder %s9407_s2, %s7944_s29  ;;  %p7951_p5 = scmp.lt.u32.totalorder %s7944_s29, %s9407_s2 }
  0xd9   : > { %p7947_p12 = pnand %p7945_p6, %p8342_p8 }
  0xdb   : > { %p7948_p13 = pneg %p7947_p12 }
  0xdd   : > { %p7953_p4 = pnand %p7951_p5, %p7948_p13 }
  0xdf   : > { %7956 = shalt.err (!%p7953_p4)
}
  0xe0   : > { %s7957_s3 = scalar_lea.vmem %s8490_s7, 32  ;;  %p7965_p10 = scmp.lt.s32.totalorder %s8490_s7, %s8490_s7 }
  0xe1   : > { %p7958_p2 = scmp.ne.s32.totalorder %s8490_s7, %s7957_s3  ;;  %p7966_p11 = scmp.lt.s32.totalorder %s7957_s3, %s7957_s3 }
  0xe3   : > { %p7960_p7 = pnand %p7958_p2, %p8342_p8  ;;  %p7967_p0 = por %p7966_p11, %p7965_p10 }
  0xe5   : > { %p7961_p1 = pneg %p7960_p7 }
  0xe7   : > { %p7968_p6 = pnand %p7967_p0, %p7961_p1 }
  0xe9   : > { %7971 = shalt.err (!%p7968_p6)
}
  0xea   : > { %p9408_p12 = scmp.ne.s32.totalorder %s9389_s13, 0  ;;  %s8217_s16 = smov [#allocation11]  }
  0xeb   : > { %s382_s1 = sshll.u32 %s8217_s16, 4  ;;  %s7972_s29 = scalar_lea.hbm %s9351_s4, 8192  ;;  %s383_s1 = int_to_ptr.vmem [resolvable:$true] %s382_s1 }
  0xec   : > { %7514 = dma.hbm_to_vmem [thread:$0]  (!%p9408_p12), %s9407_s2, 32, %s8490_s7, [#allocation7]  }
  0xed   : > { %p7973_p13 = scmp.ne.s32.totalorder %s9351_s4, %s7972_s29  ;;  %p7979_p2 = scmp.lt.u32.totalorder %s7972_s29, %s9351_s4 }
  0xef   : > { %p7975_p5 = pnand %p7973_p13, %p8342_p8 }
  0xf1   : > { %p7976_p4 = pneg %p7975_p5 }
  0xf3   : > { %p7981_p7 = pnand %p7979_p2, %p7976_p4 }
  0xf5   : > { %7984 = shalt.err (!%p7981_p7)
}
  0xf6   : > { %s7985_s7 = scalar_lea.vmem %s383_s1, 8192  ;;  %p7993_p0 = scmp.lt.s32.totalorder %s383_s1, %s383_s1 }
  0xf7   : > { %p7986_p1 = scmp.ne.s32.totalorder %s383_s1, %s7985_s7  ;;  %p7994_p6 = scmp.lt.s32.totalorder %s7985_s7, %s7985_s7 }
  0xf9   : > { %p7988_p10 = pnand %p7986_p1, %p8342_p8  ;;  %p7995_p3 = por %p7994_p6, %p7993_p0 }
  0xfb   : > { %p7989_p11 = pneg %p7988_p10 }
  0xfd   : > { %p7996_p9 = pnand %p7995_p3, %p7989_p11 }
  0xff   : > { %7999 = shalt.err (!%p7996_p9)
}
 0x100   : > { %s8218_s10 = smov 256   ;;  %s8219_s19 = smov 16  }
 0x101   : > { %7520 = dma.hbm_to_vmem [thread:$0]  (!%p9408_p12), %s9351_s4, 8192, %s383_s1, [#allocation10], %s8218_s10, %s8218_s10, %s8219_s19  }
 0x102   : > { %s8220_s5 = smov [#allocation14]   ;;  %s8221_s17 = smov [#allocation17]  }
 0x103   : > { %s407_s29 = sshll.u32 %s8220_s5, 4  ;;  %s431_s30 = sshll.u32 %s8221_s17, 4  ;;  %s408_s29 = int_to_ptr.vmem [resolvable:$true] %s407_s29  ;;  %s432_s30 = int_to_ptr.vmem [resolvable:$true] %s431_s30 }
 0x104   : > { %s8000_s7 = scalar_lea.hbm %s9353_s6, 64 }
 0x105   : > { %p8001_p9 = scmp.ne.s32.totalorder %s9353_s6, %s8000_s7  ;;  %p8007_p5 = scmp.lt.u32.totalorder %s8000_s7, %s9353_s6 }
 0x107   : > { %p8003_p3 = pnand %p8001_p9, %p8342_p8 }
 0x109   : > { %p8004_p13 = pneg %p8003_p3 }
 0x10b   : > { %p8009_p4 = pnand %p8007_p5, %p8004_p13 }
 0x10d   : > { %8012 = shalt.err (!%p8009_p4)
}
 0x10e   : > { %s8013_s1 = scalar_lea.vmem %s408_s29, 64  ;;  %p8021_p10 = scmp.lt.s32.totalorder %s408_s29, %s408_s29 }
 0x10f   : > { %p8014_p2 = scmp.ne.s32.totalorder %s408_s29, %s8013_s1  ;;  %p8022_p11 = scmp.lt.s32.totalorder %s8013_s1, %s8013_s1 }
 0x111   : > { %p8016_p7 = pnand %p8014_p2, %p8342_p8  ;;  %p8023_p0 = por %p8022_p11, %p8021_p10 }
 0x113   : > { %p8017_p1 = pneg %p8016_p7 }
 0x115   : > { %p8024_p6 = pnand %p8023_p0, %p8017_p1 }
 0x117   : > { %8027 = shalt.err (!%p8024_p6)
}
 0x118   : > { %7526 = dma.hbm_to_vmem [thread:$0]  (!%p9408_p12), %s9353_s6, 64, %s408_s29, [#allocation13]  }
 0x119   : > { %s8028_s10 = scalar_lea.hbm %s9355_s8, 128 }
 0x11a   : > { %p8029_p9 = scmp.ne.s32.totalorder %s9355_s8, %s8028_s10  ;;  %p8035_p5 = scmp.lt.u32.totalorder %s8028_s10, %s9355_s8 }
 0x11c   : > { %p8031_p3 = pnand %p8029_p9, %p8342_p8 }
 0x11e   : > { %p8032_p13 = pneg %p8031_p3 }
 0x120   : > { %p8037_p4 = pnand %p8035_p5, %p8032_p13 }
 0x122   : > { %8040 = shalt.err (!%p8037_p4)
}
 0x123   : > { %s8041_s17 = scalar_lea.vmem %s432_s30, 128  ;;  %p8049_p10 = scmp.lt.s32.totalorder %s432_s30, %s432_s30 }
 0x124   : > { %p8042_p2 = scmp.ne.s32.totalorder %s432_s30, %s8041_s17  ;;  %p8050_p11 = scmp.lt.s32.totalorder %s8041_s17, %s8041_s17 }
 0x126   : > { %p8044_p7 = pnand %p8042_p2, %p8342_p8  ;;  %p8051_p0 = por %p8050_p11, %p8049_p10 }
 0x128   : > { %p8045_p1 = pneg %p8044_p7 }
 0x12a   : > { %p8052_p6 = pnand %p8051_p0, %p8045_p1 }
 0x12c   : > { %8055 = shalt.err (!%p8052_p6)
}
 0x12d   : > { %7532 = dma.hbm_to_vmem [thread:$0]  (!%p9408_p12), %s9355_s8, 128, %s432_s30, [#allocation16]  }
 0x12e   : > { %s8222_s3 = smov [#allocation18]   ;;  %s9409_s1 = sand.u32 1, %s8200_s23  }
 0x12f   : > { %s442_s7 = sshll.u32 %s8222_s3, 4  ;;  %s7455_s2 = smul.u32 6, %s9409_s1  ;;  %s443_s7 = int_to_ptr.vmem [resolvable:$true] %s442_s7 }
 0x130   : > { %s7391_s20 = smul.u32 96, %s8204_s24  ;;  %s8056_s10 = scalar_lea.hbm %s9356_s9, 128 }
 0x131   : > { %p8057_p9 = scmp.ne.s32.totalorder %s9356_s9, %s8056_s10  ;;  %p8063_p5 = scmp.lt.u32.totalorder %s8056_s10, %s9356_s9 }
 0x133   : > { %p8059_p3 = pnand %p8057_p9, %p8342_p8 }
 0x135   : > { %p8060_p13 = pneg %p8059_p3 }
 0x137   : > { %p8065_p4 = pnand %p8063_p5, %p8060_p13 }
 0x139   : > { %8068 = shalt.err (!%p8065_p4)
}
 0x13a   : > { %s8069_s30 = scalar_lea.vmem %s443_s7, 128  ;;  %p8077_p10 = scmp.lt.s32.totalorder %s443_s7, %s443_s7 }
 0x13b   : > { %p8070_p2 = scmp.ne.s32.totalorder %s443_s7, %s8069_s30  ;;  %p8078_p11 = scmp.lt.s32.totalorder %s8069_s30, %s8069_s30 }
 0x13d   : > { %p8072_p7 = pnand %p8070_p2, %p8342_p8  ;;  %p8079_p0 = por %p8078_p11, %p8077_p10 }
 0x13f   : > { %p8073_p1 = pneg %p8072_p7 }
 0x141   : > { %p8080_p6 = pnand %p8079_p0, %p8073_p1 }
 0x143   : > { %8083 = shalt.err (!%p8080_p6)
}
 0x144   : > { %7535 = dma.hbm_to_vmem [thread:$0]  (!%p9408_p12), %s9356_s9, 128, %s443_s7, [#allocation19]  }
 0x145   : > { %s8624_s1 = scalar_lea.hbm %s9358_s11, %s7391_s20  ;;  %s479_s25 = scalar_lea.vmem [#allocation21], %s7455_s2 }
 0x146   : > { %s487_s21 = sshll.u32 %s479_s25, 4  ;;  %s8084_s0 = scalar_lea.hbm %s8624_s1, 96  ;;  %s488_s21 = int_to_ptr.vmem [resolvable:$true] %s487_s21 }
 0x147   : > { %p8085_p8 = scmp.ne.s32.totalorder %s8624_s1, %s8084_s0  ;;  %p9410_p9 = scmp.ne.s32.totalorder %s9403_s14, 0 }
 0x148   : > { %s8089_s10 = scalar_lea.hbm %s9358_s11, 384  ;;  %p8090_p12 = scmp.lt.u32.totalorder %s8624_s1, %s9358_s11 }
 0x149   : > { %p9411_p3 = pneg %p9410_p9  ;;  %p8091_p4 = scmp.lt.u32.totalorder %s8089_s10, %s8084_s0 }
 0x14a   : > { %p8093_p7 = scmp.lt.u32.totalorder %s8084_s0, %s8624_s1 }
 0x14b   : > { %p8087_p13 = pnand %p8085_p8, %p9411_p3  ;;  %p8092_p2 = por %p8091_p4, %p8090_p12 }
 0x14d   : > { %p8088_p5 = pneg %p8087_p13  ;;  %p8094_p1 = por %p8093_p7, %p8092_p2 }
 0x14f   : > { %p8095_p10 = pnand %p8094_p1, %p8088_p5 }
 0x151   : > { %8098 = shalt.err (!%p8095_p10)
}
 0x152   : > { %s8099_s2 = scalar_lea.vmem %s488_s21, 96  ;;  %p9412_p0 = pmov %p9411_p3 }
 0x153   : > { %p8100_p11 = scmp.ne.s32.totalorder %s488_s21, %s8099_s2  ;;  %s8223_s16 = smov [#allocation21]  }
 0x154   : > { %s8104_s28 = sshll.u32 %s8223_s16, 4  ;;  %s8105_s28 = int_to_ptr.vmem [resolvable:$false] %s8104_s28 }
 0x155   : > { %p8102_p6 = pnand %p8100_p11, %p9412_p0  ;;  %s8106_s5 = scalar_lea.vmem %s8105_s28, 192 }
 0x156   : > { %p8107_p3 = scmp.lt.s32.totalorder %s488_s21, %s8105_s28  ;;  %p8108_p13 = scmp.lt.s32.totalorder %s8106_s5, %s8099_s2 }
 0x157   : > { %p8103_p8 = pneg %p8102_p6 }
 0x158   : > { %p8109_p4 = por %p8108_p13, %p8107_p3 }
 0x15a   : > { %p8110_p12 = pnand %p8109_p4, %p8103_p8 }
 0x15c   : > { %8113 = shalt.err (!%p8110_p12)
}
 0x15d   : > { %7542 = dma.hbm_to_vmem [thread:$0]  (!%p9410_p9), %s8624_s1, 96, %s488_s21, %s8492_s12  }
 0x15e   : > { %s9413_s30 = sld [smem:[#allocation32_spill]] }
 0x164   : > { %p9414_p5 = scmp.ne.s32.totalorder %s9413_s30, 0 }
 0x165   : > { %p9415_p2 = scmp.eq.s32.totalorder (!%p9414_p5), %s8312_s27, 0 }
 0x166   : > { %496 = sbr.rel (%p9414_p5) target bundleno = 2417 (0x971), region = 68 }
 0x16d   : > { %8159 = dma.done.wait (%p9415_p2), [#allocation4], 128   ;;  %p9416_p7 = pmov %p9415_p2 }
 0x16e   : > { %p9417_p1 = pmov %p9415_p2 }
 0x16f   : > { %8161 = vsyncadd (%p9416_p7), [#allocation4], 4294967168 }
 0x170   : > { %8163 = dma.done.wait (%p9417_p1), [#allocation7], 1056   ;;  %p9418_p10 = pmov %p9417_p1 }
 0x171   : > { %p9419_p11 = pmov %p9417_p1 }
 0x172   : > { %8165 = vsyncadd (%p9418_p10), [#allocation7], 4294966240 }
 0x173   : > { %8167 = dma.done.wait (%p9419_p11), [#allocation10], 8224   ;;  %p9420_p9 = pmov %p9417_p1 }
 0x174   : > { %p9421_p0 = pmov %p9417_p1 }
 0x175   : > { %8169 = vsyncadd (%p9420_p9), [#allocation10], 4294959072 }
 0x176   : > { %8171 = dma.done.wait (%p9421_p0), [#allocation13], 128   ;;  %p9422_p6 = pmov %p9421_p0 }
 0x177   : > { %p9423_p8 = pmov %p9421_p0 }
 0x178   : > { %8173 = vsyncadd (%p9422_p6), [#allocation13], 4294967168 }
 0x179   : > { %8175 = dma.done.wait (%p9423_p8), [#allocation16], 32896   ;;  %p9424_p3 = pmov %p9421_p0 }
 0x17a   : > { %p9425_p13 = pmov %p9421_p0 }
 0x17b   : > { %8177 = vsyncadd (%p9424_p3), [#allocation16], 4294934400 }
 0x17c   : > { %8179 = dma.done.wait (%p9425_p13), [#allocation19], 128   ;;  %p9426_p4 = pmov %p9421_p0 }
 0x17d   : > { %s538_s12 = sand.u32 1, %s8312_s27   ;;  %s8674_s14 = sand.u32 1, %s8196_s22  }
 0x17e   : > { %8181 = vsyncadd (%p9426_p4), [#allocation19], 4294967168  ;;  %s7456_s17 = smul.u32 3072, %s8674_s14  ;;  %s539_s29 = scalar_lea.sflag [#allocation4], %s538_s12 }
 0x17f   : > { %p9427_p12 = scmp.ne.s32.totalorder %s9399_s18, 0 }
 0x180   : > { %s8677_s15 = scalar_lea.vmem [#allocation20], %s7456_s17 }
 0x181   : > { %8183 = dma.done.wait (%p9427_p12), %s539_s29, 49248  }
 0x182   : > { %8185 = vsyncadd (%p9427_p12), %s539_s29, 4294918048  ;;  %s7457_s3 = smul.u32 6, %s8674_s14  ;;  %p9428_p5 = scmp.ne.s32.totalorder %s8312_s27, 0 }
 0x183   : > { %s7458_s1 = smul.u32 48, %s8674_s14  ;;  %v7618_v0 = vld [vmem:[#allocation6 + $0x4] ss:$8 sps:$4 sm:$0xff] (!%p9428_p5)   ;;  %v7620_v1 = vld [vmem:[#allocation6] ss:$8 sps:$4 sm:$0xff] (!%p9428_p5)   ;;  %v8224_v2 = vmov (!%p9428_p5), 0  }
 0x184   : > { %s8685_s25 = scalar_lea.vmem [#allocation21], %s7457_s3  ;;  %604 = sbr.rel (%p9428_p5) target bundleno = 1403 (0x57b), region = 120  ;;  %691 = vmatprep.mubr.bf16.mxu0 (!%p9428_p5), %v8224_v2  ;;  %659 = vmatprep.subr.bf16.mxu0 (!%p9428_p5), %v7618_v0  ;;  %v7621_v3 = vld [vmem:[#allocation6 + $0x14] ss:$8 sps:$4 sm:$0xff] (!%p9428_p5)   ;;  %v7623_v4 = vld [vmem:[#allocation6 + $0x10] ss:$8 sps:$4 sm:$0xff] (!%p9428_p5)  }
 0x185   : > { %s8687_s21 = scalar_lea.vmem [#allocation22], %s7458_s1  ;;  %660 = vmatpush1.bf16.msra.mxu0 (!%p9428_p5), %v7620_v1  ;;  %v7624_v5 = vld [vmem:[#allocation6 + $0x24] ss:$8 sps:$4 sm:$0xff] (!%p9428_p5)   ;;  %v7630_v6 = vld [vmem:[#allocation11 + $0x4] ss:$16 sps:$4 sm:$0xff] (!%p9428_p5)   ;;  %vm655_vm0 = vcmask (!%p9428_p5), 523264  }
 0x186   : > { %661 = vmatprep.subr.bf16.mxu0 (!%p9428_p5), %v7621_v3  ;;  %v7626_v7 = vld [vmem:[#allocation6 + $0x20] ss:$8 sps:$4 sm:$0xff] (!%p9428_p5)   ;;  %v7627_v8 = vld [vmem:[#allocation6 + $0x34] ss:$8 sps:$4 sm:$0xff] (!%p9428_p5)   ;;  %1159 = vmatprep.subr.bf16.mxu1 (!%p9428_p5), %v7630_v6  ;;  %v7629_v10 = vld [vmem:[#allocation6 + $0x30] ss:$8 sps:$4 sm:$0xff] (!%p9428_p5)  }
 0x187   : > { %v7635_v9 = vld [vmem:[#allocation11] ss:$16 sps:$4 sm:$0xff] (!%p9428_p5)   ;;  %v7636_v11 = vld [vmem:[#allocation11 + $0x24] ss:$16 sps:$4 sm:$0xff] (!%p9428_p5)   ;;  %v7634_v13 = vld [vmem:[#allocation11 + $0xc] ss:$16 sps:$4 sm:$0xff] (!%p9428_p5)  }
 0x188   : > { %v605_v12 = vld [vmem:[#allocation3] sm:$0xff] (!%p9428_p5)  ;;  %1160 = vmatpush1.bf16.msra.mxu1 (!%p9428_p5), %v7635_v9  ;;  %v7641_v14 = vld [vmem:[#allocation11 + $0x20] ss:$16 sps:$4 sm:$0xff] (!%p9428_p5)   ;;  %v7640_v17 = vld [vmem:[#allocation11 + $0x2c] ss:$16 sps:$4 sm:$0xff] (!%p9428_p5)  }
 0x189   : > { %662 = vmatpush1.bf16.msra.mxu0 (!%p9428_p5), %v7623_v4  ;;  %1161 = vmatprep.subr.bf16.mxu1 (!%p9428_p5), %v7636_v11  ;;  %v7632_v15 = vld [vmem:[#allocation11 + $0x8] ss:$16 sps:$4 sm:$0xff] (!%p9428_p5)   ;;  %v606_v16 = vpack.c.bf16 (!%p9428_p5), %v605_v12, %v605_v12  ;;  %v7642_v19 = vld [vmem:[#allocation11 + $0x44] ss:$16 sps:$4 sm:$0xff] (!%p9428_p5)   ;;  %v7646_v20 = vld [vmem:[#allocation11 + $0x4c] ss:$16 sps:$4 sm:$0xff] (!%p9428_p5)  }
 0x18a   : > { %663 = vmatprep.subr.bf16.mxu0 (!%p9428_p5), %v7624_v5  ;;  %v7638_v18 = vld [vmem:[#allocation11 + $0x28] ss:$16 sps:$4 sm:$0xff] (!%p9428_p5)   ;;  %v7647_v22 = vld [vmem:[#allocation11 + $0x40] ss:$16 sps:$4 sm:$0xff] (!%p9428_p5)   ;;  %v7648_v23 = vld [vmem:[#allocation11 + $0x64] ss:$16 sps:$4 sm:$0xff] (!%p9428_p5)  }
 0x18b   : > { %v7644_v21 = vld [vmem:[#allocation11 + $0x48] ss:$16 sps:$4 sm:$0xff]   ;;  %v7652_v24 = vld [vmem:[#allocation11 + $0x6c] ss:$16 sps:$4 sm:$0xff]   ;;  %v7653_v26 = vld [vmem:[#allocation11 + $0x60] ss:$16 sps:$4 sm:$0xff]  }
 0x18c   : > { %1162 = vmatpush1.bf16.msra.mxu1 %v7641_v14  ;;  %v7650_v25 = vld [vmem:[#allocation11 + $0x68] ss:$16 sps:$4 sm:$0xff]   ;;  %v7654_v27 = vld [vmem:[#allocation11 + $0x84] ss:$16 sps:$4 sm:$0xff]   ;;  %v7658_v28 = vld [vmem:[#allocation11 + $0x8c] ss:$16 sps:$4 sm:$0xff]  }
 0x18d   : > { %664 = vmatpush1.bf16.msra.mxu0 %v7626_v7  ;;  %1163 = vmatprep.subr.bf16.mxu1 %v7642_v19  ;;  %v7656_v29 = vld [vmem:[#allocation11 + $0x88] ss:$16 sps:$4 sm:$0xff]   ;;  %v7659_v30 = vld [vmem:[#allocation11 + $0x80] ss:$16 sps:$4 sm:$0xff]   ;;  %v7660_v31 = vld [vmem:[#allocation11 + $0xa4] ss:$16 sps:$4 sm:$0xff]  }
 0x18e   : > { %665 = vmatprep.subr.bf16.mxu0 %v7627_v8  ;;  %v7664_v32 = vld [vmem:[#allocation11 + $0xac] ss:$16 sps:$4 sm:$0xff]   ;;  %v7662_v33 = vld [vmem:[#allocation11 + $0xa8] ss:$16 sps:$4 sm:$0xff]   ;;  %v7665_v34 = vld [vmem:[#allocation11 + $0xa0] ss:$16 sps:$4 sm:$0xff]  }
 0x18f   : > { %v7666_v35 = vld [vmem:[#allocation11 + $0xc4] ss:$16 sps:$4 sm:$0xff]   ;;  %v7670_v36 = vld [vmem:[#allocation11 + $0xcc] ss:$16 sps:$4 sm:$0xff]   ;;  %v7668_v37 = vld [vmem:[#allocation11 + $0xc8] ss:$16 sps:$4 sm:$0xff]  }
 0x190   : > { %1164 = vmatpush1.bf16.msra.mxu1 %v7647_v22  ;;  %v7671_v38 = vld [vmem:[#allocation11 + $0xc0] ss:$16 sps:$4 sm:$0xff]   ;;  %v7672_v39 = vld [vmem:[#allocation11 + $0xe4] ss:$16 sps:$4 sm:$0xff]   ;;  %v7676_v40 = vld [vmem:[#allocation11 + $0xec] ss:$16 sps:$4 sm:$0xff]  }
 0x191   : > { %666 = vmatpush1.bf16.msra.mxu0 %v7629_v10  ;;  %1165 = vmatprep.subr.bf16.mxu1 %v7648_v23  ;;  %v7674_v41 = vld [vmem:[#allocation11 + $0xe8] ss:$16 sps:$4 sm:$0xff]   ;;  %v7677_v42 = vld [vmem:[#allocation11 + $0xe0] ss:$16 sps:$4 sm:$0xff]   ;;  %v7678_v43 = vld [vmem:[#allocation11 + $0x104] ss:$16 sps:$4 sm:$0xff]  }
 0x192   : > { %1200 = vmatprep.subr.bf16.mxu0 %v7634_v13  ;;  %v7682_v44 = vld [vmem:[#allocation11 + $0x10c] ss:$16 sps:$4 sm:$0xff]   ;;  %v7680_v45 = vld [vmem:[#allocation11 + $0x108] ss:$16 sps:$4 sm:$0xff]   ;;  %v7683_v46 = vld [vmem:[#allocation11 + $0x100] ss:$16 sps:$4 sm:$0xff]  }
 0x193   : > { %v7684_v47 = vld [vmem:[#allocation11 + $0x124] ss:$16 sps:$4 sm:$0xff]   ;;  %v7688_v48 = vld [vmem:[#allocation11 + $0x12c] ss:$16 sps:$4 sm:$0xff]   ;;  %v7686_v49 = vld [vmem:[#allocation11 + $0x128] ss:$16 sps:$4 sm:$0xff]  }
 0x194   : > { %6669 = vmatmul.mubr.msk.bf16.vlgmr.msra.gmra.mrb[0].mxu0 %vm655_vm0, %v606_v16  ;;  %1166 = vmatpush1.bf16.msra.mxu1 %v7653_v26  ;;  %v7689_v50 = vld [vmem:[#allocation11 + $0x120] ss:$16 sps:$4 sm:$0xff]   ;;  %v7690_v51 = vld [vmem:[#allocation11 + $0x144] ss:$16 sps:$4 sm:$0xff]   ;;  %v7694_v52 = vld [vmem:[#allocation11 + $0x14c] ss:$16 sps:$4 sm:$0xff]  }
 0x195   : > { %1201 = vmatpush1.bf16.msra.mxu0 %v7632_v15  ;;  %1167 = vmatprep.subr.bf16.mxu1 %v7654_v27  ;;  %v7692_v53 = vld [vmem:[#allocation11 + $0x148] ss:$16 sps:$4 sm:$0xff]   ;;  %v7695_v54 = vld [vmem:[#allocation11 + $0x140] ss:$16 sps:$4 sm:$0xff]   ;;  %v7696_v55 = vld [vmem:[#allocation11 + $0x164] ss:$16 sps:$4 sm:$0xff]  }
 0x196   : > { %1202 = vmatprep.subr.bf16.mxu0 %v7640_v17  ;;  %v7700_v56 = vld [vmem:[#allocation11 + $0x16c] ss:$16 sps:$4 sm:$0xff]   ;;  %v7698_v57 = vld [vmem:[#allocation11 + $0x168] ss:$16 sps:$4 sm:$0xff]   ;;  %v7701_v58 = vld [vmem:[#allocation11 + $0x160] ss:$16 sps:$4 sm:$0xff]  }
 0x197   : > { %v7702_v59 = vld [vmem:[#allocation11 + $0x184] ss:$16 sps:$4 sm:$0xff]   ;;  %v7706_v60 = vld [vmem:[#allocation11 + $0x18c] ss:$16 sps:$4 sm:$0xff]   ;;  %v7704_v61 = vld [vmem:[#allocation11 + $0x188] ss:$16 sps:$4 sm:$0xff]  }
 0x198   : > { %1168 = vmatpush1.bf16.msra.mxu1 %v7659_v30  ;;  %v7707_v62 = vld [vmem:[#allocation11 + $0x180] ss:$16 sps:$4 sm:$0xff]   ;;  %v7708_v63 = vld [vmem:[#allocation11 + $0x1a4] ss:$16 sps:$4 sm:$0xff]   ;;  %v7712_v0 = vld [vmem:[#allocation11 + $0x1ac] ss:$16 sps:$4 sm:$0xff]  }
 0x199   : > { %1203 = vmatpush1.bf16.msra.mxu0 %v7638_v18  ;;  %1169 = vmatprep.subr.bf16.mxu1 %v7660_v31  ;;  %v7710_v1 = vld [vmem:[#allocation11 + $0x1a8] ss:$16 sps:$4 sm:$0xff]   ;;  %v7713_v2 = vld [vmem:[#allocation11 + $0x1a0] ss:$16 sps:$4 sm:$0xff]   ;;  %v7714_v3 = vld [vmem:[#allocation11 + $0x1c4] ss:$16 sps:$4 sm:$0xff]  }
 0x19a   : > { %1204 = vmatprep.subr.bf16.mxu0 %v7646_v20  ;;  %v7716_v4 = vld [vmem:[#allocation11 + $0x1c8] ss:$16 sps:$4 sm:$0xff]   ;;  %v7718_v5 = vld [vmem:[#allocation11 + $0x1cc] ss:$16 sps:$4 sm:$0xff]   ;;  %v7719_v6 = vld [vmem:[#allocation11 + $0x1c0] ss:$16 sps:$4 sm:$0xff]  }
 0x19b   : > { %v7720_v7 = vld [vmem:[#allocation11 + $0x1e4] ss:$16 sps:$4 sm:$0xff]   ;;  %v7724_v8 = vld [vmem:[#allocation11 + $0x1ec] ss:$16 sps:$4 sm:$0xff]   ;;  %v7722_v9 = vld [vmem:[#allocation11 + $0x1e8] ss:$16 sps:$4 sm:$0xff]  }
 0x19c   : > { %1170 = vmatpush1.bf16.msra.mxu1 %v7665_v34  ;;  %v7725_v10 = vld [vmem:[#allocation11 + $0x1e0] ss:$16 sps:$4 sm:$0xff]   ;;  %v8691_v11 = vld [vmem:[#allocation15] sm:$0xff] }
 0x19d   : > { %1205 = vmatpush1.bf16.msra.mxu0 %v7644_v21  ;;  %1171 = vmatprep.subr.bf16.mxu1 %v7666_v35  ;;  %v8693_v12 = vld [vmem:[#allocation15 + $0x20] sm:$0xff]  ;;  %v8695_v13 = vld [vmem:[#allocation15 + $0x8] sm:$0xff] }
 0x19e   : > { %1206 = vmatprep.subr.bf16.mxu0 %v7652_v24  ;;  %v6734_v14 = vcombine.low %v8691_v11, %v8693_v12  ;;  %v6735_v15 = vcombine.high %v8691_v11, %v8693_v12  ;;  %v8701_v16 = vld [vmem:[#allocation15 + $0x28] sm:$0xff]  ;;  %v1409_v11 = vld [vmem:[#allocation15 + $0xc0] sm:$0xff] }
 0x19f   : > { %v6736_v17 = vcombine.low %v8695_v13, %v8701_v16  ;;  %v6737_v18 = vcombine.high %v8695_v13, %v8701_v16  ;;  %v1413_v12 = vld [vmem:[#allocation15 + $0xe0] sm:$0xff]  ;;  %v1410_v13 = vld [vmem:[#allocation15 + $0xc8] sm:$0xff] }
 0x1a0   : > { %1172 = vmatpush1.bf16.msra.mxu1 %v7671_v38  ;;  %v1414_v16 = vld [vmem:[#allocation15 + $0xe8] sm:$0xff] }
 0x1a1   : > { %1207 = vmatpush1.bf16.msra.mxu0 %v7650_v25  ;;  %1173 = vmatprep.subr.bf16.mxu1 %v7672_v39 }
 0x1a2   : > { %1208 = vmatprep.subr.bf16.mxu0 %v7658_v28 }
 0x1a4   : > { %1174 = vmatpush1.bf16.msra.mxu1 %v7677_v42 }
 0x1a5   : > { %1209 = vmatpush1.bf16.msra.mxu0 %v7656_v29  ;;  %1175 = vmatprep.subr.bf16.mxu1 %v7678_v43 }
 0x1a6   : > { %1210 = vmatprep.subr.bf16.mxu0 %v7664_v32 }
 0x1a8   : > { %1176 = vmatpush1.bf16.msra.mxu1 %v7683_v46 }
 0x1a9   : > { %1211 = vmatpush1.bf16.msra.mxu0 %v7662_v33  ;;  %1177 = vmatprep.subr.bf16.mxu1 %v7684_v47 }
 0x1aa   : > { %1212 = vmatprep.subr.bf16.mxu0 %v7670_v36 }
 0x1ac   : > { %1178 = vmatpush1.bf16.msra.mxu1 %v7689_v50  ;;  %v736_v50 = vlaneseq }
 0x1ad   : > { %1213 = vmatpush1.bf16.msra.mxu0 %v7668_v37  ;;  %1179 = vmatprep.subr.bf16.mxu1 %v7690_v51 }
 0x1ae   : > { %1214 = vmatprep.subr.bf16.mxu0 %v7676_v40 }
 0x1b0   : > { %1180 = vmatpush1.bf16.msra.mxu1 %v7695_v54 }
 0x1b1   : > { %1215 = vmatpush1.bf16.msra.mxu0 %v7674_v41  ;;  %1181 = vmatprep.subr.bf16.mxu1 %v7696_v55  ;;  %v8707_v55 = vshrl.u32 %v736_v50, 7  ;;  %v1429_v50 = vld [vmem:[#allocation15 + $0x160] sm:$0xff] }
 0x1b2   : > { %1216 = vmatprep.subr.bf16.mxu0 %v7682_v44 }
 0x1b4   : > { %1182 = vmatpush1.bf16.msra.mxu1 %v7701_v58 }
 0x1b5   : > { %1217 = vmatpush1.bf16.msra.mxu0 %v7680_v45  ;;  %1183 = vmatprep.subr.bf16.mxu1 %v7702_v59  ;;  %v8710_v59 = vsub.s32 0, %v8707_v55 }
 0x1b6   : > { %1218 = vmatprep.subr.bf16.mxu0 %v7688_v48 }
 0x1b8   : > { %1184 = vmatpush1.bf16.msra.mxu1 %v7707_v62 }
 0x1b9   : > { %1219 = vmatpush1.bf16.msra.mxu0 %v7686_v49  ;;  %1185 = vmatprep.subr.bf16.mxu1 %v7708_v63 }
 0x1ba   : > { %1220 = vmatprep.subr.bf16.mxu0 %v7694_v52 }
 0x1bc   : > { %1186 = vmatpush1.bf16.msra.mxu1 %v7713_v2 }
 0x1bd   : > { %1221 = vmatpush1.bf16.msra.mxu0 %v7692_v53  ;;  %1187 = vmatprep.subr.bf16.mxu1 %v7714_v3 }
 0x1be   : > { %1222 = vmatprep.subr.bf16.mxu0 %v7700_v56 }
 0x1c0   : > { %1188 = vmatpush1.bf16.msra.mxu1 %v7719_v6 }
 0x1c1   : > { %1223 = vmatpush1.bf16.msra.mxu0 %v7698_v57  ;;  %1189 = vmatprep.subr.bf16.mxu1 %v7720_v7 }
 0x1c2   : > { %1224 = vmatprep.subr.bf16.mxu0 %v7706_v60  ;;  %v700_v60 = vld [vmem:[#allocation8] sm:$0x3] }
 0x1c3   : > { %v739_v62 = vrot.slane %v700_v60, %v8710_v59 }
 0x1c4   : > { %1190 = vmatpush1.bf16.msra.mxu1 %v7725_v10 }
 0x1c5   : > { %1225 = vmatpush1.bf16.msra.mxu0 %v7704_v61  ;;  %2921 = vmatprep.subr.bf16.mxu1 %v6735_v15  ;;  %v8713_v61 = vsub.s32 1, %v8707_v55 }
 0x1c6   : > { %1226 = vmatprep.subr.bf16.mxu0 %v7712_v0  ;;  %v701_v0 = vld [vmem:[#allocation9] sm:$0x3] }
 0x1c7   : > { %v743_v63 = vrot.slane %v700_v60, %v8713_v61  ;;  %v758_v2 = vrot.slane %v701_v0, %v8710_v59  ;;  %v1437_v60 = vld [vmem:[#allocation15 + $0x1a0] sm:$0xff] }
 0x1c9   : > { %1227 = vmatpush1.bf16.msra.mxu0 %v7710_v1 }
 0x1ca   : > { %1228 = vmatprep.subr.bf16.mxu0 %v7718_v5  ;;  %v762_v5 = vrot.slane %v701_v0, %v8713_v61  ;;  %v1438_v0 = vld [vmem:[#allocation15 + $0x1a8] sm:$0xff] }
 0x1cd   : > { %1229 = vmatpush1.bf16.msra.mxu0 %v7716_v4 }
 0x1ce   : > { %1230 = vmatprep.subr.bf16.mxu0 %v7724_v8 }
 0x1d1   : > { %1231 = vmatpush1.bf16.msra.mxu0 %v7722_v9 }
 0x1d2   : > { %3003 = vmatprep.subr.bf16.mxu0 %v6737_v18 }
 0x267   : > { %v693_v19 = vpop.f32.mrb[0].mxu0 }
 0x268   : > { %v702_v20 = vrot.slane %v693_v19, 4  ;;  %v695_v21 = vpop.f32.mrb[1].mxu0 }
 0x269   : > { %v708_v22 = vrot.slane %v695_v21, 4  ;;  %v697_v23 = vpop.f32.mrb[2].mxu0 }
 0x26a   : > { %v703_v24 = vadd.f32 %v702_v20, %v693_v19  ;;  %v698_v25 = vpop.f32.mrb[3].mxu0  ;;  %v1398_v23 = vld [vmem:[#allocation15 + $0x68] sm:$0xff] }
 0x26b   : > { %v709_v26 = vadd.f32 %v708_v22, %v695_v21  ;;  %v1394_v22 = vld [vmem:[#allocation15 + $0x48] sm:$0xff] }
 0x26c   : > { %v704_v27 = vrot.slane %v703_v24, 2 }
 0x26d   : > { %v710_v28 = vrot.slane %v709_v26, 2 }
 0x26e   : > { %v705_v29 = vadd.f32 %v704_v27, %v703_v24 }
 0x26f   : > { %v711_v30 = vadd.f32 %v710_v28, %v709_v26  ;;  %v6745_v28 = vcombine.high %v1394_v22, %v1398_v23 }
 0x270   : > { %v706_v31 = vrot.slane %v705_v29, 1 }
 0x271   : > { %v712_v32 = vrot.slane %v711_v30, 1 }
 0x272   : > { %v707_v33 = vadd.f32 %v706_v31, %v705_v29  ;;  %v1401_v31 = vld [vmem:[#allocation15 + $0x80] sm:$0xff] }
 0x273   : > { %v713_v34 = vadd.f32 %v712_v32, %v711_v30  ;;  %v6744_v30 = vcombine.low %v1394_v22, %v1398_v23  ;;  %v1405_v32 = vld [vmem:[#allocation15 + $0xa0] sm:$0xff]  ;;  %v1454_v22 = vld [vmem:[#allocation15 + $0x228] sm:$0xff] }
 0x274   : > { %v715_v35 = vmul.f32 0.125, %v707_v33  ;;  %v1402_v33 = vld [vmem:[#allocation15 + $0x88] sm:$0xff] }
 0x275   : > { %v716_v36 = vmul.f32 0.125, %v713_v34  ;;  %v6751_v34 = vcombine.high %v1401_v31, %v1405_v32 }
 0x276   : > { %v717_v37 = vsub.f32 %v693_v19, %v715_v35  ;;  %v1393_v19 = vld [vmem:[#allocation15 + $0x40] sm:$0xff]  ;;  %v1406_v35 = vld [vmem:[#allocation15 + $0xa8] sm:$0xff] }
 0x277   : > { %v718_v38 = vsub.f32 %v695_v21, %v716_v36  ;;  %v1397_v21 = vld [vmem:[#allocation15 + $0x60] sm:$0xff]  ;;  %v6750_v36 = vcombine.low %v1401_v31, %v1405_v32 }
 0x278   : > { %v719_v39 = vmul.f32 %v717_v37, %v717_v37  ;;  %v746_v1 = vmul.f32 %v739_v62, %v717_v37  ;;  %v6743_v27 = vcombine.high %v1393_v19, %v1397_v21  ;;  %v6742_v29 = vcombine.low %v1393_v19, %v1397_v21  ;;  %v1434_v62 = vld [vmem:[#allocation15 + $0x188] sm:$0xff]  ;;  %v1453_v19 = vld [vmem:[#allocation15 + $0x220] sm:$0xff] }
 0x279   : > { %v720_v40 = vmul.f32 %v718_v38, %v718_v38  ;;  %v747_v4 = vmul.f32 %v743_v63, %v718_v38  ;;  %v6752_v37 = vcombine.low %v1402_v33, %v1406_v35  ;;  %v6753_v38 = vcombine.high %v1402_v33, %v1406_v35  ;;  %v1469_v35 = vld [vmem:[#allocation15 + $0x2a0] sm:$0xff] }
 0x27a   : > { %v721_v41 = vrot.slane %v719_v39, 4 }
 0x27b   : > { %v727_v42 = vrot.slane %v720_v40, 4 }
 0x27c   : > { %v722_v43 = vadd.f32 %v721_v41, %v719_v39  ;;  %v6760_v39 = vcombine.low %v1410_v13, %v1414_v16  ;;  %v1417_v41 = vld [vmem:[#allocation15 + $0x100] sm:$0xff] }
 0x27d   : > { %v728_v44 = vadd.f32 %v727_v42, %v720_v40  ;;  %v6761_v40 = vcombine.high %v1410_v13, %v1414_v16  ;;  %v1421_v42 = vld [vmem:[#allocation15 + $0x120] sm:$0xff] }
 0x27e   : > { %v723_v45 = vrot.slane %v722_v43, 2  ;;  %v1477_v16 = vld [vmem:[#allocation15 + $0x2e0] sm:$0xff] }
 0x27f   : > { %v729_v46 = vrot.slane %v728_v44, 2 }
 0x280   : > { %v724_v47 = vadd.f32 %v723_v45, %v722_v43  ;;  %v1418_v43 = vld [vmem:[#allocation15 + $0x108] sm:$0xff] }
 0x281   : > { %v730_v48 = vadd.f32 %v729_v46, %v728_v44  ;;  %v6767_v44 = vcombine.high %v1417_v41, %v1421_v42  ;;  %v1422_v45 = vld [vmem:[#allocation15 + $0x128] sm:$0xff]  ;;  %v6766_v46 = vcombine.low %v1417_v41, %v1421_v42 }
 0x282   : > { %v725_v49 = vrot.slane %v724_v47, 1 }
 0x283   : > { %v731_v51 = vrot.slane %v730_v48, 1 }
 0x284   : > { %v726_v52 = vadd.f32 %v725_v49, %v724_v47  ;;  %v6768_v47 = vcombine.low %v1418_v43, %v1422_v45  ;;  %v1425_v49 = vld [vmem:[#allocation15 + $0x140] sm:$0xff] }
 0x285   : > { %v732_v53 = vadd.f32 %v731_v51, %v730_v48  ;;  %v6769_v48 = vcombine.high %v1418_v43, %v1422_v45  ;;  %v1426_v51 = vld [vmem:[#allocation15 + $0x148] sm:$0xff]  ;;  %v1485_v45 = vld [vmem:[#allocation15 + $0x320] sm:$0xff] }
 0x286   : > { %v733_v54 = vmul.f32 0.125, %v726_v52  ;;  %v6775_v52 = vcombine.high %v1425_v49, %v1429_v50 }
 0x287   : > { %v734_v56 = vmul.f32 0.125, %v732_v53  ;;  %v1430_v53 = vld [vmem:[#allocation15 + $0x168] sm:$0xff] }
 0x288   : > { %v748_v57 = vadd.f32 0.8, %v733_v54  ;;  %v6774_v54 = vcombine.low %v1425_v49, %v1429_v50 }
 0x289   : > { %v749_v58 = vadd.f32 0.8, %v734_v56  ;;  %v6776_v56 = vcombine.low %v1426_v51, %v1430_v53 }
 0x28a   : > { %7726 = vrsqrt.f32 %v748_v57  ;;  %v6777_v57 = vcombine.high %v1426_v51, %v1430_v53  ;;  %v1493_v53 = vld [vmem:[#allocation15 + $0x360] sm:$0xff] }
 0x28b   : > { %7728 = vrsqrt.f32 %v749_v58  ;;  %v1433_v58 = vld [vmem:[#allocation15 + $0x180] sm:$0xff] }
 0x28c   : > { %v6783_v63 = vcombine.high %v1433_v58, %v1437_v60 }
 0x294   : > { %v7727_v3 = vpop.eup %7726 }
 0x295   : > { %v7729_v6 = vpop.eup %7728  ;;  %v752_v7 = vmul.f32 %v7727_v3, %v746_v1  ;;  %v6782_v1 = vcombine.low %v1433_v58, %v1437_v60  ;;  %v6785_v3 = vcombine.high %v1434_v62, %v1438_v0 }
 0x296   : > { %v753_v8 = vmul.f32 %v7729_v6, %v747_v4  ;;  %v1441_v4 = vld [vmem:[#allocation15 + $0x1c0] sm:$0xff]  ;;  %v1442_v6 = vld [vmem:[#allocation15 + $0x1c8] sm:$0xff] }
 0x297   : > { %v765_v9 = vadd.f32 %v758_v2, %v752_v7  ;;  %v6784_v2 = vcombine.low %v1434_v62, %v1438_v0  ;;  %v1501_v0 = vld [vmem:[#allocation15 + $0x3a0] sm:$0xff] }
 0x298   : > { %v766_v10 = vadd.f32 %v762_v5, %v753_v8  ;;  %v1445_v5 = vld [vmem:[#allocation15 + $0x1e0] sm:$0xff]  ;;  %v1446_v8 = vld [vmem:[#allocation15 + $0x1e8] sm:$0xff] }
 0x299   : > { %vm767_vm1 = vcmp.gt.f32.partialorder %v765_v9, 0.0  ;;  %v769_v15 = vmul.f32 0.2, %v765_v9  ;;  %v6791_v7 = vcombine.high %v1441_v4, %v1445_v5 }
 0x29a   : > { %vm768_vm2 = vcmp.gt.f32.partialorder %v766_v10, 0.0  ;;  %v770_v18 = vmul.f32 0.2, %v766_v10 }
 0x29b   : > { %v771_v20 = vsel %vm767_vm1, %v765_v9, %v769_v15  ;;  %v6790_v9 = vcombine.low %v1441_v4, %v1445_v5  ;;  %v6793_v15 = vcombine.high %v1442_v6, %v1446_v8 }
 0x29c   : > { %v772_v24 = vsel %vm768_vm2, %v766_v10, %v770_v18  ;;  %v773_v26 = vpack.c.bf16 %v771_v20, %v771_v20  ;;  %v6792_v10 = vcombine.low %v1442_v6, %v1446_v8  ;;  %v1449_v18 = vld [vmem:[#allocation15 + $0x200] sm:$0xff]  ;;  %v1450_v20 = vld [vmem:[#allocation15 + $0x208] sm:$0xff] }
 0x29d   : > { %v774_v25 = vpack.c.bf16 %v772_v24, %v772_v24  ;;  %v6799_v21 = vcombine.high %v1449_v18, %v1453_v19  ;;  %v6798_v23 = vcombine.low %v1449_v18, %v1453_v19  ;;  %v6800_v24 = vcombine.low %v1450_v20, %v1454_v22  ;;  %v1509_v8 = vld [vmem:[#allocation15 + $0x3e0] sm:$0xff]  ;;  %v1510_v18 = vld [vmem:[#allocation15 + $0x3e8] sm:$0xff] }
 0x29f   : > { %1191 = vmatprep.mubr.bf16.mxu1 %v774_v25  ;;  %1232 = vmatprep.mubr.bf16.mxu0 %v774_v25  ;;  %v6801_v25 = vcombine.high %v1450_v20, %v1454_v22  ;;  %v8727_v22 = vld [vmem:[#allocation15 + $0x420] sm:$0xff] }
 0x2a0   : > { %1192 = vmatmul.mubr.bf16.vlgmr.msra.gmra.mrb[0].mxu1 %v773_v26  ;;  %1233 = vmatmul.mubr.bf16.vlgmr.msra.gmra.mrb[4].mxu0 %v773_v26  ;;  %v1457_v26 = vld [vmem:[#allocation15 + $0x240] sm:$0xff] }
 0x2a1   : > { %2922 = vmatpush1.bf16.msra.mxu1 %v6734_v14  ;;  %3004 = vmatpush1.bf16.msra.mxu0 %v6736_v17  ;;  %v6759_v14 = vcombine.high %v1409_v11, %v1413_v12  ;;  %v6758_v17 = vcombine.low %v1409_v11, %v1413_v12 }
 0x2a2   : > { %2923 = vmatprep.subr.bf16.mxu1 %v6743_v27  ;;  %3005 = vmatprep.subr.bf16.mxu0 %v6745_v28  ;;  %v1461_v27 = vld [vmem:[#allocation15 + $0x260] sm:$0xff]  ;;  %v1458_v28 = vld [vmem:[#allocation15 + $0x248] sm:$0xff] }
 0x2a3   : > { %v6806_v31 = vcombine.low %v1457_v26, %v1461_v27 }
 0x2a5   : > { %2924 = vmatpush1.bf16.msra.mxu1 %v6742_v29  ;;  %3006 = vmatpush1.bf16.msra.mxu0 %v6744_v30  ;;  %v6807_v29 = vcombine.high %v1457_v26, %v1461_v27  ;;  %v1462_v30 = vld [vmem:[#allocation15 + $0x268] sm:$0xff] }
 0x2a6   : > { %2925 = vmatprep.subr.bf16.mxu1 %v6751_v34  ;;  %3007 = vmatprep.subr.bf16.mxu0 %v6753_v38  ;;  %v6808_v32 = vcombine.low %v1458_v28, %v1462_v30  ;;  %v6809_v33 = vcombine.high %v1458_v28, %v1462_v30  ;;  %v1465_v34 = vld [vmem:[#allocation15 + $0x280] sm:$0xff]  ;;  %v1470_v38 = vld [vmem:[#allocation15 + $0x2a8] sm:$0xff] }
 0x2a7   : > { %v6814_v11 = vcombine.low %v1465_v34, %v1469_v35 }
 0x2a9   : > { %2926 = vmatpush1.bf16.msra.mxu1 %v6750_v36  ;;  %3008 = vmatpush1.bf16.msra.mxu0 %v6752_v37  ;;  %v1466_v36 = vld [vmem:[#allocation15 + $0x288] sm:$0xff]  ;;  %v6815_v37 = vcombine.high %v1465_v34, %v1469_v35 }
 0x2aa   : > { %2927 = vmatprep.subr.bf16.mxu1 %v6759_v14  ;;  %3009 = vmatprep.subr.bf16.mxu0 %v6761_v40  ;;  %v6816_v12 = vcombine.low %v1466_v36, %v1470_v38  ;;  %v6817_v13 = vcombine.high %v1466_v36, %v1470_v38  ;;  %v1473_v14 = vld [vmem:[#allocation15 + $0x2c0] sm:$0xff]  ;;  %v1478_v40 = vld [vmem:[#allocation15 + $0x2e8] sm:$0xff] }
 0x2ab   : > { %v6822_v41 = vcombine.low %v1473_v14, %v1477_v16 }
 0x2ad   : > { %2928 = vmatpush1.bf16.msra.mxu1 %v6758_v17  ;;  %3010 = vmatpush1.bf16.msra.mxu0 %v6760_v39  ;;  %v1474_v17 = vld [vmem:[#allocation15 + $0x2c8] sm:$0xff]  ;;  %v6823_v39 = vcombine.high %v1473_v14, %v1477_v16 }
 0x2ae   : > { %2929 = vmatprep.subr.bf16.mxu1 %v6767_v44  ;;  %3011 = vmatprep.subr.bf16.mxu0 %v6769_v48  ;;  %v6824_v42 = vcombine.low %v1474_v17, %v1478_v40  ;;  %v6825_v43 = vcombine.high %v1474_v17, %v1478_v40  ;;  %v1481_v44 = vld [vmem:[#allocation15 + $0x300] sm:$0xff]  ;;  %v1486_v48 = vld [vmem:[#allocation15 + $0x328] sm:$0xff] }
 0x2af   : > { %v6830_v49 = vcombine.low %v1481_v44, %v1485_v45 }
 0x2b1   : > { %2930 = vmatpush1.bf16.msra.mxu1 %v6766_v46  ;;  %3012 = vmatpush1.bf16.msra.mxu0 %v6768_v47  ;;  %v1482_v46 = vld [vmem:[#allocation15 + $0x308] sm:$0xff]  ;;  %v6831_v47 = vcombine.high %v1481_v44, %v1485_v45 }
 0x2b2   : > { %2931 = vmatprep.subr.bf16.mxu1 %v6775_v52  ;;  %3013 = vmatprep.subr.bf16.mxu0 %v6777_v57  ;;  %v6832_v50 = vcombine.low %v1482_v46, %v1486_v48  ;;  %v6833_v51 = vcombine.high %v1482_v46, %v1486_v48  ;;  %v1489_v52 = vld [vmem:[#allocation15 + $0x340] sm:$0xff]  ;;  %v1494_v57 = vld [vmem:[#allocation15 + $0x368] sm:$0xff] }
 0x2b3   : > { %v6838_v58 = vcombine.low %v1489_v52, %v1493_v53 }
 0x2b5   : > { %2932 = vmatpush1.bf16.msra.mxu1 %v6774_v54  ;;  %3014 = vmatpush1.bf16.msra.mxu0 %v6776_v56  ;;  %v1490_v54 = vld [vmem:[#allocation15 + $0x348] sm:$0xff]  ;;  %v6839_v56 = vcombine.high %v1489_v52, %v1493_v53 }
 0x2b6   : > { %2933 = vmatprep.subr.bf16.mxu1 %v6783_v63  ;;  %3015 = vmatprep.subr.bf16.mxu0 %v6785_v3  ;;  %v6840_v60 = vcombine.low %v1490_v54, %v1494_v57  ;;  %v6841_v62 = vcombine.high %v1490_v54, %v1494_v57  ;;  %v1497_v63 = vld [vmem:[#allocation15 + $0x380] sm:$0xff]  ;;  %v1502_v3 = vld [vmem:[#allocation15 + $0x3a8] sm:$0xff] }
 0x2b7   : > { %v6846_v4 = vcombine.low %v1497_v63, %v1501_v0 }
 0x2b9   : > { %2934 = vmatpush1.bf16.msra.mxu1 %v6782_v1  ;;  %3016 = vmatpush1.bf16.msra.mxu0 %v6784_v2  ;;  %v1498_v1 = vld [vmem:[#allocation15 + $0x388] sm:$0xff]  ;;  %v6847_v2 = vcombine.high %v1497_v63, %v1501_v0 }
 0x2ba   : > { %2935 = vmatprep.subr.bf16.mxu1 %v6791_v7  ;;  %3017 = vmatprep.subr.bf16.mxu0 %v6793_v15  ;;  %v6848_v5 = vcombine.low %v1498_v1, %v1502_v3  ;;  %v6849_v6 = vcombine.high %v1498_v1, %v1502_v3  ;;  %v1505_v7 = vld [vmem:[#allocation15 + $0x3c0] sm:$0xff] }
 0x2bb   : > { %v6855_v15 = vcombine.high %v1505_v7, %v1509_v8 }
 0x2bd   : > { %2936 = vmatpush1.bf16.msra.mxu1 %v6790_v9  ;;  %3018 = vmatpush1.bf16.msra.mxu0 %v6792_v10  ;;  %v1506_v9 = vld [vmem:[#allocation15 + $0x3c8] sm:$0xff]  ;;  %v6854_v10 = vcombine.low %v1505_v7, %v1509_v8 }
 0x2be   : > { %2937 = vmatprep.subr.bf16.mxu1 %v6799_v21  ;;  %3019 = vmatprep.subr.bf16.mxu0 %v6801_v25  ;;  %v6856_v19 = vcombine.low %v1506_v9, %v1510_v18  ;;  %v6857_v20 = vcombine.high %v1506_v9, %v1510_v18  ;;  %v8725_v21 = vld [vmem:[#allocation15 + $0x400] sm:$0xff]  ;;  %v8733_v25 = vld [vmem:[#allocation15 + $0x428] sm:$0xff] }
 0x2bf   : > { %v6862_v26 = vcombine.low %v8725_v21, %v8727_v22 }
 0x2c1   : > { %2938 = vmatpush1.bf16.msra.mxu1 %v6798_v23  ;;  %3020 = vmatpush1.bf16.msra.mxu0 %v6800_v24  ;;  %v8729_v23 = vld [vmem:[#allocation15 + $0x408] sm:$0xff]  ;;  %v6863_v24 = vcombine.high %v8725_v21, %v8727_v22 }
 0x2c2   : > { %2939 = vmatprep.subr.bf16.mxu1 %v6807_v29  ;;  %3021 = vmatprep.subr.bf16.mxu0 %v6809_v33  ;;  %v6864_v27 = vcombine.low %v8729_v23, %v8733_v25  ;;  %v6865_v28 = vcombine.high %v8729_v23, %v8733_v25 }
 0x2c5   : > { %2940 = vmatpush1.bf16.msra.mxu1 %v6806_v31  ;;  %3022 = vmatpush1.bf16.msra.mxu0 %v6808_v32 }
 0x2c6   : > { %2941 = vmatprep.subr.bf16.mxu1 %v6815_v37  ;;  %3023 = vmatprep.subr.bf16.mxu0 %v6817_v13 }
 0x2c9   : > { %2942 = vmatpush1.bf16.msra.mxu1 %v6814_v11  ;;  %3024 = vmatpush1.bf16.msra.mxu0 %v6816_v12 }
 0x2ca   : > { %2943 = vmatprep.subr.bf16.mxu1 %v6823_v39  ;;  %3025 = vmatprep.subr.bf16.mxu0 %v6825_v43 }
 0x2cd   : > { %2944 = vmatpush1.bf16.msra.mxu1 %v6822_v41  ;;  %3026 = vmatpush1.bf16.msra.mxu0 %v6824_v42 }
 0x2ce   : > { %2945 = vmatprep.subr.bf16.mxu1 %v6831_v47  ;;  %3027 = vmatprep.subr.bf16.mxu0 %v6833_v51 }
 0x2d1   : > { %2946 = vmatpush1.bf16.msra.mxu1 %v6830_v49  ;;  %3028 = vmatpush1.bf16.msra.mxu0 %v6832_v50  ;;  %v8742_v49 = vsub.s32 2, %v8707_v55  ;;  %v8744_v50 = vld [vmem:[#allocation12] sm:$0xf] }
 0x2d2   : > { %2947 = vmatprep.subr.bf16.mxu1 %v6839_v56  ;;  %3029 = vmatprep.subr.bf16.mxu0 %v6841_v62 }
 0x2d3   : > { %v1319_v62 = vrot.slane %v8744_v50, %v8742_v49 }
 0x2d5   : > { %2948 = vmatpush1.bf16.msra.mxu1 %v6838_v58  ;;  %3030 = vmatpush1.bf16.msra.mxu0 %v6840_v60 }
 0x2d6   : > { %2949 = vmatprep.subr.bf16.mxu1 %v6847_v2  ;;  %3031 = vmatprep.subr.bf16.mxu0 %v6849_v6 }
 0x2d9   : > { %2950 = vmatpush1.bf16.msra.mxu1 %v6846_v4  ;;  %3032 = vmatpush1.bf16.msra.mxu0 %v6848_v5 }
 0x2da   : > { %2951 = vmatprep.subr.bf16.mxu1 %v6855_v15  ;;  %3033 = vmatprep.subr.bf16.mxu0 %v6857_v20 }
 0x2dd   : > { %2952 = vmatpush1.bf16.msra.mxu1 %v6854_v10  ;;  %3034 = vmatpush1.bf16.msra.mxu0 %v6856_v19 }
 0x2de   : > { %2962 = vmatprep.subr.bf16.mxu1 %v6863_v24  ;;  %3044 = vmatprep.subr.bf16.mxu0 %v6865_v28 }
 0x373   : > { %v1193_v29 = vpop.f32.mrb[0].mxu1  ;;  %v1234_v30 = vpop.f32.mrb[4].mxu0 }
 0x374   : > { %v1243_v31 = vrot.slane %v1193_v29, 4  ;;  %v1255_v32 = vrot.slane %v1234_v30, 4  ;;  %v1195_v33 = vpop.f32.mrb[1].mxu1  ;;  %v1236_v34 = vpop.f32.mrb[5].mxu0 }
 0x375   : > { %v1249_v35 = vrot.slane %v1195_v33, 4  ;;  %v1261_v36 = vrot.slane %v1236_v34, 4  ;;  %v1197_v37 = vpop.f32.mrb[2].mxu1  ;;  %v1238_v38 = vpop.f32.mrb[6].mxu0 }
 0x376   : > { %v1244_v11 = vadd.f32 %v1243_v31, %v1193_v29  ;;  %v1256_v12 = vadd.f32 %v1255_v32, %v1234_v30  ;;  %v1198_v13 = vpop.f32.mrb[3].mxu1  ;;  %v1239_v14 = vpop.f32.mrb[7].mxu0 }
 0x377   : > { %v1250_v16 = vadd.f32 %v1249_v35, %v1195_v33  ;;  %v1262_v17 = vadd.f32 %v1261_v36, %v1236_v34 }
 0x378   : > { %v1245_v39 = vrot.slane %v1244_v11, 2  ;;  %v1257_v40 = vrot.slane %v1256_v12, 2 }
 0x379   : > { %v1251_v41 = vrot.slane %v1250_v16, 2  ;;  %v1263_v42 = vrot.slane %v1262_v17, 2 }
 0x37a   : > { %v1246_v43 = vadd.f32 %v1245_v39, %v1244_v11  ;;  %v1258_v44 = vadd.f32 %v1257_v40, %v1256_v12 }
 0x37b   : > { %v1252_v45 = vadd.f32 %v1251_v41, %v1250_v16  ;;  %v1264_v46 = vadd.f32 %v1263_v42, %v1262_v17 }
 0x37c   : > { %v1247_v47 = vrot.slane %v1246_v43, 1  ;;  %v1259_v48 = vrot.slane %v1258_v44, 1 }
 0x37d   : > { %v1253_v51 = vrot.slane %v1252_v45, 1  ;;  %v1265_v52 = vrot.slane %v1264_v46, 1 }
 0x37e   : > { %v1248_v53 = vadd.f32 %v1247_v47, %v1246_v43  ;;  %v1260_v54 = vadd.f32 %v1259_v48, %v1258_v44  ;;  %v8749_v48 = vsub.s32 3, %v8707_v55 }
 0x37f   : > { %v1254_v56 = vadd.f32 %v1253_v51, %v1252_v45  ;;  %v1266_v57 = vadd.f32 %v1265_v52, %v1264_v46  ;;  %v1311_v51 = vrot.slane %v8744_v50, %v8710_v59  ;;  %v1242_v52 = vld [vmem:[#allocation14] sm:$0xf] }
 0x380   : > { %v1267_v58 = vmul.f32 0.125, %v1248_v53  ;;  %v1269_v60 = vmul.f32 0.125, %v1260_v54  ;;  %v1315_v53 = vrot.slane %v8744_v50, %v8713_v61  ;;  %v1323_v54 = vrot.slane %v8744_v50, %v8749_v48 }
 0x381   : > { %v1268_v63 = vmul.f32 0.125, %v1254_v56  ;;  %v1270_v0 = vmul.f32 0.125, %v1266_v57  ;;  %v1348_v57 = vrot.slane %v1242_v52, %v8710_v59 }
 0x382   : > { %v1271_v1 = vsub.f32 %v1193_v29, %v1267_v58  ;;  %v1273_v2 = vsub.f32 %v1234_v30, %v1269_v60  ;;  %v1356_v60 = vrot.slane %v1242_v52, %v8742_v49 }
 0x383   : > { %v1272_v3 = vsub.f32 %v1195_v33, %v1268_v63  ;;  %v1274_v4 = vsub.f32 %v1236_v34, %v1270_v0 }
 0x384   : > { %v1275_v5 = vmul.f32 %v1271_v1, %v1271_v1  ;;  %v1277_v6 = vmul.f32 %v1273_v2, %v1273_v2  ;;  %v1330_v7 = vmul.f32 %v1319_v62, %v1273_v2  ;;  %v1328_v56 = vmul.f32 %v1311_v51, %v1271_v1 }
 0x385   : > { %v1276_v8 = vmul.f32 %v1272_v3, %v1272_v3  ;;  %v1278_v9 = vmul.f32 %v1274_v4, %v1274_v4  ;;  %v1329_v0 = vmul.f32 %v1315_v53, %v1272_v3  ;;  %v1352_v2 = vrot.slane %v1242_v52, %v8713_v61 }
 0x386   : > { %v1279_v10 = vrot.slane %v1275_v5, 4  ;;  %v1291_v15 = vrot.slane %v1277_v6, 4 }
 0x387   : > { %v1285_v18 = vrot.slane %v1276_v8, 4  ;;  %v1297_v19 = vrot.slane %v1278_v9, 4 }
 0x388   : > { %v1280_v20 = vadd.f32 %v1279_v10, %v1275_v5  ;;  %v1292_v24 = vadd.f32 %v1291_v15, %v1277_v6 }
 0x389   : > { %v1286_v28 = vadd.f32 %v1285_v18, %v1276_v8  ;;  %v1298_v31 = vadd.f32 %v1297_v19, %v1278_v9  ;;  %v1331_v8 = vmul.f32 %v1323_v54, %v1274_v4  ;;  %v1360_v9 = vrot.slane %v1242_v52, %v8749_v48  ;;  %v1525_v4 = vld [vmem:[#allocation15 + $0x460] sm:$0xff] }
 0x38a   : > { %v1281_v32 = vrot.slane %v1280_v20, 2  ;;  %v1293_v35 = vrot.slane %v1292_v24, 2  ;;  %v1553_v54 = vld [vmem:[#allocation15 + $0x540] sm:$0xff] }
 0x38b   : > { %v1287_v36 = vrot.slane %v1286_v28, 2  ;;  %v1299_v29 = vrot.slane %v1298_v31, 2 }
 0x38c   : > { %v1282_v30 = vadd.f32 %v1281_v32, %v1280_v20  ;;  %v1294_v33 = vadd.f32 %v1293_v35, %v1292_v24  ;;  %v1521_v32 = vld [vmem:[#allocation15 + $0x440] sm:$0xff]  ;;  %v1522_v35 = vld [vmem:[#allocation15 + $0x448] sm:$0xff] }
 0x38d   : > { %v1288_v34 = vadd.f32 %v1287_v36, %v1286_v28  ;;  %v1300_v37 = vadd.f32 %v1299_v29, %v1298_v31  ;;  %v1526_v36 = vld [vmem:[#allocation15 + $0x468] sm:$0xff] }
 0x38e   : > { %v1283_v38 = vrot.slane %v1282_v30, 1  ;;  %v1295_v11 = vrot.slane %v1294_v33, 1 }
 0x38f   : > { %v1289_v12 = vrot.slane %v1288_v34, 1  ;;  %v1301_v13 = vrot.slane %v1300_v37, 1 }
 0x390   : > { %v1284_v14 = vadd.f32 %v1283_v38, %v1282_v30  ;;  %v1296_v16 = vadd.f32 %v1295_v11, %v1294_v33  ;;  %v6873_v38 = vcombine.high %v1522_v35, %v1526_v36  ;;  %v1533_v11 = vld [vmem:[#allocation15 + $0x4a0] sm:$0xff] }
 0x391   : > { %v1290_v17 = vadd.f32 %v1289_v12, %v1288_v34  ;;  %v1302_v39 = vadd.f32 %v1301_v13, %v1300_v37  ;;  %v1529_v34 = vld [vmem:[#allocation15 + $0x480] sm:$0xff]  ;;  %v6871_v37 = vcombine.high %v1521_v32, %v1525_v4  ;;  %v1530_v12 = vld [vmem:[#allocation15 + $0x488] sm:$0xff] }
 0x392   : > { %v1303_v40 = vmul.f32 0.125, %v1284_v14  ;;  %v1305_v41 = vmul.f32 0.125, %v1296_v16  ;;  %v1534_v13 = vld [vmem:[#allocation15 + $0x4a8] sm:$0xff]  ;;  %v6870_v16 = vcombine.low %v1521_v32, %v1525_v4  ;;  %v6878_v21 = vcombine.low %v1529_v34, %v1533_v11  ;;  %v1581_v4 = vld [vmem:[#allocation15 + $0x620] sm:$0xff] }
 0x393   : > { %v1304_v42 = vmul.f32 0.125, %v1290_v17  ;;  %v1306_v43 = vmul.f32 0.125, %v1302_v39  ;;  %v6872_v17 = vcombine.low %v1522_v35, %v1526_v36  ;;  %v6879_v39 = vcombine.high %v1529_v34, %v1533_v11  ;;  %v1578_v35 = vld [vmem:[#allocation15 + $0x608] sm:$0xff]  ;;  %v1585_v11 = vld [vmem:[#allocation15 + $0x640] sm:$0xff] }
 0x394   : > { %v1332_v44 = vadd.f32 0.8, %v1303_v40  ;;  %v1334_v45 = vadd.f32 0.8, %v1305_v41  ;;  %v6881_v40 = vcombine.high %v1530_v12, %v1534_v13  ;;  %v1537_v41 = vld [vmem:[#allocation15 + $0x4c0] sm:$0xff]  ;;  %v6880_v22 = vcombine.low %v1530_v12, %v1534_v13  ;;  %v1582_v36 = vld [vmem:[#allocation15 + $0x628] sm:$0xff] }
 0x395   : > { %v1333_v46 = vadd.f32 0.8, %v1304_v42  ;;  %v1335_v47 = vadd.f32 0.8, %v1306_v43  ;;  %v1541_v42 = vld [vmem:[#allocation15 + $0x4e0] sm:$0xff]  ;;  %v1538_v43 = vld [vmem:[#allocation15 + $0x4c8] sm:$0xff] }
 0x396   : > { %7730 = vrsqrt.f32 %v1332_v44  ;;  %v1542_v44 = vld [vmem:[#allocation15 + $0x4e8] sm:$0xff]  ;;  %v6887_v23 = vcombine.high %v1537_v41, %v1541_v42  ;;  %v1589_v12 = vld [vmem:[#allocation15 + $0x660] sm:$0xff] }
 0x397   : > { %7732 = vrsqrt.f32 %v1334_v45  ;;  %v6889_v25 = vcombine.high %v1538_v43, %v1542_v44  ;;  %v1546_v45 = vld [vmem:[#allocation15 + $0x508] sm:$0xff]  ;;  %v6888_v51 = vcombine.low %v1538_v43, %v1542_v44  ;;  %v1597_v43 = vld [vmem:[#allocation15 + $0x6a0] sm:$0xff] }
 0x398   : > { %7734 = vrsqrt.f32 %v1333_v46  ;;  %v1550_v46 = vld [vmem:[#allocation15 + $0x528] sm:$0xff] }
 0x399   : > { %7736 = vrsqrt.f32 %v1335_v47  ;;  %v6886_v47 = vcombine.low %v1537_v41, %v1541_v42  ;;  %v6897_v53 = vcombine.high %v1546_v45, %v1550_v46  ;;  %v1586_v13 = vld [vmem:[#allocation15 + $0x648] sm:$0xff]  ;;  %v1593_v42 = vld [vmem:[#allocation15 + $0x680] sm:$0xff] }
 0x39a   : > { %v1594_v44 = vld [vmem:[#allocation15 + $0x688] sm:$0xff] }
 0x3a0   : > { %v7731_v58 = vpop.eup %7730 }
 0x3a1   : > { %v7733_v62 = vpop.eup %7732  ;;  %v1340_v63 = vmul.f32 %v7731_v58, %v1328_v56  ;;  %v1557_v56 = vld [vmem:[#allocation15 + $0x560] sm:$0xff]  ;;  %v1558_v58 = vld [vmem:[#allocation15 + $0x568] sm:$0xff] }
 0x3a2   : > { %v7735_v5 = vpop.eup %7734  ;;  %v1342_v6 = vmul.f32 %v7733_v62, %v1330_v7  ;;  %v6896_v62 = vcombine.low %v1546_v45, %v1550_v46  ;;  %v1605_v45 = vld [vmem:[#allocation15 + $0x6e0] sm:$0xff]  ;;  %v1602_v46 = vld [vmem:[#allocation15 + $0x6c8] sm:$0xff] }
 0x3a3   : > { %v7737_v10 = vpop.eup %7736  ;;  %v1365_v15 = vadd.f32 %v1348_v57, %v1340_v63  ;;  %v1341_v18 = vmul.f32 %v7735_v5, %v1329_v0  ;;  %v1554_v57 = vld [vmem:[#allocation15 + $0x548] sm:$0xff]  ;;  %v6903_v63 = vcombine.high %v1553_v54, %v1557_v56  ;;  %v1565_v5 = vld [vmem:[#allocation15 + $0x5a0] sm:$0xff] }
 0x3a4   : > { %v8761_v50 = vadd.f32 %v1356_v60, %v1342_v6  ;;  %v1343_v1 = vmul.f32 %v7737_v10, %v1331_v8  ;;  %v6905_v0 = vcombine.high %v1554_v57, %v1558_v58  ;;  %v1562_v6 = vld [vmem:[#allocation15 + $0x588] sm:$0xff]  ;;  %v6904_v10 = vcombine.low %v1554_v57, %v1558_v58  ;;  %v1613_v57 = vld [vmem:[#allocation15 + $0x720] sm:$0xff] }
 0x3a5   : > { %v1366_v19 = vadd.f32 %v1352_v2, %v1341_v18  ;;  %vm1369_vm3 = vcmp.gt.f32.partialorder %v1365_v15, 0.0  ;;  %v1373_v20 = vmul.f32 0.2, %v1365_v15  ;;  %v1561_v2 = vld [vmem:[#allocation15 + $0x580] sm:$0xff]  ;;  %v1566_v8 = vld [vmem:[#allocation15 + $0x5a8] sm:$0xff] }
 0x3a6   : > { %v1368_v24 = vadd.f32 %v1360_v9, %v1343_v1  ;;  %v6902_v9 = vcombine.low %v1553_v54, %v1557_v56  ;;  %v6913_v18 = vcombine.high %v1562_v6, %v1566_v8  ;;  %v1569_v1 = vld [vmem:[#allocation15 + $0x5c0] sm:$0xff]  ;;  %v1610_v58 = vld [vmem:[#allocation15 + $0x708] sm:$0xff]  ;;  %vm1371_vm6 = vcmp.gt.f32.partialorder %v8761_v50, 0.0 }
 0x3a7   : > { %vm1370_vm4 = vcmp.gt.f32.partialorder %v1366_v19, 0.0  ;;  %v1374_v28 = vmul.f32 0.2, %v1366_v19  ;;  %v1377_v3 = vsel %vm1369_vm3, %v1365_v15, %v1373_v20  ;;  %v6911_v15 = vcombine.high %v1561_v2, %v1565_v5  ;;  %v1570_v20 = vld [vmem:[#allocation15 + $0x5c8] sm:$0xff]  ;;  %v1609_v56 = vld [vmem:[#allocation15 + $0x700] sm:$0xff] }
 0x3a8   : > { %vm1372_vm5 = vcmp.gt.f32.partialorder %v1368_v24, 0.0  ;;  %v1376_v31 = vmul.f32 0.2, %v1368_v24  ;;  %v8765_v33 = vpack.c.bf16 %v1377_v3, %v1377_v3  ;;  %v6912_v3 = vcombine.low %v1562_v6, %v1566_v8  ;;  %v1621_v6 = vld [vmem:[#allocation15 + $0x760] sm:$0xff]  ;;  %v1618_v8 = vld [vmem:[#allocation15 + $0x748] sm:$0xff] }
 0x3a9   : > { %v1378_v7 = vsel %vm1370_vm4, %v1366_v19, %v1374_v28  ;;  %v1573_v19 = vld [vmem:[#allocation15 + $0x5e0] sm:$0xff]  ;;  %v6910_v28 = vcombine.low %v1561_v2, %v1565_v5 }
 0x3aa   : > { %v8763_v29 = vpack.c.bf16 %v1378_v7, %v1378_v7  ;;  %v1380_v30 = vsel %vm1372_vm5, %v1368_v24, %v1376_v31  ;;  %v1574_v24 = vld [vmem:[#allocation15 + $0x5e8] sm:$0xff]  ;;  %v6919_v31 = vcombine.high %v1569_v1, %v1573_v19  ;;  %v1577_v7 = vld [vmem:[#allocation15 + $0x600] sm:$0xff] }
 0x3ab   : > { %v8771_v14 = vpack.c.bf16 %v1380_v30, %v1380_v30  ;;  %v6921_v32 = vcombine.high %v1570_v20, %v1574_v24  ;;  %v6918_v30 = vcombine.low %v1569_v1, %v1573_v19  ;;  %v6920_v34 = vcombine.low %v1570_v20, %v1574_v24  ;;  %v1617_v5 = vld [vmem:[#allocation15 + $0x740] sm:$0xff]  ;;  %v1626_v24 = vld [vmem:[#allocation15 + $0x788] sm:$0xff] }
 0x3ac   : > { %2953 = vmatprep.mubr.bf16.mxu1 %v8763_v29  ;;  %3035 = vmatprep.mubr.bf16.mxu0 %v8763_v29  ;;  %v1625_v19 = vld [vmem:[#allocation15 + $0x780] sm:$0xff] }
 0x3ad   : > { %2954 = vmatmul.mubr.bf16.vlgmr.msra.gmra.mrb[4].mxu1 %v8765_v33  ;;  %3036 = vmatmul.mubr.bf16.vlgmr.msra.gmra.mrb[8].mxu0 %v8765_v33  ;;  %v1629_v20 = vld [vmem:[#allocation15 + $0x7a0] sm:$0xff] }
 0x3ae   : > { %2963 = vmatpush1.bf16.msra.mxu1 %v6862_v26  ;;  %3045 = vmatpush1.bf16.msra.mxu0 %v6864_v27  ;;  %v1545_v26 = vld [vmem:[#allocation15 + $0x500] sm:$0xff] }
 0x3af   : > { %2994 = vmatprep.mubr.bf16.mxu1 %v8771_v14  ;;  %3076 = vmatprep.mubr.bf16.mxu0 %v8771_v14  ;;  %v1549_v27 = vld [vmem:[#allocation15 + $0x520] sm:$0xff] }
 0x3b0   : > { %2964 = vmatprep.subr.bf16.mxu1 %v6871_v37  ;;  %3046 = vmatprep.subr.bf16.mxu0 %v6873_v38  ;;  %v6895_v52 = vcombine.high %v1545_v26, %v1549_v27  ;;  %v6894_v60 = vcombine.low %v1545_v26, %v1549_v27  ;;  %v6927_v37 = vcombine.high %v1577_v7, %v1581_v4  ;;  %v1601_v27 = vld [vmem:[#allocation15 + $0x6c0] sm:$0xff] }
 0x3b1   : > { %v6929_v38 = vcombine.high %v1578_v35, %v1582_v36 }
 0x3b2   : > { %2965 = vmatpush1.bf16.msra.mxu1 %v6870_v16  ;;  %3047 = vmatpush1.bf16.msra.mxu0 %v6872_v17  ;;  %v1590_v16 = vld [vmem:[#allocation15 + $0x668] sm:$0xff]  ;;  %v6926_v17 = vcombine.low %v1577_v7, %v1581_v4  ;;  %v1633_v4 = vld [vmem:[#allocation15 + $0x7c0] sm:$0xff] }
 0x3b3   : > { %2966 = vmatprep.subr.bf16.mxu1 %v6879_v39  ;;  %3048 = vmatprep.subr.bf16.mxu0 %v6881_v40  ;;  %v6928_v39 = vcombine.low %v1578_v35, %v1582_v36  ;;  %v6935_v40 = vcombine.high %v1585_v11, %v1589_v12  ;;  %v6937_v41 = vcombine.high %v1586_v13, %v1590_v16  ;;  %v1637_v35 = vld [vmem:[#allocation15 + $0x7e0] sm:$0xff]  ;;  %v1634_v36 = vld [vmem:[#allocation15 + $0x7c8] sm:$0xff] }
 0x3b6   : > { %2967 = vmatpush1.bf16.msra.mxu1 %v6878_v21  ;;  %3049 = vmatpush1.bf16.msra.mxu0 %v6880_v22  ;;  %v1598_v21 = vld [vmem:[#allocation15 + $0x6a8] sm:$0xff]  ;;  %v6934_v22 = vcombine.low %v1585_v11, %v1589_v12  ;;  %v1387_v12 = vld [vmem:[#allocation15 + $0x10] sm:$0xff] }
 0x3b7   : > { %2968 = vmatprep.subr.bf16.mxu1 %v6887_v23  ;;  %3050 = vmatprep.subr.bf16.mxu0 %v6889_v25  ;;  %v6936_v23 = vcombine.low %v1586_v13, %v1590_v16  ;;  %v6943_v25 = vcombine.high %v1593_v42, %v1597_v43  ;;  %v6945_v26 = vcombine.high %v1594_v44, %v1598_v21  ;;  %v1375_v13 = vmul.f32 0.2, %v8761_v50  ;;  %v1391_v16 = vld [vmem:[#allocation15 + $0x30] sm:$0xff] }
 0x3ba   : > { %2969 = vmatpush1.bf16.msra.mxu1 %v6886_v47  ;;  %3051 = vmatpush1.bf16.msra.mxu0 %v6888_v51  ;;  %v1606_v47 = vld [vmem:[#allocation15 + $0x6e8] sm:$0xff]  ;;  %v6942_v51 = vcombine.low %v1593_v42, %v1597_v43  ;;  %v6739_v42 = vcombine.high %v1387_v12, %v1391_v16 }
 0x3bb   : > { %2970 = vmatprep.subr.bf16.mxu1 %v6895_v52  ;;  %3052 = vmatprep.subr.bf16.mxu0 %v6897_v53  ;;  %v6944_v52 = vcombine.low %v1594_v44, %v1598_v21  ;;  %v6951_v53 = vcombine.high %v1601_v27, %v1605_v45  ;;  %v6953_v54 = vcombine.high %v1602_v46, %v1606_v47  ;;  %v1395_v21 = vld [vmem:[#allocation15 + $0x50] sm:$0xff] }
 0x3bc   : > { %v1379_v44 = vsel %vm1371_vm6, %v8761_v50, %v1375_v13  ;;  %v1404_v50 = vld [vmem:[#allocation15 + $0x98] sm:$0xff] }
 0x3be   : > { %2971 = vmatpush1.bf16.msra.mxu1 %v6894_v60  ;;  %3053 = vmatpush1.bf16.msra.mxu0 %v6896_v62  ;;  %v1614_v60 = vld [vmem:[#allocation15 + $0x728] sm:$0xff]  ;;  %v6950_v62 = vcombine.low %v1601_v27, %v1605_v45  ;;  %v8784_v27 = vpack.c.bf16 %v1379_v44, %v1379_v44 }
 0x3bf   : > { %2972 = vmatprep.subr.bf16.mxu1 %v6903_v63  ;;  %3054 = vmatprep.subr.bf16.mxu0 %v6905_v0  ;;  %v6952_v63 = vcombine.low %v1602_v46, %v1606_v47  ;;  %v6959_v0 = vcombine.high %v1609_v56, %v1613_v57  ;;  %v6961_v2 = vcombine.high %v1610_v58, %v1614_v60 }
 0x3c2   : > { %2973 = vmatpush1.bf16.msra.mxu1 %v6902_v9  ;;  %3055 = vmatpush1.bf16.msra.mxu0 %v6904_v10  ;;  %v1622_v9 = vld [vmem:[#allocation15 + $0x768] sm:$0xff]  ;;  %v6958_v10 = vcombine.low %v1609_v56, %v1613_v57 }
 0x3c3   : > { %2974 = vmatprep.subr.bf16.mxu1 %v6911_v15  ;;  %3056 = vmatprep.subr.bf16.mxu0 %v6913_v18  ;;  %v6960_v15 = vcombine.low %v1610_v58, %v1614_v60  ;;  %v6967_v18 = vcombine.high %v1617_v5, %v1621_v6  ;;  %v6969_v1 = vcombine.high %v1618_v8, %v1622_v9  ;;  %v1411_v60 = vld [vmem:[#allocation15 + $0xd0] sm:$0xff] }
 0x3c6   : > { %2975 = vmatpush1.bf16.msra.mxu1 %v6910_v28  ;;  %3057 = vmatpush1.bf16.msra.mxu0 %v6912_v3  ;;  %v1630_v28 = vld [vmem:[#allocation15 + $0x7a8] sm:$0xff]  ;;  %v6966_v3 = vcombine.low %v1617_v5, %v1621_v6 }
 0x3c7   : > { %2976 = vmatprep.subr.bf16.mxu1 %v6919_v31  ;;  %3058 = vmatprep.subr.bf16.mxu0 %v6921_v32  ;;  %v6968_v31 = vcombine.low %v1618_v8, %v1622_v9  ;;  %v6975_v32 = vcombine.high %v1625_v19, %v1629_v20  ;;  %v6977_v7 = vcombine.high %v1626_v24, %v1630_v28  ;;  %v1419_v9 = vld [vmem:[#allocation15 + $0x110] sm:$0xff] }
 0x3ca   : > { %2977 = vmatpush1.bf16.msra.mxu1 %v6918_v30  ;;  %3059 = vmatpush1.bf16.msra.mxu0 %v6920_v34  ;;  %v1638_v30 = vld [vmem:[#allocation15 + $0x7e8] sm:$0xff]  ;;  %v6974_v34 = vcombine.low %v1625_v19, %v1629_v20 }
 0x3cb   : > { %2978 = vmatprep.subr.bf16.mxu1 %v6927_v37  ;;  %3060 = vmatprep.subr.bf16.mxu0 %v6929_v38  ;;  %v6976_v37 = vcombine.low %v1626_v24, %v1630_v28  ;;  %v6983_v38 = vcombine.high %v1633_v4, %v1637_v35  ;;  %v6985_v11 = vcombine.high %v1634_v36, %v1638_v30  ;;  %v1427_v24 = vld [vmem:[#allocation15 + $0x150] sm:$0xff] }
 0x3cc   : > { %v1431_v28 = vld [vmem:[#allocation15 + $0x170] sm:$0xff] }
 0x3ce   : > { %2979 = vmatpush1.bf16.msra.mxu1 %v6926_v17  ;;  %3061 = vmatpush1.bf16.msra.mxu0 %v6928_v39  ;;  %v1388_v17 = vld [vmem:[#allocation15 + $0x18] sm:$0xff] }
 0x3cf   : > { %2980 = vmatprep.subr.bf16.mxu1 %v6935_v40  ;;  %3062 = vmatprep.subr.bf16.mxu0 %v6937_v41  ;;  %v1392_v39 = vld [vmem:[#allocation15 + $0x38] sm:$0xff]  ;;  %v6982_v40 = vcombine.low %v1633_v4, %v1637_v35  ;;  %v6984_v41 = vcombine.low %v1634_v36, %v1638_v30  ;;  %v6779_v4 = vcombine.high %v1427_v24, %v1431_v28  ;;  %v1435_v36 = vld [vmem:[#allocation15 + $0x190] sm:$0xff] }
 0x3d0   : > { %v6741_v43 = vcombine.high %v1388_v17, %v1392_v39  ;;  %v6740_v45 = vcombine.low %v1388_v17, %v1392_v39  ;;  %v1439_v30 = vld [vmem:[#allocation15 + $0x1b0] sm:$0xff]  ;;  %v1444_v39 = vld [vmem:[#allocation15 + $0x1d8] sm:$0xff] }
 0x3d1   : > { %v1447_v17 = vld [vmem:[#allocation15 + $0x1f0] sm:$0xff] }
 0x3d2   : > { %2981 = vmatpush1.bf16.msra.mxu1 %v6934_v22  ;;  %3063 = vmatpush1.bf16.msra.mxu0 %v6936_v23  ;;  %v1399_v22 = vld [vmem:[#allocation15 + $0x70] sm:$0xff]  ;;  %v1396_v23 = vld [vmem:[#allocation15 + $0x58] sm:$0xff] }
 0x3d3   : > { %2982 = vmatprep.subr.bf16.mxu1 %v6943_v25  ;;  %3064 = vmatprep.subr.bf16.mxu0 %v6945_v26  ;;  %v1400_v25 = vld [vmem:[#allocation15 + $0x78] sm:$0xff]  ;;  %v6738_v26 = vcombine.low %v1387_v12, %v1391_v16  ;;  %v6747_v46 = vcombine.high %v1395_v21, %v1399_v22  ;;  %v6787_v12 = vcombine.high %v1435_v36, %v1439_v30  ;;  %v1443_v16 = vld [vmem:[#allocation15 + $0x1d0] sm:$0xff] }
 0x3d4   : > { %v6749_v47 = vcombine.high %v1396_v23, %v1400_v25  ;;  %v6748_v56 = vcombine.low %v1396_v23, %v1400_v25  ;;  %v1452_v23 = vld [vmem:[#allocation15 + $0x218] sm:$0xff] }
 0x3d5   : > { %v1456_v25 = vld [vmem:[#allocation15 + $0x238] sm:$0xff] }
 0x3d6   : > { %2983 = vmatpush1.bf16.msra.mxu1 %v6942_v51  ;;  %3065 = vmatpush1.bf16.msra.mxu0 %v6944_v52  ;;  %v1403_v51 = vld [vmem:[#allocation15 + $0x90] sm:$0xff] }
 0x3d7   : > { %2984 = vmatprep.subr.bf16.mxu1 %v6951_v53  ;;  %3066 = vmatprep.subr.bf16.mxu0 %v6953_v54  ;;  %v1407_v52 = vld [vmem:[#allocation15 + $0xb0] sm:$0xff]  ;;  %v1408_v53 = vld [vmem:[#allocation15 + $0xb8] sm:$0xff]  ;;  %v6746_v54 = vcombine.low %v1395_v21, %v1399_v22 }
 0x3d8   : > { %v6755_v57 = vcombine.high %v1403_v51, %v1407_v52  ;;  %v6757_v58 = vcombine.high %v1404_v50, %v1408_v53  ;;  %v6756_v5 = vcombine.low %v1404_v50, %v1408_v53  ;;  %v1451_v21 = vld [vmem:[#allocation15 + $0x210] sm:$0xff]  ;;  %v1460_v50 = vld [vmem:[#allocation15 + $0x258] sm:$0xff] }
 0x3d9   : > { %v1455_v22 = vld [vmem:[#allocation15 + $0x230] sm:$0xff]  ;;  %v1464_v53 = vld [vmem:[#allocation15 + $0x278] sm:$0xff] }
 0x3da   : > { %2985 = vmatpush1.bf16.msra.mxu1 %v6950_v62  ;;  %3067 = vmatpush1.bf16.msra.mxu0 %v6952_v63  ;;  %v1415_v62 = vld [vmem:[#allocation15 + $0xf0] sm:$0xff]  ;;  %v1412_v63 = vld [vmem:[#allocation15 + $0xd8] sm:$0xff] }
 0x3db   : > { %2986 = vmatprep.subr.bf16.mxu1 %v6959_v0  ;;  %3068 = vmatprep.subr.bf16.mxu0 %v6961_v2  ;;  %v1416_v0 = vld [vmem:[#allocation15 + $0xf8] sm:$0xff]  ;;  %v6754_v2 = vcombine.low %v1403_v51, %v1407_v52  ;;  %v6763_v6 = vcombine.high %v1411_v60, %v1415_v62  ;;  %v1459_v51 = vld [vmem:[#allocation15 + $0x250] sm:$0xff] }
 0x3dc   : > { %v6765_v8 = vcombine.high %v1412_v63, %v1416_v0  ;;  %v1463_v52 = vld [vmem:[#allocation15 + $0x270] sm:$0xff] }
 0x3de   : > { %2987 = vmatpush1.bf16.msra.mxu1 %v6958_v10  ;;  %3069 = vmatpush1.bf16.msra.mxu0 %v6960_v15  ;;  %v1423_v10 = vld [vmem:[#allocation15 + $0x130] sm:$0xff]  ;;  %v1424_v15 = vld [vmem:[#allocation15 + $0x138] sm:$0xff] }
 0x3df   : > { %2988 = vmatprep.subr.bf16.mxu1 %v6967_v18  ;;  %3070 = vmatprep.subr.bf16.mxu0 %v6969_v1  ;;  %v6762_v18 = vcombine.low %v1411_v60, %v1415_v62  ;;  %v6764_v1 = vcombine.low %v1412_v63, %v1416_v0  ;;  %v6771_v19 = vcombine.high %v1419_v9, %v1423_v10  ;;  %v1467_v60 = vld [vmem:[#allocation15 + $0x290] sm:$0xff]  ;;  %v1468_v63 = vld [vmem:[#allocation15 + $0x298] sm:$0xff] }
 0x3e0   : > { %v1471_v62 = vld [vmem:[#allocation15 + $0x2b0] sm:$0xff]  ;;  %v1472_v0 = vld [vmem:[#allocation15 + $0x2b8] sm:$0xff] }
 0x3e2   : > { %2989 = vmatpush1.bf16.msra.mxu1 %v6966_v3  ;;  %3071 = vmatpush1.bf16.msra.mxu0 %v6968_v31  ;;  %v1428_v3 = vld [vmem:[#allocation15 + $0x158] sm:$0xff] }
 0x3e3   : > { %2990 = vmatprep.subr.bf16.mxu1 %v6975_v32  ;;  %3072 = vmatprep.subr.bf16.mxu0 %v6977_v7  ;;  %v1432_v31 = vld [vmem:[#allocation15 + $0x178] sm:$0xff]  ;;  %v6770_v32 = vcombine.low %v1419_v9, %v1423_v10  ;;  %v1475_v9 = vld [vmem:[#allocation15 + $0x2d0] sm:$0xff] }
 0x3e4   : > { %v6781_v35 = vcombine.high %v1428_v3, %v1432_v31  ;;  %v1479_v10 = vld [vmem:[#allocation15 + $0x2f0] sm:$0xff] }
 0x3e6   : > { %2991 = vmatpush1.bf16.msra.mxu1 %v6974_v34  ;;  %3073 = vmatpush1.bf16.msra.mxu0 %v6976_v37  ;;  %v1436_v34 = vld [vmem:[#allocation15 + $0x198] sm:$0xff] }
 0x3e7   : > { %2992 = vmatprep.subr.bf16.mxu1 %v6983_v38  ;;  %3074 = vmatprep.subr.bf16.mxu0 %v6985_v11  ;;  %v1440_v37 = vld [vmem:[#allocation15 + $0x1b8] sm:$0xff]  ;;  %v6778_v38 = vcombine.low %v1427_v24, %v1431_v28  ;;  %v6780_v11 = vcombine.low %v1428_v3, %v1432_v31  ;;  %v1483_v24 = vld [vmem:[#allocation15 + $0x310] sm:$0xff] }
 0x3e8   : > { %v6789_v13 = vcombine.high %v1436_v34, %v1440_v37  ;;  %v1487_v28 = vld [vmem:[#allocation15 + $0x330] sm:$0xff]  ;;  %v1484_v3 = vld [vmem:[#allocation15 + $0x318] sm:$0xff] }
 0x3e9   : > { %v1488_v31 = vld [vmem:[#allocation15 + $0x338] sm:$0xff] }
 0x3ea   : > { %2993 = vmatpush1.bf16.msra.mxu1 %v6982_v40  ;;  %3075 = vmatpush1.bf16.msra.mxu0 %v6984_v41  ;;  %v1448_v40 = vld [vmem:[#allocation15 + $0x1f8] sm:$0xff]  ;;  %v6786_v41 = vcombine.low %v1435_v36, %v1439_v30  ;;  %v1491_v36 = vld [vmem:[#allocation15 + $0x350] sm:$0xff] }
 0x3eb   : > { %3085 = vmatprep.subr.bf16.mxu1 %v6739_v42  ;;  %3167 = vmatprep.subr.bf16.mxu0 %v6741_v43  ;;  %v6788_v42 = vcombine.low %v1436_v34, %v1440_v37  ;;  %v6795_v43 = vcombine.high %v1443_v16, %v1447_v17  ;;  %v6797_v44 = vcombine.high %v1444_v39, %v1448_v40  ;;  %v1495_v30 = vld [vmem:[#allocation15 + $0x370] sm:$0xff]  ;;  %v1492_v34 = vld [vmem:[#allocation15 + $0x358] sm:$0xff] }
 0x3ec   : > { %v1496_v37 = vld [vmem:[#allocation15 + $0x378] sm:$0xff] }
 0x3ed   : > { %2995 = vmatmul.mubr.bf16.vlgmr.msra.gmra.mrb[4].mxu1 %v8784_v27  ;;  %3077 = vmatmul.mubr.bf16.vlgmr.msra.gmra.mrb[8].mxu0 %v8784_v27 }
 0x3ee   : > { %3086 = vmatpush1.bf16.msra.mxu1 %v6738_v26  ;;  %3117 = vmatprep.mubr.bf16.mxu1 %v8763_v29  ;;  %v6794_v26 = vcombine.low %v1443_v16, %v1447_v17  ;;  %v1499_v16 = vld [vmem:[#allocation15 + $0x390] sm:$0xff] }
 0x3ef   : > { %3168 = vmatpush1.bf16.msra.mxu0 %v6740_v45  ;;  %3199 = vmatprep.mubr.bf16.mxu0 %v8763_v29  ;;  %v1420_v29 = vld [vmem:[#allocation15 + $0x118] sm:$0xff]  ;;  %v6796_v45 = vcombine.low %v1444_v39, %v1448_v40  ;;  %v1503_v17 = vld [vmem:[#allocation15 + $0x3b0] sm:$0xff] }
 0x3f0   : > { %3087 = vmatprep.subr.bf16.mxu1 %v6747_v46  ;;  %3169 = vmatprep.subr.bf16.mxu0 %v6749_v47  ;;  %v6773_v20 = vcombine.high %v1420_v29, %v1424_v15  ;;  %v6772_v7 = vcombine.low %v1420_v29, %v1424_v15  ;;  %v6803_v46 = vcombine.high %v1451_v21, %v1455_v22  ;;  %v1476_v29 = vld [vmem:[#allocation15 + $0x2d8] sm:$0xff] }
 0x3f1   : > { %v6805_v47 = vcombine.high %v1452_v23, %v1456_v25  ;;  %v1480_v15 = vld [vmem:[#allocation15 + $0x2f8] sm:$0xff] }
 0x3f2   : > { %3088 = vmatpush1.bf16.msra.mxu1 %v6746_v54  ;;  %v6802_v54 = vcombine.low %v1451_v21, %v1455_v22  ;;  %v1500_v39 = vld [vmem:[#allocation15 + $0x398] sm:$0xff]  ;;  %v1507_v21 = vld [vmem:[#allocation15 + $0x3d0] sm:$0xff] }
 0x3f3   : > { %3170 = vmatpush1.bf16.msra.mxu0 %v6748_v56  ;;  %3089 = vmatprep.subr.bf16.mxu1 %v6755_v57  ;;  %v6804_v56 = vcombine.low %v1452_v23, %v1456_v25  ;;  %v6811_v57 = vcombine.high %v1459_v51, %v1463_v52  ;;  %v1504_v40 = vld [vmem:[#allocation15 + $0x3b8] sm:$0xff]  ;;  %v1511_v22 = vld [vmem:[#allocation15 + $0x3f0] sm:$0xff] }
 0x3f4   : > { %3171 = vmatprep.subr.bf16.mxu0 %v6757_v58  ;;  %v6813_v58 = vcombine.high %v1460_v50, %v1464_v53  ;;  %v1508_v23 = vld [vmem:[#allocation15 + $0x3d8] sm:$0xff] }
 0x3f5   : > { %v1512_v25 = vld [vmem:[#allocation15 + $0x3f8] sm:$0xff] }
 0x3f6   : > { %3090 = vmatpush1.bf16.msra.mxu1 %v6754_v2  ;;  %v6810_v2 = vcombine.low %v1459_v51, %v1463_v52  ;;  %v1515_v51 = vld [vmem:[#allocation15 + $0x410] sm:$0xff] }
 0x3f7   : > { %3172 = vmatpush1.bf16.msra.mxu0 %v6756_v5  ;;  %3091 = vmatprep.subr.bf16.mxu1 %v6763_v6  ;;  %v6812_v5 = vcombine.low %v1460_v50, %v1464_v53  ;;  %v6819_v6 = vcombine.high %v1467_v60, %v1471_v62  ;;  %v1519_v52 = vld [vmem:[#allocation15 + $0x430] sm:$0xff]  ;;  %v1516_v50 = vld [vmem:[#allocation15 + $0x418] sm:$0xff] }
 0x3f8   : > { %3173 = vmatprep.subr.bf16.mxu0 %v6765_v8  ;;  %v6821_v8 = vcombine.high %v1468_v63, %v1472_v0  ;;  %v1520_v53 = vld [vmem:[#allocation15 + $0x438] sm:$0xff] }
 0x3fa   : > { %3092 = vmatpush1.bf16.msra.mxu1 %v6762_v18  ;;  %v6818_v18 = vcombine.low %v1467_v60, %v1471_v62  ;;  %v1523_v60 = vld [vmem:[#allocation15 + $0x450] sm:$0xff] }
 0x3fb   : > { %3174 = vmatpush1.bf16.msra.mxu0 %v6764_v1  ;;  %3093 = vmatprep.subr.bf16.mxu1 %v6771_v19  ;;  %v6820_v1 = vcombine.low %v1468_v63, %v1472_v0  ;;  %v6827_v19 = vcombine.high %v1475_v9, %v1479_v10  ;;  %v1527_v62 = vld [vmem:[#allocation15 + $0x470] sm:$0xff]  ;;  %v6866_v63 = vcombine.low %v1515_v51, %v1519_v52  ;;  %v1524_v0 = vld [vmem:[#allocation15 + $0x458] sm:$0xff] }
 0x3fc   : > { %3175 = vmatprep.subr.bf16.mxu0 %v6773_v20  ;;  %v6829_v20 = vcombine.high %v1476_v29, %v1480_v15 }
 0x3fe   : > { %3094 = vmatpush1.bf16.msra.mxu1 %v6770_v32  ;;  %v6826_v32 = vcombine.low %v1475_v9, %v1479_v10  ;;  %v1535_v9 = vld [vmem:[#allocation15 + $0x4b0] sm:$0xff] }
 0x3ff   : > { %3176 = vmatpush1.bf16.msra.mxu0 %v6772_v7  ;;  %3095 = vmatprep.subr.bf16.mxu1 %v6779_v4  ;;  %v6828_v7 = vcombine.low %v1476_v29, %v1480_v15  ;;  %v6835_v4 = vcombine.high %v1483_v24, %v1487_v28  ;;  %v1532_v29 = vld [vmem:[#allocation15 + $0x498] sm:$0xff] }
 0x400   : > { %3177 = vmatprep.subr.bf16.mxu0 %v6781_v35  ;;  %v6837_v35 = vcombine.high %v1484_v3, %v1488_v31  ;;  %v1536_v15 = vld [vmem:[#allocation15 + $0x4b8] sm:$0xff] }
 0x402   : > { %3096 = vmatpush1.bf16.msra.mxu1 %v6778_v38  ;;  %v6834_v38 = vcombine.low %v1483_v24, %v1487_v28  ;;  %v1539_v24 = vld [vmem:[#allocation15 + $0x4d0] sm:$0xff] }
 0x403   : > { %3178 = vmatpush1.bf16.msra.mxu0 %v6780_v11  ;;  %3097 = vmatprep.subr.bf16.mxu1 %v6787_v12  ;;  %v6836_v11 = vcombine.low %v1484_v3, %v1488_v31  ;;  %v6843_v12 = vcombine.high %v1491_v36, %v1495_v30  ;;  %v1543_v28 = vld [vmem:[#allocation15 + $0x4f0] sm:$0xff]  ;;  %v1540_v3 = vld [vmem:[#allocation15 + $0x4d8] sm:$0xff] }
 0x404   : > { %3179 = vmatprep.subr.bf16.mxu0 %v6789_v13  ;;  %v6845_v13 = vcombine.high %v1492_v34, %v1496_v37  ;;  %v1544_v31 = vld [vmem:[#allocation15 + $0x4f8] sm:$0xff] }
 0x406   : > { %3098 = vmatpush1.bf16.msra.mxu1 %v6786_v41  ;;  %v6842_v41 = vcombine.low %v1491_v36, %v1495_v30  ;;  %v1551_v36 = vld [vmem:[#allocation15 + $0x530] sm:$0xff]  ;;  %v1548_v30 = vld [vmem:[#allocation15 + $0x518] sm:$0xff] }
 0x407   : > { %3180 = vmatpush1.bf16.msra.mxu0 %v6788_v42  ;;  %3099 = vmatprep.subr.bf16.mxu1 %v6795_v43  ;;  %v6844_v42 = vcombine.low %v1492_v34, %v1496_v37  ;;  %v6851_v43 = vcombine.high %v1499_v16, %v1503_v17  ;;  %v1552_v34 = vld [vmem:[#allocation15 + $0x538] sm:$0xff]  ;;  %v6892_v37 = vcombine.low %v1540_v3, %v1544_v31 }
 0x408   : > { %3181 = vmatprep.subr.bf16.mxu0 %v6797_v44  ;;  %v6853_v44 = vcombine.high %v1500_v39, %v1504_v40 }
 0x40a   : > { %3100 = vmatpush1.bf16.msra.mxu1 %v6794_v26  ;;  %v6850_v26 = vcombine.low %v1499_v16, %v1503_v17  ;;  %v1556_v16 = vld [vmem:[#allocation15 + $0x558] sm:$0xff] }
 0x40b   : > { %3182 = vmatpush1.bf16.msra.mxu0 %v6796_v45  ;;  %3101 = vmatprep.subr.bf16.mxu1 %v6803_v46  ;;  %v6852_v45 = vcombine.low %v1500_v39, %v1504_v40  ;;  %v6859_v46 = vcombine.high %v1507_v21, %v1511_v22  ;;  %v1560_v17 = vld [vmem:[#allocation15 + $0x578] sm:$0xff]  ;;  %v6900_v40 = vcombine.low %v1548_v30, %v1552_v34 }
 0x40c   : > { %3183 = vmatprep.subr.bf16.mxu0 %v6805_v47  ;;  %v6861_v47 = vcombine.high %v1508_v23, %v1512_v25 }
 0x40e   : > { %3102 = vmatpush1.bf16.msra.mxu1 %v6802_v54  ;;  %v6858_v54 = vcombine.low %v1507_v21, %v1511_v22  ;;  %v1564_v21 = vld [vmem:[#allocation15 + $0x598] sm:$0xff] }
 0x40f   : > { %3184 = vmatpush1.bf16.msra.mxu0 %v6804_v56  ;;  %3103 = vmatprep.subr.bf16.mxu1 %v6811_v57  ;;  %v6860_v56 = vcombine.low %v1508_v23, %v1512_v25  ;;  %v6867_v57 = vcombine.high %v1515_v51, %v1519_v52  ;;  %v1568_v22 = vld [vmem:[#allocation15 + $0x5b8] sm:$0xff]  ;;  %v6908_v25 = vcombine.low %v1556_v16, %v1560_v17 }
 0x410   : > { %3185 = vmatprep.subr.bf16.mxu0 %v6813_v58  ;;  %v6869_v58 = vcombine.high %v1516_v50, %v1520_v53  ;;  %v1572_v51 = vld [vmem:[#allocation15 + $0x5d8] sm:$0xff] }
 0x411   : > { %v1576_v52 = vld [vmem:[#allocation15 + $0x5f8] sm:$0xff] }
 0x412   : > { %3104 = vmatpush1.bf16.msra.mxu1 %v6810_v2  ;;  %v1528_v2 = vld [vmem:[#allocation15 + $0x478] sm:$0xff] }
 0x413   : > { %3186 = vmatpush1.bf16.msra.mxu0 %v6812_v5  ;;  %3105 = vmatprep.subr.bf16.mxu1 %v6819_v6  ;;  %v6868_v5 = vcombine.low %v1516_v50, %v1520_v53  ;;  %v6875_v6 = vcombine.high %v1523_v60, %v1527_v62  ;;  %v6877_v10 = vcombine.high %v1524_v0, %v1528_v2 }
 0x414   : > { %3187 = vmatprep.subr.bf16.mxu0 %v6821_v8  ;;  %v1531_v8 = vld [vmem:[#allocation15 + $0x490] sm:$0xff]  ;;  %v6916_v53 = vcombine.low %v1564_v21, %v1568_v22 }
 0x416   : > { %3106 = vmatpush1.bf16.msra.mxu1 %v6818_v18  ;;  %v6874_v18 = vcombine.low %v1523_v60, %v1527_v62  ;;  %v1580_v60 = vld [vmem:[#allocation15 + $0x618] sm:$0xff] }
 0x417   : > { %3188 = vmatpush1.bf16.msra.mxu0 %v6820_v1  ;;  %3107 = vmatprep.subr.bf16.mxu1 %v6827_v19  ;;  %v6876_v1 = vcombine.low %v1524_v0, %v1528_v2  ;;  %v6883_v19 = vcombine.high %v1531_v8, %v1535_v9  ;;  %v1584_v62 = vld [vmem:[#allocation15 + $0x638] sm:$0xff]  ;;  %v6924_v0 = vcombine.low %v1572_v51, %v1576_v52 }
 0x418   : > { %3189 = vmatprep.subr.bf16.mxu0 %v6829_v20  ;;  %v6885_v20 = vcombine.high %v1532_v29, %v1536_v15 }
 0x41a   : > { %3108 = vmatpush1.bf16.msra.mxu1 %v6826_v32  ;;  %v6882_v32 = vcombine.low %v1531_v8, %v1535_v9  ;;  %v1591_v8 = vld [vmem:[#allocation15 + $0x670] sm:$0xff]  ;;  %v1588_v9 = vld [vmem:[#allocation15 + $0x658] sm:$0xff] }
 0x41b   : > { %3190 = vmatpush1.bf16.msra.mxu0 %v6828_v7  ;;  %3109 = vmatprep.subr.bf16.mxu1 %v6835_v4  ;;  %v6891_v7 = vcombine.high %v1539_v24, %v1543_v28  ;;  %v6893_v4 = vcombine.high %v1540_v3, %v1544_v31 }
 0x41c   : > { %3191 = vmatprep.subr.bf16.mxu0 %v6837_v35  ;;  %v1547_v35 = vld [vmem:[#allocation15 + $0x510] sm:$0xff] }
 0x41d   : > { %v6898_v39 = vcombine.low %v1547_v35, %v1551_v36 }
 0x41e   : > { %3110 = vmatpush1.bf16.msra.mxu1 %v6834_v38  ;;  %v6899_v38 = vcombine.high %v1547_v35, %v1551_v36  ;;  %v1604_v35 = vld [vmem:[#allocation15 + $0x6d8] sm:$0xff] }
 0x41f   : > { %3192 = vmatpush1.bf16.msra.mxu0 %v6836_v11  ;;  %3111 = vmatprep.subr.bf16.mxu1 %v6843_v12  ;;  %v6901_v11 = vcombine.high %v1548_v30, %v1552_v34  ;;  %v1555_v12 = vld [vmem:[#allocation15 + $0x550] sm:$0xff]  ;;  %v1608_v36 = vld [vmem:[#allocation15 + $0x6f8] sm:$0xff] }
 0x420   : > { %3193 = vmatprep.subr.bf16.mxu0 %v6845_v13  ;;  %v1559_v13 = vld [vmem:[#allocation15 + $0x570] sm:$0xff] }
 0x421   : > { %v6906_v23 = vcombine.low %v1555_v12, %v1559_v13 }
 0x422   : > { %3112 = vmatpush1.bf16.msra.mxu1 %v6842_v41  ;;  %v6907_v41 = vcombine.high %v1555_v12, %v1559_v13  ;;  %v1612_v12 = vld [vmem:[#allocation15 + $0x718] sm:$0xff] }
 0x423   : > { %3194 = vmatpush1.bf16.msra.mxu0 %v6844_v42  ;;  %3113 = vmatprep.subr.bf16.mxu1 %v6851_v43  ;;  %v6909_v42 = vcombine.high %v1556_v16, %v1560_v17  ;;  %v1563_v43 = vld [vmem:[#allocation15 + $0x590] sm:$0xff]  ;;  %v1616_v13 = vld [vmem:[#allocation15 + $0x738] sm:$0xff]  ;;  %v6956_v17 = vcombine.low %v1604_v35, %v1608_v36 }
 0x424   : > { %3195 = vmatprep.subr.bf16.mxu0 %v6853_v44  ;;  %v1567_v44 = vld [vmem:[#allocation15 + $0x5b0] sm:$0xff] }
 0x425   : > { %v6914_v50 = vcombine.low %v1563_v43, %v1567_v44 }
 0x426   : > { %3114 = vmatpush1.bf16.msra.mxu1 %v6850_v26  ;;  %v6915_v26 = vcombine.high %v1563_v43, %v1567_v44  ;;  %v1620_v43 = vld [vmem:[#allocation15 + $0x758] sm:$0xff] }
 0x427   : > { %3196 = vmatpush1.bf16.msra.mxu0 %v6852_v45  ;;  %3115 = vmatprep.subr.bf16.mxu1 %v6859_v46  ;;  %v6917_v45 = vcombine.high %v1564_v21, %v1568_v22  ;;  %v1571_v46 = vld [vmem:[#allocation15 + $0x5d0] sm:$0xff]  ;;  %v1624_v44 = vld [vmem:[#allocation15 + $0x778] sm:$0xff]  ;;  %v6964_v22 = vcombine.low %v1612_v12, %v1616_v13 }
 0x428   : > { %3197 = vmatprep.subr.bf16.mxu0 %v6861_v47  ;;  %v1575_v47 = vld [vmem:[#allocation15 + $0x5f0] sm:$0xff] }
 0x42a   : > { %3116 = vmatpush1.bf16.msra.mxu1 %v6858_v54  ;;  %v6923_v54 = vcombine.high %v1571_v46, %v1575_v47 }
 0x42b   : > { %3198 = vmatpush1.bf16.msra.mxu0 %v6860_v56  ;;  %3126 = vmatprep.subr.bf16.mxu1 %v6867_v57  ;;  %v6925_v56 = vcombine.high %v1572_v51, %v1576_v52  ;;  %v1579_v57 = vld [vmem:[#allocation15 + $0x610] sm:$0xff]  ;;  %v6972_v52 = vcombine.low %v1620_v43, %v1624_v44 }
 0x42c   : > { %3208 = vmatprep.subr.bf16.mxu0 %v6869_v58  ;;  %v1583_v58 = vld [vmem:[#allocation15 + $0x630] sm:$0xff] }
 0x42d   : > { %3118 = vmatmul.mubr.bf16.vlgmr.msra.gmra.mrb[8].mxu1 %v8765_v33  ;;  %v6931_v2 = vcombine.high %v1579_v57, %v1583_v58 }
 0x42e   : > { %3200 = vmatmul.mubr.bf16.vlgmr.msra.gmra.mrb[12].mxu0 %v8765_v33  ;;  %3127 = vmatpush1.bf16.msra.mxu1 %v6866_v63  ;;  %v6884_v33 = vcombine.low %v1532_v29, %v1536_v15  ;;  %v6922_v63 = vcombine.low %v1571_v46, %v1575_v47  ;;  %v6930_v29 = vcombine.low %v1579_v57, %v1583_v58  ;;  %v1628_v46 = vld [vmem:[#allocation15 + $0x798] sm:$0xff] }
 0x42f   : > { %3158 = vmatprep.mubr.bf16.mxu1 %v8771_v14  ;;  %3209 = vmatpush1.bf16.msra.mxu0 %v6868_v5  ;;  %v6933_v5 = vcombine.high %v1580_v60, %v1584_v62  ;;  %v6932_v15 = vcombine.low %v1580_v60, %v1584_v62  ;;  %v1632_v47 = vld [vmem:[#allocation15 + $0x7b8] sm:$0xff] }
 0x430   : > { %3240 = vmatprep.mubr.bf16.mxu0 %v8771_v14  ;;  %3128 = vmatprep.subr.bf16.mxu1 %v6875_v6  ;;  %v6890_v14 = vcombine.low %v1539_v24, %v1543_v28  ;;  %v1587_v6 = vld [vmem:[#allocation15 + $0x650] sm:$0xff]  ;;  %v1596_v24 = vld [vmem:[#allocation15 + $0x698] sm:$0xff]  ;;  %v6980_v62 = vcombine.low %v1628_v46, %v1632_v47 }
 0x431   : > { %3210 = vmatprep.subr.bf16.mxu0 %v6877_v10  ;;  %v1592_v10 = vld [vmem:[#allocation15 + $0x678] sm:$0xff]  ;;  %v6938_v3 = vcombine.low %v1587_v6, %v1591_v8 }
 0x432   : > { %3129 = vmatpush1.bf16.msra.mxu1 %v6874_v18  ;;  %v6939_v18 = vcombine.high %v1587_v6, %v1591_v8  ;;  %v1600_v28 = vld [vmem:[#allocation15 + $0x6b8] sm:$0xff]  ;;  %v6940_v31 = vcombine.low %v1588_v9, %v1592_v10 }
 0x433   : > { %3211 = vmatpush1.bf16.msra.mxu0 %v6876_v1  ;;  %3130 = vmatprep.subr.bf16.mxu1 %v6883_v19  ;;  %v6941_v1 = vcombine.high %v1588_v9, %v1592_v10  ;;  %v1595_v19 = vld [vmem:[#allocation15 + $0x690] sm:$0xff]  ;;  %v6948_v34 = vcombine.low %v1596_v24, %v1600_v28  ;;  %v1636_v57 = vld [vmem:[#allocation15 + $0x7d8] sm:$0xff] }
 0x434   : > { %3212 = vmatprep.subr.bf16.mxu0 %v6885_v20  ;;  %v1599_v20 = vld [vmem:[#allocation15 + $0x6b0] sm:$0xff]  ;;  %v1640_v58 = vld [vmem:[#allocation15 + $0x7f8] sm:$0xff] }
 0x435   : > { %v6946_v30 = vcombine.low %v1595_v19, %v1599_v20 }
 0x436   : > { %3131 = vmatpush1.bf16.msra.mxu1 %v6882_v32  ;;  %v6947_v32 = vcombine.high %v1595_v19, %v1599_v20 }
 0x437   : > { %3213 = vmatpush1.bf16.msra.mxu0 %v6884_v33  ;;  %3132 = vmatprep.subr.bf16.mxu1 %v6891_v7  ;;  %v6949_v33 = vcombine.high %v1596_v24, %v1600_v28  ;;  %v1603_v7 = vld [vmem:[#allocation15 + $0x6d0] sm:$0xff] }
 0x438   : > { %3214 = vmatprep.subr.bf16.mxu0 %v6893_v4  ;;  %v1607_v4 = vld [vmem:[#allocation15 + $0x6f0] sm:$0xff] }
 0x439   : > { %v6954_v16 = vcombine.low %v1603_v7, %v1607_v4 }
 0x43a   : > { %3133 = vmatpush1.bf16.msra.mxu1 %v6890_v14  ;;  %v6955_v14 = vcombine.high %v1603_v7, %v1607_v4 }
 0x43b   : > { %3215 = vmatpush1.bf16.msra.mxu0 %v6892_v37  ;;  %3134 = vmatprep.subr.bf16.mxu1 %v6899_v38  ;;  %v6957_v37 = vcombine.high %v1604_v35, %v1608_v36  ;;  %v1611_v38 = vld [vmem:[#allocation15 + $0x710] sm:$0xff] }
 0x43c   : > { %3216 = vmatprep.subr.bf16.mxu0 %v6901_v11  ;;  %v1615_v11 = vld [vmem:[#allocation15 + $0x730] sm:$0xff] }
 0x43d   : > { %v6962_v21 = vcombine.low %v1611_v38, %v1615_v11 }
 0x43e   : > { %3135 = vmatpush1.bf16.msra.mxu1 %v6898_v39  ;;  %v6963_v39 = vcombine.high %v1611_v38, %v1615_v11 }
 0x43f   : > { %3217 = vmatpush1.bf16.msra.mxu0 %v6900_v40  ;;  %3136 = vmatprep.subr.bf16.mxu1 %v6907_v41  ;;  %v6965_v40 = vcombine.high %v1612_v12, %v1616_v13  ;;  %v1619_v41 = vld [vmem:[#allocation15 + $0x750] sm:$0xff] }
 0x440   : > { %3218 = vmatprep.subr.bf16.mxu0 %v6909_v42  ;;  %v1623_v42 = vld [vmem:[#allocation15 + $0x770] sm:$0xff] }
 0x441   : > { %v6970_v51 = vcombine.low %v1619_v41, %v1623_v42 }
 0x442   : > { %3137 = vmatpush1.bf16.msra.mxu1 %v6906_v23  ;;  %v6971_v23 = vcombine.high %v1619_v41, %v1623_v42 }
 0x443   : > { %3219 = vmatpush1.bf16.msra.mxu0 %v6908_v25  ;;  %3138 = vmatprep.subr.bf16.mxu1 %v6915_v26  ;;  %v6973_v25 = vcombine.high %v1620_v43, %v1624_v44  ;;  %v1627_v26 = vld [vmem:[#allocation15 + $0x790] sm:$0xff] }
 0x444   : > { %3220 = vmatprep.subr.bf16.mxu0 %v6917_v45  ;;  %v1631_v45 = vld [vmem:[#allocation15 + $0x7b0] sm:$0xff] }
 0x445   : > { %v6978_v60 = vcombine.low %v1627_v26, %v1631_v45 }
 0x446   : > { %3139 = vmatpush1.bf16.msra.mxu1 %v6914_v50  ;;  %v6979_v50 = vcombine.high %v1627_v26, %v1631_v45 }
 0x447   : > { %3221 = vmatpush1.bf16.msra.mxu0 %v6916_v53  ;;  %3140 = vmatprep.subr.bf16.mxu1 %v6923_v54  ;;  %v6981_v53 = vcombine.high %v1628_v46, %v1632_v47  ;;  %v1635_v54 = vld [vmem:[#allocation15 + $0x7d0] sm:$0xff] }
 0x448   : > { %3222 = vmatprep.subr.bf16.mxu0 %v6925_v56  ;;  %v1639_v56 = vld [vmem:[#allocation15 + $0x7f0] sm:$0xff] }
 0x44a   : > { %3141 = vmatpush1.bf16.msra.mxu1 %v6922_v63  ;;  %v6987_v63 = vcombine.high %v1635_v54, %v1639_v56 }
 0x44b   : > { %3223 = vmatpush1.bf16.msra.mxu0 %v6924_v0  ;;  %3142 = vmatprep.subr.bf16.mxu1 %v6931_v2  ;;  %v6989_v0 = vcombine.high %v1636_v57, %v1640_v58  ;;  %v6986_v2 = vcombine.low %v1635_v54, %v1639_v56 }
 0x44c   : > { %3224 = vmatprep.subr.bf16.mxu0 %v6933_v5  ;;  %v6988_v5 = vcombine.low %v1636_v57, %v1640_v58 }
 0x44e   : > { %3143 = vmatpush1.bf16.msra.mxu1 %v6930_v29 }
 0x44f   : > { %3225 = vmatpush1.bf16.msra.mxu0 %v6932_v15  ;;  %3144 = vmatprep.subr.bf16.mxu1 %v6939_v18 }
 0x450   : > { %3226 = vmatprep.subr.bf16.mxu0 %v6941_v1 }
 0x452   : > { %3145 = vmatpush1.bf16.msra.mxu1 %v6938_v3 }
 0x453   : > { %3227 = vmatpush1.bf16.msra.mxu0 %v6940_v31  ;;  %3146 = vmatprep.subr.bf16.mxu1 %v6947_v32 }
 0x454   : > { %3228 = vmatprep.subr.bf16.mxu0 %v6949_v33 }
 0x456   : > { %3147 = vmatpush1.bf16.msra.mxu1 %v6946_v30 }
 0x457   : > { %3229 = vmatpush1.bf16.msra.mxu0 %v6948_v34  ;;  %3148 = vmatprep.subr.bf16.mxu1 %v6955_v14 }
 0x458   : > { %3230 = vmatprep.subr.bf16.mxu0 %v6957_v37 }
 0x45a   : > { %3149 = vmatpush1.bf16.msra.mxu1 %v6954_v16 }
 0x45b   : > { %3231 = vmatpush1.bf16.msra.mxu0 %v6956_v17  ;;  %3150 = vmatprep.subr.bf16.mxu1 %v6963_v39 }
 0x45c   : > { %3232 = vmatprep.subr.bf16.mxu0 %v6965_v40 }
 0x45e   : > { %3151 = vmatpush1.bf16.msra.mxu1 %v6962_v21 }
 0x45f   : > { %3233 = vmatpush1.bf16.msra.mxu0 %v6964_v22  ;;  %3152 = vmatprep.subr.bf16.mxu1 %v6971_v23 }
 0x460   : > { %3234 = vmatprep.subr.bf16.mxu0 %v6973_v25 }
 0x462   : > { %3153 = vmatpush1.bf16.msra.mxu1 %v6970_v51 }
 0x463   : > { %3235 = vmatpush1.bf16.msra.mxu0 %v6972_v52  ;;  %3154 = vmatprep.subr.bf16.mxu1 %v6979_v50 }
 0x464   : > { %3236 = vmatprep.subr.bf16.mxu0 %v6981_v53 }
 0x466   : > { %3155 = vmatpush1.bf16.msra.mxu1 %v6978_v60 }
 0x467   : > { %3237 = vmatpush1.bf16.msra.mxu0 %v6980_v62  ;;  %3156 = vmatprep.subr.bf16.mxu1 %v6987_v63 }
 0x468   : > { %3238 = vmatprep.subr.bf16.mxu0 %v6989_v0 }
 0x46a   : > { %3157 = vmatpush1.bf16.msra.mxu1 %v6986_v2 }
 0x46b   : > { %3239 = vmatpush1.bf16.msra.mxu0 %v6988_v5 }
 0x46d   : > { %3159 = vmatmul.mubr.bf16.vlgmr.msra.gmra.mrb[8].mxu1 %v8784_v27 }
 0x46e   : > { %3241 = vmatmul.mubr.bf16.vlgmr.msra.gmra.mrb[12].mxu0 %v8784_v27 }
 0x4c0   : > { %v2996_v6 = vpop.f32.mrb[4].mxu1  ;;  %v3078_v8 = vpop.f32.mrb[8].mxu0 }
 0x4c1   : > { %v3251_v9 = vrot.slane %v2996_v6, 4  ;;  %v3263_v10 = vrot.slane %v3078_v8, 4  ;;  %v2998_v29 = vpop.f32.mrb[5].mxu1  ;;  %v3080_v15 = vpop.f32.mrb[9].mxu0 }
 0x4c2   : > { %v3257_v18 = vrot.slane %v2998_v29, 4  ;;  %v3269_v1 = vrot.slane %v3080_v15, 4  ;;  %v3000_v19 = vpop.f32.mrb[6].mxu1  ;;  %v3082_v20 = vpop.f32.mrb[10].mxu0 }
 0x4c3   : > { %v3252_v24 = vadd.f32 %v3251_v9, %v2996_v6  ;;  %v3264_v28 = vadd.f32 %v3263_v10, %v3078_v8  ;;  %v3001_v3 = vpop.f32.mrb[7].mxu1  ;;  %v3083_v31 = vpop.f32.mrb[11].mxu0 }
 0x4c4   : > { %v3258_v32 = vadd.f32 %v3257_v18, %v2998_v29  ;;  %v3270_v33 = vadd.f32 %v3269_v1, %v3080_v15 }
 0x4c5   : > { %v3253_v7 = vrot.slane %v3252_v24, 2  ;;  %v3265_v4 = vrot.slane %v3264_v28, 2 }
 0x4c6   : > { %v3259_v35 = vrot.slane %v3258_v32, 2  ;;  %v3271_v27 = vrot.slane %v3270_v33, 2 }
 0x4c7   : > { %v3254_v36 = vadd.f32 %v3253_v7, %v3252_v24  ;;  %v3266_v30 = vadd.f32 %v3265_v4, %v3264_v28  ;;  %v8796_v4 = vld [vmem:[#allocation17] sm:$0xff] }
 0x4c8   : > { %v3260_v34 = vadd.f32 %v3259_v35, %v3258_v32  ;;  %v3272_v14 = vadd.f32 %v3271_v27, %v3270_v33  ;;  %v3383_v35 = vrot.slane %v8796_v4, %v8710_v59  ;;  %v8800_v27 = vld [vmem:[#allocation18] sm:$0xff] }
 0x4c9   : > { %v3255_v37 = vrot.slane %v3254_v36, 1  ;;  %v3267_v38 = vrot.slane %v3266_v30, 1 }
 0x4ca   : > { %v3261_v11 = vrot.slane %v3260_v34, 1  ;;  %v3273_v12 = vrot.slane %v3272_v14, 1 }
 0x4cb   : > { %v3256_v13 = vadd.f32 %v3255_v37, %v3254_v36  ;;  %v3268_v16 = vadd.f32 %v3267_v38, %v3266_v30  ;;  %v3391_v36 = vrot.slane %v8796_v4, %v8742_v49  ;;  %v3387_v30 = vrot.slane %v8796_v4, %v8713_v61 }
 0x4cc   : > { %v3262_v17 = vadd.f32 %v3261_v11, %v3260_v34  ;;  %v3274_v39 = vadd.f32 %v3273_v12, %v3272_v14  ;;  %v3395_v34 = vrot.slane %v8796_v4, %v8749_v48  ;;  %v3456_v37 = vrot.slane %v8800_v27, %v8710_v59 }
 0x4cd   : > { %v3299_v40 = vmul.f32 0.125, %v3256_v13  ;;  %v3301_v41 = vmul.f32 0.125, %v3268_v16  ;;  %v3464_v12 = vrot.slane %v8800_v27, %v8742_v49 }
 0x4ce   : > { %v3300_v42 = vmul.f32 0.125, %v3262_v17  ;;  %v3302_v43 = vmul.f32 0.125, %v3274_v39  ;;  %v3460_v39 = vrot.slane %v8800_v27, %v8713_v61 }
 0x4cf   : > { %v3307_v44 = vsub.f32 %v2996_v6, %v3299_v40  ;;  %v3309_v21 = vsub.f32 %v3078_v8, %v3301_v41 }
 0x4d0   : > { %v3308_v22 = vsub.f32 %v2998_v29, %v3300_v42  ;;  %v3310_v23 = vsub.f32 %v3080_v15, %v3302_v43  ;;  %v3468_v43 = vrot.slane %v8800_v27, %v8749_v48 }
 0x4d1   : > { %v3315_v25 = vmul.f32 %v3307_v44, %v3307_v44  ;;  %v3317_v26 = vmul.f32 %v3309_v21, %v3309_v21  ;;  %v3420_v14 = vmul.f32 %v3383_v35, %v3307_v44  ;;  %v3422_v11 = vmul.f32 %v3391_v36, %v3309_v21 }
 0x4d2   : > { %v3316_v45 = vmul.f32 %v3308_v22, %v3308_v22  ;;  %v3318_v46 = vmul.f32 %v3310_v23, %v3310_v23  ;;  %v3421_v17 = vmul.f32 %v3387_v30, %v3308_v22  ;;  %v3423_v42 = vmul.f32 %v3395_v34, %v3310_v23 }
 0x4d3   : > { %v3323_v47 = vrot.slane %v3315_v25, 4  ;;  %v3335_v51 = vrot.slane %v3317_v26, 4 }
 0x4d4   : > { %v3329_v52 = vrot.slane %v3316_v45, 4  ;;  %v3341_v50 = vrot.slane %v3318_v46, 4 }
 0x4d5   : > { %v3324_v53 = vadd.f32 %v3323_v47, %v3315_v25  ;;  %v3336_v54 = vadd.f32 %v3335_v51, %v3317_v26 }
 0x4d6   : > { %v3330_v56 = vadd.f32 %v3329_v52, %v3316_v45  ;;  %v3342_v57 = vadd.f32 %v3341_v50, %v3318_v46 }
 0x4d7   : > { %v3325_v58 = vrot.slane %v3324_v53, 2  ;;  %v3337_v60 = vrot.slane %v3336_v54, 2 }
 0x4d8   : > { %v3331_v62 = vrot.slane %v3330_v56, 2  ;;  %v3343_v63 = vrot.slane %v3342_v57, 2 }
 0x4d9   : > { %v3326_v0 = vadd.f32 %v3325_v58, %v3324_v53  ;;  %v3338_v2 = vadd.f32 %v3337_v60, %v3336_v54 }
 0x4da   : > { %v3332_v5 = vadd.f32 %v3331_v62, %v3330_v56  ;;  %v3344_v6 = vadd.f32 %v3343_v63, %v3342_v57 }
 0x4db   : > { %v3327_v8 = vrot.slane %v3326_v0, 1  ;;  %v3339_v9 = vrot.slane %v3338_v2, 1 }
 0x4dc   : > { %v3333_v10 = vrot.slane %v3332_v5, 1  ;;  %v3345_v29 = vrot.slane %v3344_v6, 1 }
 0x4dd   : > { %v3328_v15 = vadd.f32 %v3327_v8, %v3326_v0  ;;  %v3340_v18 = vadd.f32 %v3339_v9, %v3338_v2 }
 0x4de   : > { %v3334_v1 = vadd.f32 %v3333_v10, %v3332_v5  ;;  %v3346_v19 = vadd.f32 %v3345_v29, %v3344_v6 }
 0x4df   : > { %v3371_v20 = vmul.f32 0.125, %v3328_v15  ;;  %v3373_v24 = vmul.f32 0.125, %v3340_v18 }
 0x4e0   : > { %v3372_v28 = vmul.f32 0.125, %v3334_v1  ;;  %v3374_v3 = vmul.f32 0.125, %v3346_v19 }
 0x4e1   : > { %v3428_v31 = vadd.f32 0.8, %v3371_v20  ;;  %v3430_v32 = vadd.f32 0.8, %v3373_v24 }
 0x4e2   : > { %v3429_v33 = vadd.f32 0.8, %v3372_v28  ;;  %v3431_v7 = vadd.f32 0.8, %v3374_v3 }
 0x4e3   : > { %7738 = vrsqrt.f32 %v3428_v31 }
 0x4e4   : > { %7740 = vrsqrt.f32 %v3430_v32 }
 0x4e5   : > { %7742 = vrsqrt.f32 %v3429_v33 }
 0x4e6   : > { %7744 = vrsqrt.f32 %v3431_v7 }
 0x4ed   : > { %v7739_v38 = vpop.eup %7738 }
 0x4ee   : > { %v7741_v13 = vpop.eup %7740  ;;  %v3444_v16 = vmul.f32 %v7739_v38, %v3420_v14 }
 0x4ef   : > { %v7743_v40 = vpop.eup %7742  ;;  %v3446_v41 = vmul.f32 %v7741_v13, %v3422_v11 }
 0x4f0   : > { %v7745_v44 = vpop.eup %7744  ;;  %v3493_v25 = vadd.f32 %v3456_v37, %v3444_v16  ;;  %v3445_v59 = vmul.f32 %v7743_v40, %v3421_v17 }
 0x4f1   : > { %v3495_v26 = vadd.f32 %v3464_v12, %v3446_v41  ;;  %v3447_v21 = vmul.f32 %v7745_v44, %v3423_v42 }
 0x4f2   : > { %vm3501_vm7 = vcmp.gt.f32.partialorder %v3493_v25, 0.0  ;;  %v3509_v45 = vmul.f32 0.2, %v3493_v25  ;;  %v3494_v49 = vadd.f32 %v3460_v39, %v3445_v59 }
 0x4f3   : > { %vm3503_vm8 = vcmp.gt.f32.partialorder %v3495_v26, 0.0  ;;  %v3511_v46 = vmul.f32 0.2, %v3495_v26  ;;  %v3496_v22 = vadd.f32 %v3468_v43, %v3447_v21 }
 0x4f4   : > { %v3517_v47 = vsel %vm3501_vm7, %v3493_v25, %v3509_v45  ;;  %vm3502_vm9 = vcmp.gt.f32.partialorder %v3494_v49, 0.0  ;;  %v3510_v61 = vmul.f32 0.2, %v3494_v49 }
 0x4f5   : > { %v3519_v51 = vsel %vm3503_vm8, %v3495_v26, %v3511_v46  ;;  %vm3504_vm10 = vcmp.gt.f32.partialorder %v3496_v22, 0.0  ;;  %v3512_v23 = vmul.f32 0.2, %v3496_v22 }
 0x4f6   : > { %v3518_v52 = vsel %vm3502_vm9, %v3494_v49, %v3510_v61 }
 0x4f7   : > { %v7392_v50 = vpack.c.bf16 %v3518_v52, %v3517_v47  ;;  %v3520_v48 = vsel %vm3504_vm10, %v3496_v22, %v3512_v23 }
 0x4f8   : > { %v7393_v53 = vpack.c.bf16 %v3520_v48, %v3519_v51 }
 0x4f9   : > { %3557 = vst [vmem:[#allocation2] sm:$0xff] %v7392_v50 }
 0x4fa   : > { %3558 = vst [vmem:[#allocation2 + $0x8] sm:$0xff] %v7393_v53 }
 0x540   : > { %v3160_v54 = vpop.f32.mrb[8].mxu1 }
 0x541   : > { %v3275_v56 = vrot.slane %v3160_v54, 4  ;;  %v3242_v57 = vpop.f32.mrb[12].mxu0  ;;  %v3162_v58 = vpop.f32.mrb[9].mxu1 }
 0x542   : > { %v3287_v60 = vrot.slane %v3242_v57, 4  ;;  %v3281_v62 = vrot.slane %v3162_v58, 4  ;;  %v3244_v63 = vpop.f32.mrb[13].mxu0  ;;  %v3164_v0 = vpop.f32.mrb[10].mxu1 }
 0x543   : > { %v3276_v2 = vadd.f32 %v3275_v56, %v3160_v54  ;;  %v3293_v5 = vrot.slane %v3244_v63, 4  ;;  %v3246_v6 = vpop.f32.mrb[14].mxu0  ;;  %v3165_v8 = vpop.f32.mrb[11].mxu1 }
 0x544   : > { %v3288_v9 = vadd.f32 %v3287_v60, %v3242_v57  ;;  %v3282_v10 = vadd.f32 %v3281_v62, %v3162_v58  ;;  %v3247_v29 = vpop.f32.mrb[15].mxu0 }
 0x545   : > { %v3277_v15 = vrot.slane %v3276_v2, 2  ;;  %v3294_v18 = vadd.f32 %v3293_v5, %v3244_v63 }
 0x546   : > { %v3289_v1 = vrot.slane %v3288_v9, 2  ;;  %v3283_v19 = vrot.slane %v3282_v10, 2 }
 0x547   : > { %v3278_v20 = vadd.f32 %v3277_v15, %v3276_v2  ;;  %v3295_v24 = vrot.slane %v3294_v18, 2  ;;  %v3398_v15 = vsub.s32 4, %v8707_v55 }
 0x548   : > { %v3290_v28 = vadd.f32 %v3289_v1, %v3288_v9  ;;  %v3284_v3 = vadd.f32 %v3283_v19, %v3282_v10  ;;  %v3402_v1 = vsub.s32 5, %v8707_v55  ;;  %v3410_v19 = vsub.s32 7, %v8707_v55 }
 0x549   : > { %v3279_v31 = vrot.slane %v3278_v20, 1  ;;  %v3296_v32 = vadd.f32 %v3295_v24, %v3294_v18  ;;  %v3406_v18 = vsub.s32 6, %v8707_v55 }
 0x54a   : > { %v3291_v33 = vrot.slane %v3290_v28, 1  ;;  %v3285_v7 = vrot.slane %v3284_v3, 1  ;;  %v3476_v55 = vrot.slane %v8800_v27, %v3402_v1 }
 0x54b   : > { %v3280_v35 = vadd.f32 %v3279_v31, %v3278_v20  ;;  %v3297_v36 = vrot.slane %v3296_v32, 1  ;;  %v3399_v20 = vrot.slane %v8796_v4, %v3398_v15  ;;  %v3407_v24 = vrot.slane %v8796_v4, %v3406_v18 }
 0x54c   : > { %v3292_v30 = vadd.f32 %v3291_v33, %v3290_v28  ;;  %v3286_v34 = vadd.f32 %v3285_v7, %v3284_v3  ;;  %v3403_v28 = vrot.slane %v8796_v4, %v3402_v1  ;;  %v3411_v3 = vrot.slane %v8796_v4, %v3410_v19 }
 0x54d   : > { %v3303_v14 = vmul.f32 0.125, %v3280_v35  ;;  %v3298_v37 = vadd.f32 %v3297_v36, %v3296_v32  ;;  %v3472_v32 = vrot.slane %v8800_v27, %v3398_v15  ;;  %v3480_v35 = vrot.slane %v8800_v27, %v3406_v18 }
 0x54e   : > { %v3305_v38 = vmul.f32 0.125, %v3292_v30  ;;  %v3304_v11 = vmul.f32 0.125, %v3286_v34 }
 0x54f   : > { %v3311_v12 = vsub.f32 %v3160_v54, %v3303_v14  ;;  %v3306_v13 = vmul.f32 0.125, %v3298_v37 }
 0x550   : > { %v3313_v16 = vsub.f32 %v3242_v57, %v3305_v38  ;;  %v3312_v17 = vsub.f32 %v3162_v58, %v3304_v11  ;;  %v3484_v11 = vrot.slane %v8800_v27, %v3410_v19 }
 0x551   : > { %v3319_v39 = vmul.f32 %v3311_v12, %v3311_v12  ;;  %v3314_v40 = vsub.f32 %v3244_v63, %v3306_v13  ;;  %v3424_v31 = vmul.f32 %v3399_v20, %v3311_v12 }
 0x552   : > { %v3321_v41 = vmul.f32 %v3313_v16, %v3313_v16  ;;  %v3320_v42 = vmul.f32 %v3312_v17, %v3312_v17  ;;  %v3426_v7 = vmul.f32 %v3407_v24, %v3313_v16  ;;  %v3425_v34 = vmul.f32 %v3403_v28, %v3312_v17 }
 0x553   : > { %v3347_v43 = vrot.slane %v3319_v39, 4  ;;  %v3322_v44 = vmul.f32 %v3314_v40, %v3314_v40  ;;  %v3427_v38 = vmul.f32 %v3411_v3, %v3314_v40 }
 0x554   : > { %v3359_v25 = vrot.slane %v3321_v41, 4  ;;  %v3353_v59 = vrot.slane %v3320_v42, 4 }
 0x555   : > { %v3348_v26 = vadd.f32 %v3347_v43, %v3319_v39  ;;  %v3365_v21 = vrot.slane %v3322_v44, 4 }
 0x556   : > { %v3360_v45 = vadd.f32 %v3359_v25, %v3321_v41  ;;  %v3354_v49 = vadd.f32 %v3353_v59, %v3320_v42 }
 0x557   : > { %v3349_v46 = vrot.slane %v3348_v26, 2  ;;  %v3366_v22 = vadd.f32 %v3365_v21, %v3322_v44 }
 0x558   : > { %v3361_v47 = vrot.slane %v3360_v45, 2  ;;  %v3355_v61 = vrot.slane %v3354_v49, 2 }
 0x559   : > { %v3350_v51 = vadd.f32 %v3349_v46, %v3348_v26  ;;  %v3367_v23 = vrot.slane %v3366_v22, 2 }
 0x55a   : > { %v3362_v52 = vadd.f32 %v3361_v47, %v3360_v45  ;;  %v3356_v50 = vadd.f32 %v3355_v61, %v3354_v49 }
 0x55b   : > { %v3351_v48 = vrot.slane %v3350_v51, 1  ;;  %v3368_v53 = vadd.f32 %v3367_v23, %v3366_v22 }
 0x55c   : > { %v3363_v54 = vrot.slane %v3362_v52, 1  ;;  %v3357_v56 = vrot.slane %v3356_v50, 1 }
 0x55d   : > { %v3352_v57 = vadd.f32 %v3351_v48, %v3350_v51  ;;  %v3369_v58 = vrot.slane %v3368_v53, 1 }
 0x55e   : > { %v3364_v60 = vadd.f32 %v3363_v54, %v3362_v52  ;;  %v3358_v62 = vadd.f32 %v3357_v56, %v3356_v50 }
 0x55f   : > { %v3375_v63 = vmul.f32 0.125, %v3352_v57  ;;  %v3370_v0 = vadd.f32 %v3369_v58, %v3368_v53 }
 0x560   : > { %v3377_v2 = vmul.f32 0.125, %v3364_v60  ;;  %v3376_v5 = vmul.f32 0.125, %v3358_v62 }
 0x561   : > { %v3432_v6 = vadd.f32 0.8, %v3375_v63  ;;  %v3378_v8 = vmul.f32 0.125, %v3370_v0 }
 0x562   : > { %v3434_v9 = vadd.f32 0.8, %v3377_v2  ;;  %v3433_v10 = vadd.f32 0.8, %v3376_v5 }
 0x563   : > { %7746 = vrsqrt.f32 %v3432_v6  ;;  %v3435_v29 = vadd.f32 0.8, %v3378_v8 }
 0x564   : > { %7748 = vrsqrt.f32 %v3434_v9 }
 0x565   : > { %7750 = vrsqrt.f32 %v3433_v10 }
 0x566   : > { %7752 = vrsqrt.f32 %v3435_v29 }
 0x56d   : > { %v7747_v33 = vpop.eup %7746 }
 0x56e   : > { %v7749_v36 = vpop.eup %7748  ;;  %v3448_v30 = vmul.f32 %v7747_v33, %v3424_v31 }
 0x56f   : > { %v7751_v14 = vpop.eup %7750  ;;  %v3450_v37 = vmul.f32 %v7749_v36, %v3426_v7 }
 0x570   : > { %v7753_v13 = vpop.eup %7752  ;;  %v3497_v39 = vadd.f32 %v3472_v32, %v3448_v30  ;;  %v3449_v4 = vmul.f32 %v7751_v14, %v3425_v34 }
 0x571   : > { %v3499_v12 = vadd.f32 %v3480_v35, %v3450_v37  ;;  %v3451_v41 = vmul.f32 %v7753_v13, %v3427_v38 }
 0x572   : > { %vm3505_vm11 = vcmp.gt.f32.partialorder %v3497_v39, 0.0  ;;  %v3513_v42 = vmul.f32 0.2, %v3497_v39  ;;  %v3498_v16 = vadd.f32 %v3476_v55, %v3449_v4 }
 0x573   : > { %vm3507_vm12 = vcmp.gt.f32.partialorder %v3499_v12, 0.0  ;;  %v3515_v43 = vmul.f32 0.2, %v3499_v12  ;;  %v3500_v44 = vadd.f32 %v3484_v11, %v3451_v41 }
 0x574   : > { %v3521_v25 = vsel %vm3505_vm11, %v3497_v39, %v3513_v42  ;;  %vm3506_vm13 = vcmp.gt.f32.partialorder %v3498_v16, 0.0  ;;  %v3514_v17 = vmul.f32 0.2, %v3498_v16 }
 0x575   : > { %v3523_v59 = vsel %vm3507_vm12, %v3499_v12, %v3515_v43  ;;  %vm3508_vm14 = vcmp.gt.f32.partialorder %v3500_v44, 0.0  ;;  %v3516_v26 = vmul.f32 0.2, %v3500_v44 }
 0x576   : > { %v3522_v40 = vsel %vm3506_vm13, %v3498_v16, %v3514_v17 }
 0x577   : > { %v7394_v21 = vpack.c.bf16 %v3522_v40, %v3521_v25  ;;  %v3524_v27 = vsel %vm3508_vm14, %v3500_v44, %v3516_v26 }
 0x578   : > { %v7395_v45 = vpack.c.bf16 %v3524_v27, %v3523_v59 }
 0x579   : > { %3559 = vst [vmem:[#allocation2 + $0x10] sm:$0xff] %v7394_v21 }
 0x57a   : > { %3560 = vst [vmem:[#allocation2 + $0x18] sm:$0xff] %v7395_v45 }
 0x57b PF: > { %v3565_v49 = vld [vmem:[%s8677_s15] sm:$0xff]  ;;  %v3567_v22 = vld [vmem:[%s8677_s15 + $0x10] sm:$0xff]  ;;  %s7396_s18 = smul.u32 768, %s8312_s27  ;;  %s6448_s0 = sshll.u32 %s8687_s21, 4  ;;  %s9304_s0 = int_to_ptr.vmem [resolvable:$true] %s6448_s0 }
 0x57c   : > { %v3569_v46 = vld [vmem:[%s8677_s15 + $0x20] sm:$0xff]  ;;  %v3571_v61 = vld [vmem:[%s8677_s15 + $0x30] sm:$0xff]  ;;  %s9429_s10 = sld [smem:[#allocation43_spill]]  ;;  %s6434_s27 = scalar_lea.sflag [#allocation5], %s8674_s14 }
 0x57d   : > { %v7003_v47 = vcombine.high %v3565_v49, %v3569_v46  ;;  %v7002_v51 = vcombine.low %v3565_v49, %v3569_v46  ;;  %v3573_v23 = vld [vmem:[%s8677_s15 + $0x40] sm:$0xff]  ;;  %v7007_v50 = vcombine.high %v3567_v22, %v3571_v61  ;;  %v7006_v48 = vcombine.low %v3567_v22, %v3571_v61  ;;  %v3575_v54 = vld [vmem:[%s8677_s15 + $0x50] sm:$0xff]  ;;  %s8114_s20 = scalar_lea.vmem %s9304_s0, 768  ;;  %p9430_p7 = scmp.ne.s32.totalorder %s9400_s26, 0 }
 0x57e   : > { %v3577_v52 = vld [vmem:[%s8677_s15 + $0x60] sm:$0xff]  ;;  %v3579_v56 = vld [vmem:[%s8677_s15 + $0x70] sm:$0xff]  ;;  %p8115_p2 = scmp.ne.s32.totalorder %s9304_s0, %s8114_s20  ;;  %s8225_s2 = smov [#allocation22]  }
 0x57f   : > { %v7011_v53 = vcombine.high %v3573_v23, %v3577_v52  ;;  %5929 = vmatprep.subr.bf16.mxu1 %v7003_v47  ;;  %v7015_v57 = vcombine.high %v3575_v54, %v3579_v56  ;;  %6011 = vmatprep.subr.bf16.mxu0 %v7007_v50  ;;  %v3581_v58 = vld [vmem:[%s8677_s15 + $0x80] sm:$0xff]  ;;  %v3583_v62 = vld [vmem:[%s8677_s15 + $0x90] sm:$0xff]  ;;  %v7010_v0 = vcombine.low %v3573_v23, %v3577_v52  ;;  %s8118_s16 = sshll.u32 %s8225_s2, 4  ;;  %s8119_s16 = int_to_ptr.vmem [resolvable:$false] %s8118_s16 }
 0x580   : > { %5930 = vmatpush1.bf16.xpose.msra.mxu1 %v7002_v51  ;;  %6012 = vmatpush1.bf16.xpose.msra.mxu0 %v7006_v48  ;;  %v3585_v60 = vld [vmem:[%s8677_s15 + $0xa0] sm:$0xff]  ;;  %v3587_v63 = vld [vmem:[%s8677_s15 + $0xb0] sm:$0xff]  ;;  %v7014_v2 = vcombine.low %v3575_v54, %v3579_v56  ;;  %p8116_p1 = pnand %p8115_p2, %p9430_p7  ;;  %s8120_s28 = scalar_lea.vmem %s8119_s16, 1536 }
 0x581   : > { %5931 = vmatprep.subr.bf16.mxu1 %v7011_v53  ;;  %6013 = vmatprep.subr.bf16.mxu0 %v7015_v57  ;;  %v7019_v5 = vcombine.high %v3581_v58, %v3585_v60  ;;  %v7023_v6 = vcombine.high %v3583_v62, %v3587_v63  ;;  %v3589_v8 = vld [vmem:[%s8677_s15 + $0xc0] sm:$0xff]  ;;  %v3591_v10 = vld [vmem:[%s8677_s15 + $0xd0] sm:$0xff]  ;;  %v7018_v15 = vcombine.low %v3581_v58, %v3585_v60  ;;  %p8121_p11 = scmp.lt.s32.totalorder %s9304_s0, %s8119_s16  ;;  %p8122_p9 = scmp.lt.s32.totalorder %s8120_s28, %s8114_s20 }
 0x582   : > { %v3593_v9 = vld [vmem:[%s8677_s15 + $0xe0] sm:$0xff]  ;;  %v3595_v29 = vld [vmem:[%s8677_s15 + $0xf0] sm:$0xff]  ;;  %v7022_v18 = vcombine.low %v3583_v62, %v3587_v63  ;;  %s9302_s19 = scalar_lea.hbm %s9429_s10, %s7396_s18  ;;  %p8117_p10 = pneg %p8116_p1 }
 0x583   : > { %v7027_v1 = vcombine.high %v3589_v8, %v3593_v9  ;;  %v7031_v19 = vcombine.high %v3591_v10, %v3595_v29  ;;  %v8844_v20 = vld [vmem:[#allocation2] sm:$0xff]  ;;  %v8852_v31 = vld [vmem:[#allocation2 + $0x10] sm:$0xff]  ;;  %v7026_v35 = vcombine.low %v3589_v8, %v3593_v9  ;;  %v7030_v36 = vcombine.low %v3591_v10, %v3595_v29  ;;  %p8123_p0 = por %p8122_p9, %p8121_p11 }
 0x584   : > { %v3597_v24 = vld [vmem:[%s8677_s15 + $0x100] sm:$0xff]  ;;  %v8850_v3 = vcombine.high %v8844_v20, %v8844_v20  ;;  %v3599_v32 = vld [vmem:[%s8677_s15 + $0x110] sm:$0xff]  ;;  %v8858_v7 = vcombine.high %v8852_v31, %v8852_v31 }
 0x585   : > { %v3601_v28 = vld [vmem:[%s8677_s15 + $0x120] sm:$0xff]  ;;  %v3603_v33 = vld [vmem:[%s8677_s15 + $0x130] sm:$0xff]  ;;  %p8124_p6 = pnand %p8123_p0, %p8117_p10 }
 0x586   : > { %5961 = vmatprep.mubr.bf16.mxu1 %v8850_v3  ;;  %v7035_v30 = vcombine.high %v3597_v24, %v3601_v28  ;;  %6043 = vmatprep.mubr.bf16.mxu0 %v8858_v7  ;;  %v7039_v34 = vcombine.high %v3599_v32, %v3603_v33  ;;  %v3605_v55 = vld [vmem:[%s8677_s15 + $0x140] sm:$0xff]  ;;  %v3607_v37 = vld [vmem:[%s8677_s15 + $0x150] sm:$0xff]  ;;  %v7034_v11 = vcombine.low %v3597_v24, %v3601_v28 }
 0x587   : > { %v3609_v14 = vld [vmem:[%s8677_s15 + $0x160] sm:$0xff]  ;;  %v3611_v38 = vld [vmem:[%s8677_s15 + $0x170] sm:$0xff]  ;;  %v7038_v13 = vcombine.low %v3599_v32, %v3603_v33 }
 0x588   : > { %5932 = vmatpush1.bf16.xpose.msra.mxu1 %v7010_v0  ;;  %6014 = vmatpush1.bf16.xpose.msra.mxu0 %v7014_v2  ;;  %v7043_v39 = vcombine.high %v3605_v55, %v3609_v14  ;;  %v7047_v4 = vcombine.high %v3607_v37, %v3611_v38  ;;  %v3613_v12 = vld [vmem:[%s8677_s15 + $0x180] sm:$0xff]  ;;  %v3615_v42 = vld [vmem:[%s8677_s15 + $0x190] sm:$0xff]  ;;  %v7042_v43 = vcombine.low %v3605_v55, %v3609_v14 }
 0x589   : > { %5933 = vmatprep.subr.bf16.mxu1 %v7019_v5  ;;  %6015 = vmatprep.subr.bf16.mxu0 %v7023_v6  ;;  %v3617_v41 = vld [vmem:[%s8677_s15 + $0x1a0] sm:$0xff]  ;;  %v3619_v16 = vld [vmem:[%s8677_s15 + $0x1b0] sm:$0xff]  ;;  %v7046_v44 = vcombine.low %v3607_v37, %v3611_v38 }
 0x58a   : > { %v7051_v25 = vcombine.high %v3613_v12, %v3617_v41  ;;  %v7055_v17 = vcombine.high %v3615_v42, %v3619_v16  ;;  %v3621_v59 = vld [vmem:[%s8677_s15 + $0x1c0] sm:$0xff]  ;;  %v3623_v40 = vld [vmem:[%s8677_s15 + $0x1d0] sm:$0xff]  ;;  %v7050_v27 = vcombine.low %v3613_v12, %v3617_v41  ;;  %v7054_v45 = vcombine.low %v3615_v42, %v3619_v16 }
 0x58b   : > { %v3625_v26 = vld [vmem:[%s8677_s15 + $0x1e0] sm:$0xff]  ;;  %v3627_v21 = vld [vmem:[%s8677_s15 + $0x1f0] sm:$0xff] }
 0x58c   : > { %v7059_v49 = vcombine.high %v3621_v59, %v3625_v26  ;;  %v7063_v46 = vcombine.high %v3623_v40, %v3627_v21  ;;  %v3629_v22 = vld [vmem:[%s8677_s15 + $0x200] sm:$0xff]  ;;  %v3631_v61 = vld [vmem:[%s8677_s15 + $0x210] sm:$0xff]  ;;  %v7058_v23 = vcombine.low %v3621_v59, %v3625_v26  ;;  %v7062_v52 = vcombine.low %v3623_v40, %v3627_v21 }
 0x58d   : > { %v3633_v47 = vld [vmem:[%s8677_s15 + $0x220] sm:$0xff]  ;;  %v3635_v51 = vld [vmem:[%s8677_s15 + $0x230] sm:$0xff] }
 0x58e   : > { %v7067_v50 = vcombine.high %v3629_v22, %v3633_v47  ;;  %v7071_v48 = vcombine.high %v3631_v61, %v3635_v51  ;;  %v3637_v53 = vld [vmem:[%s8677_s15 + $0x240] sm:$0xff]  ;;  %v3639_v56 = vld [vmem:[%s8677_s15 + $0x250] sm:$0xff]  ;;  %v7066_v58 = vcombine.low %v3629_v22, %v3633_v47  ;;  %v7070_v60 = vcombine.low %v3631_v61, %v3635_v51 }
 0x58f   : > { %v3641_v54 = vld [vmem:[%s8677_s15 + $0x260] sm:$0xff]  ;;  %v3643_v57 = vld [vmem:[%s8677_s15 + $0x270] sm:$0xff] }
 0x590   : > { %5934 = vmatpush1.bf16.xpose.msra.mxu1 %v7018_v15  ;;  %6016 = vmatpush1.bf16.xpose.msra.mxu0 %v7022_v18  ;;  %v7075_v62 = vcombine.high %v3637_v53, %v3641_v54  ;;  %v7079_v63 = vcombine.high %v3639_v56, %v3643_v57  ;;  %v3645_v0 = vld [vmem:[%s8677_s15 + $0x280] sm:$0xff]  ;;  %v3647_v5 = vld [vmem:[%s8677_s15 + $0x290] sm:$0xff]  ;;  %v7074_v8 = vcombine.low %v3637_v53, %v3641_v54 }
 0x591   : > { %5935 = vmatprep.subr.bf16.mxu1 %v7027_v1  ;;  %6017 = vmatprep.subr.bf16.mxu0 %v7031_v19  ;;  %v3649_v2 = vld [vmem:[%s8677_s15 + $0x2a0] sm:$0xff]  ;;  %v3651_v6 = vld [vmem:[%s8677_s15 + $0x2b0] sm:$0xff]  ;;  %v7078_v9 = vcombine.low %v3639_v56, %v3643_v57 }
 0x592   : > { %v7083_v10 = vcombine.high %v3645_v0, %v3649_v2  ;;  %v7087_v29 = vcombine.high %v3647_v5, %v3651_v6  ;;  %v3653_v15 = vld [vmem:[%s8677_s15 + $0x2c0] sm:$0xff]  ;;  %v3655_v1 = vld [vmem:[%s8677_s15 + $0x2d0] sm:$0xff]  ;;  %v7082_v24 = vcombine.low %v3645_v0, %v3649_v2  ;;  %v7086_v28 = vcombine.low %v3647_v5, %v3651_v6  ;;  %v3580_v0 = vld [vmem:[%s8677_s15 + $0x78] sm:$0xff] }
 0x593   : > { %v3657_v18 = vld [vmem:[%s8677_s15 + $0x2e0] sm:$0xff]  ;;  %v3659_v19 = vld [vmem:[%s8677_s15 + $0x2f0] sm:$0xff]  ;;  %v8922_v6 = vcombine.low %v8852_v31, %v8852_v31  ;;  %v3582_v31 = vld [vmem:[%s8677_s15 + $0x88] sm:$0xff] }
 0x594   : > { %v7091_v32 = vcombine.high %v3653_v15, %v3657_v18  ;;  %v7095_v33 = vcombine.high %v3655_v1, %v3659_v19  ;;  %v7090_v55 = vcombine.low %v3653_v15, %v3657_v18  ;;  %v7094_v14 = vcombine.low %v3655_v1, %v3659_v19  ;;  %v8918_v2 = vld [vmem:[#allocation2 + $0x8] sm:$0xff]  ;;  %v3584_v1 = vld [vmem:[%s8677_s15 + $0x98] sm:$0xff] }
 0x595   : > { %v3586_v18 = vld [vmem:[%s8677_s15 + $0xa8] sm:$0xff]  ;;  %v3588_v19 = vld [vmem:[%s8677_s15 + $0xb8] sm:$0xff] }
 0x598   : > { %5936 = vmatpush1.bf16.xpose.msra.mxu1 %v7026_v35  ;;  %6018 = vmatpush1.bf16.xpose.msra.mxu0 %v7030_v36  ;;  %v3661_v35 = vld [vmem:[%s8677_s15 + $0x300] sm:$0xff] }
 0x599   : > { %5937 = vmatprep.subr.bf16.mxu1 %v7035_v30  ;;  %6019 = vmatprep.subr.bf16.mxu0 %v7039_v34  ;;  %v3665_v36 = vld [vmem:[%s8677_s15 + $0x320] sm:$0xff]  ;;  %v3663_v30 = vld [vmem:[%s8677_s15 + $0x310] sm:$0xff] }
 0x59a   : > { %v3667_v34 = vld [vmem:[%s8677_s15 + $0x330] sm:$0xff]  ;;  %v7099_v37 = vcombine.high %v3661_v35, %v3665_v36  ;;  %v7098_v12 = vcombine.low %v3661_v35, %v3665_v36  ;;  %v3590_v35 = vld [vmem:[%s8677_s15 + $0xc8] sm:$0xff] }
 0x59b   : > { %v7103_v38 = vcombine.high %v3663_v30, %v3667_v34  ;;  %v7102_v41 = vcombine.low %v3663_v30, %v3667_v34  ;;  %v3594_v36 = vld [vmem:[%s8677_s15 + $0xe8] sm:$0xff]  ;;  %v3592_v30 = vld [vmem:[%s8677_s15 + $0xd8] sm:$0xff] }
 0x59c   : > { %v3596_v34 = vld [vmem:[%s8677_s15 + $0xf8] sm:$0xff] }
 0x5a0   : > { %5938 = vmatpush1.bf16.xpose.msra.mxu1 %v7034_v11  ;;  %6020 = vmatpush1.bf16.xpose.msra.mxu0 %v7038_v13  ;;  %v3669_v11 = vld [vmem:[%s8677_s15 + $0x340] sm:$0xff] }
 0x5a1   : > { %5939 = vmatprep.subr.bf16.mxu1 %v7043_v39  ;;  %6021 = vmatprep.subr.bf16.mxu0 %v7047_v4  ;;  %v3673_v13 = vld [vmem:[%s8677_s15 + $0x360] sm:$0xff]  ;;  %v3671_v39 = vld [vmem:[%s8677_s15 + $0x350] sm:$0xff] }
 0x5a2   : > { %v3675_v4 = vld [vmem:[%s8677_s15 + $0x370] sm:$0xff]  ;;  %v7107_v42 = vcombine.high %v3669_v11, %v3673_v13  ;;  %v7106_v59 = vcombine.low %v3669_v11, %v3673_v13  ;;  %v3598_v11 = vld [vmem:[%s8677_s15 + $0x108] sm:$0xff] }
 0x5a3   : > { %v7111_v16 = vcombine.high %v3671_v39, %v3675_v4  ;;  %v7110_v26 = vcombine.low %v3671_v39, %v3675_v4  ;;  %v3602_v13 = vld [vmem:[%s8677_s15 + $0x128] sm:$0xff]  ;;  %v3600_v39 = vld [vmem:[%s8677_s15 + $0x118] sm:$0xff] }
 0x5a4   : > { %v3604_v4 = vld [vmem:[%s8677_s15 + $0x138] sm:$0xff] }
 0x5a8   : > { %5940 = vmatpush1.bf16.xpose.msra.mxu1 %v7042_v43  ;;  %6022 = vmatpush1.bf16.xpose.msra.mxu0 %v7046_v44  ;;  %v3677_v43 = vld [vmem:[%s8677_s15 + $0x380] sm:$0xff] }
 0x5a9   : > { %5941 = vmatprep.subr.bf16.mxu1 %v7051_v25  ;;  %6023 = vmatprep.subr.bf16.mxu0 %v7055_v17  ;;  %v3681_v44 = vld [vmem:[%s8677_s15 + $0x3a0] sm:$0xff]  ;;  %v3679_v25 = vld [vmem:[%s8677_s15 + $0x390] sm:$0xff] }
 0x5aa   : > { %v3683_v17 = vld [vmem:[%s8677_s15 + $0x3b0] sm:$0xff]  ;;  %v7115_v40 = vcombine.high %v3677_v43, %v3681_v44  ;;  %v7114_v22 = vcombine.low %v3677_v43, %v3681_v44  ;;  %v3606_v43 = vld [vmem:[%s8677_s15 + $0x148] sm:$0xff] }
 0x5ab   : > { %v7119_v21 = vcombine.high %v3679_v25, %v3683_v17  ;;  %v7118_v47 = vcombine.low %v3679_v25, %v3683_v17  ;;  %v3610_v44 = vld [vmem:[%s8677_s15 + $0x168] sm:$0xff]  ;;  %v3608_v25 = vld [vmem:[%s8677_s15 + $0x158] sm:$0xff] }
 0x5ac   : > { %v3612_v17 = vld [vmem:[%s8677_s15 + $0x178] sm:$0xff] }
 0x5b0   : > { %5942 = vmatpush1.bf16.xpose.msra.mxu1 %v7050_v27  ;;  %6024 = vmatpush1.bf16.xpose.msra.mxu0 %v7054_v45  ;;  %v3685_v27 = vld [vmem:[%s8677_s15 + $0x3c0] sm:$0xff] }
 0x5b1   : > { %5943 = vmatprep.subr.bf16.mxu1 %v7059_v49  ;;  %6025 = vmatprep.subr.bf16.mxu0 %v7063_v46  ;;  %v3689_v45 = vld [vmem:[%s8677_s15 + $0x3e0] sm:$0xff]  ;;  %v3687_v49 = vld [vmem:[%s8677_s15 + $0x3d0] sm:$0xff] }
 0x5b2   : > { %v3691_v46 = vld [vmem:[%s8677_s15 + $0x3f0] sm:$0xff]  ;;  %v7123_v61 = vcombine.high %v3685_v27, %v3689_v45  ;;  %v7122_v53 = vcombine.low %v3685_v27, %v3689_v45  ;;  %v3614_v27 = vld [vmem:[%s8677_s15 + $0x188] sm:$0xff] }
 0x5b3   : > { %v7127_v51 = vcombine.high %v3687_v49, %v3691_v46  ;;  %v7126_v54 = vcombine.low %v3687_v49, %v3691_v46  ;;  %v3618_v45 = vld [vmem:[%s8677_s15 + $0x1a8] sm:$0xff]  ;;  %v3616_v49 = vld [vmem:[%s8677_s15 + $0x198] sm:$0xff] }
 0x5b4   : > { %v3620_v46 = vld [vmem:[%s8677_s15 + $0x1b8] sm:$0xff] }
 0x5b8   : > { %5944 = vmatpush1.bf16.xpose.msra.mxu1 %v7058_v23  ;;  %6026 = vmatpush1.bf16.xpose.msra.mxu0 %v7062_v52  ;;  %v3566_v23 = vld [vmem:[%s8677_s15 + $0x8] sm:$0xff] }
 0x5b9   : > { %5945 = vmatprep.subr.bf16.mxu1 %v7067_v50  ;;  %6027 = vmatprep.subr.bf16.mxu0 %v7071_v48  ;;  %v3570_v52 = vld [vmem:[%s8677_s15 + $0x28] sm:$0xff]  ;;  %v3568_v50 = vld [vmem:[%s8677_s15 + $0x18] sm:$0xff] }
 0x5ba   : > { %v3572_v48 = vld [vmem:[%s8677_s15 + $0x38] sm:$0xff]  ;;  %v7005_v56 = vcombine.high %v3566_v23, %v3570_v52  ;;  %v7004_v5 = vcombine.low %v3566_v23, %v3570_v52  ;;  %v3622_v23 = vld [vmem:[%s8677_s15 + $0x1c8] sm:$0xff] }
 0x5bb   : > { %v7009_v57 = vcombine.high %v3568_v50, %v3572_v48  ;;  %v3626_v52 = vld [vmem:[%s8677_s15 + $0x1e8] sm:$0xff] }
 0x5c0   : > { %5946 = vmatpush1.bf16.xpose.msra.mxu1 %v7066_v58  ;;  %6028 = vmatpush1.bf16.xpose.msra.mxu0 %v7070_v60  ;;  %v3574_v58 = vld [vmem:[%s8677_s15 + $0x48] sm:$0xff] }
 0x5c1   : > { %5947 = vmatprep.subr.bf16.mxu1 %v7075_v62  ;;  %6029 = vmatprep.subr.bf16.mxu0 %v7079_v63  ;;  %v3578_v60 = vld [vmem:[%s8677_s15 + $0x68] sm:$0xff]  ;;  %v8914_v62 = vcombine.low %v8844_v20, %v8844_v20  ;;  %v3576_v63 = vld [vmem:[%s8677_s15 + $0x58] sm:$0xff]  ;;  %v8928_v20 = vcombine.high %v8918_v2, %v8918_v2 }
 0x5c8   : > { %5948 = vmatpush1.bf16.xpose.msra.mxu1 %v7074_v8  ;;  %6030 = vmatpush1.bf16.xpose.msra.mxu0 %v7078_v9  ;;  %v8924_v8 = vld [vmem:[#allocation2 + $0x18] sm:$0xff]  ;;  %v7008_v9 = vcombine.low %v3568_v50, %v3572_v48 }
 0x5c9   : > { %5949 = vmatprep.subr.bf16.mxu1 %v7083_v10  ;;  %6031 = vmatprep.subr.bf16.mxu0 %v7087_v29  ;;  %v7013_v10 = vcombine.high %v3574_v58, %v3578_v60  ;;  %v7017_v29 = vcombine.high %v3576_v63, %v3580_v0  ;;  %v8933_v15 = vcombine.high %v8924_v8, %v8924_v8  ;;  %v3624_v50 = vld [vmem:[%s8677_s15 + $0x1d8] sm:$0xff] }
 0x5ca   : > { %v3628_v48 = vld [vmem:[%s8677_s15 + $0x1f8] sm:$0xff] }
 0x5d0   : > { %5950 = vmatpush1.bf16.xpose.msra.mxu1 %v7082_v24  ;;  %6032 = vmatpush1.bf16.xpose.msra.mxu0 %v7086_v28  ;;  %v7012_v24 = vcombine.low %v3574_v58, %v3578_v60  ;;  %v7016_v28 = vcombine.low %v3576_v63, %v3580_v0  ;;  %v3630_v58 = vld [vmem:[%s8677_s15 + $0x208] sm:$0xff]  ;;  %v3632_v63 = vld [vmem:[%s8677_s15 + $0x218] sm:$0xff] }
 0x5d1   : > { %5951 = vmatprep.subr.bf16.mxu1 %v7091_v32  ;;  %6033 = vmatprep.subr.bf16.mxu0 %v7095_v33  ;;  %v7021_v32 = vcombine.high %v3582_v31, %v3586_v18  ;;  %v7025_v33 = vcombine.high %v3584_v1, %v3588_v19  ;;  %v3634_v60 = vld [vmem:[%s8677_s15 + $0x228] sm:$0xff]  ;;  %v3636_v0 = vld [vmem:[%s8677_s15 + $0x238] sm:$0xff] }
 0x5d8   : > { %5952 = vmatpush1.bf16.xpose.msra.mxu1 %v7090_v55  ;;  %6034 = vmatpush1.bf16.xpose.msra.mxu0 %v7094_v14  ;;  %v7020_v55 = vcombine.low %v3582_v31, %v3586_v18  ;;  %v7024_v14 = vcombine.low %v3584_v1, %v3588_v19  ;;  %v3638_v31 = vld [vmem:[%s8677_s15 + $0x248] sm:$0xff]  ;;  %v3640_v1 = vld [vmem:[%s8677_s15 + $0x258] sm:$0xff] }
 0x5d9   : > { %5953 = vmatprep.subr.bf16.mxu1 %v7099_v37  ;;  %6035 = vmatprep.subr.bf16.mxu0 %v7103_v38  ;;  %v7029_v37 = vcombine.high %v3590_v35, %v3594_v36  ;;  %v7033_v38 = vcombine.high %v3592_v30, %v3596_v34  ;;  %v3642_v18 = vld [vmem:[%s8677_s15 + $0x268] sm:$0xff]  ;;  %v3644_v19 = vld [vmem:[%s8677_s15 + $0x278] sm:$0xff] }
 0x5e0   : > { %5954 = vmatpush1.bf16.xpose.msra.mxu1 %v7098_v12  ;;  %6036 = vmatpush1.bf16.xpose.msra.mxu0 %v7102_v41  ;;  %v7028_v12 = vcombine.low %v3590_v35, %v3594_v36  ;;  %v7032_v41 = vcombine.low %v3592_v30, %v3596_v34  ;;  %v3646_v35 = vld [vmem:[%s8677_s15 + $0x288] sm:$0xff]  ;;  %v3648_v30 = vld [vmem:[%s8677_s15 + $0x298] sm:$0xff] }
 0x5e1   : > { %5955 = vmatprep.subr.bf16.mxu1 %v7107_v42  ;;  %6037 = vmatprep.subr.bf16.mxu0 %v7111_v16  ;;  %v7037_v42 = vcombine.high %v3598_v11, %v3602_v13  ;;  %v7041_v16 = vcombine.high %v3600_v39, %v3604_v4  ;;  %v3650_v36 = vld [vmem:[%s8677_s15 + $0x2a8] sm:$0xff]  ;;  %v3652_v34 = vld [vmem:[%s8677_s15 + $0x2b8] sm:$0xff] }
 0x5e8   : > { %5956 = vmatpush1.bf16.xpose.msra.mxu1 %v7106_v59  ;;  %6038 = vmatpush1.bf16.xpose.msra.mxu0 %v7110_v26  ;;  %v7036_v59 = vcombine.low %v3598_v11, %v3602_v13  ;;  %v7040_v26 = vcombine.low %v3600_v39, %v3604_v4  ;;  %v3654_v11 = vld [vmem:[%s8677_s15 + $0x2c8] sm:$0xff]  ;;  %v3656_v39 = vld [vmem:[%s8677_s15 + $0x2d8] sm:$0xff] }
 0x5e9   : > { %5957 = vmatprep.subr.bf16.mxu1 %v7115_v40  ;;  %6039 = vmatprep.subr.bf16.mxu0 %v7119_v21  ;;  %v7045_v40 = vcombine.high %v3606_v43, %v3610_v44  ;;  %v7049_v21 = vcombine.high %v3608_v25, %v3612_v17  ;;  %v3658_v13 = vld [vmem:[%s8677_s15 + $0x2e8] sm:$0xff]  ;;  %v3660_v4 = vld [vmem:[%s8677_s15 + $0x2f8] sm:$0xff] }
 0x5f0   : > { %5958 = vmatpush1.bf16.xpose.msra.mxu1 %v7114_v22  ;;  %6040 = vmatpush1.bf16.xpose.msra.mxu0 %v7118_v47  ;;  %v7044_v22 = vcombine.low %v3606_v43, %v3610_v44  ;;  %v7048_v47 = vcombine.low %v3608_v25, %v3612_v17  ;;  %v3662_v43 = vld [vmem:[%s8677_s15 + $0x308] sm:$0xff]  ;;  %v3664_v25 = vld [vmem:[%s8677_s15 + $0x318] sm:$0xff] }
 0x5f1   : > { %5959 = vmatprep.subr.bf16.mxu1 %v7123_v61  ;;  %6041 = vmatprep.subr.bf16.mxu0 %v7127_v51  ;;  %v7053_v61 = vcombine.high %v3614_v27, %v3618_v45  ;;  %v7057_v51 = vcombine.high %v3616_v49, %v3620_v46  ;;  %v3666_v44 = vld [vmem:[%s8677_s15 + $0x328] sm:$0xff]  ;;  %v3668_v17 = vld [vmem:[%s8677_s15 + $0x338] sm:$0xff] }
 0x5f8   : > { %5960 = vmatpush1.bf16.xpose.msra.mxu1 %v7122_v53  ;;  %6042 = vmatpush1.bf16.xpose.msra.mxu0 %v7126_v54  ;;  %v7052_v53 = vcombine.low %v3614_v27, %v3618_v45  ;;  %v7056_v54 = vcombine.low %v3616_v49, %v3620_v46  ;;  %v3670_v27 = vld [vmem:[%s8677_s15 + $0x348] sm:$0xff]  ;;  %v3672_v49 = vld [vmem:[%s8677_s15 + $0x358] sm:$0xff] }
 0x5f9   : > { %5970 = vmatprep.subr.bf16.mxu1 %v7005_v56  ;;  %6052 = vmatprep.subr.bf16.mxu0 %v7009_v57  ;;  %v7061_v56 = vcombine.high %v3622_v23, %v3626_v52  ;;  %v7065_v57 = vcombine.high %v3624_v50, %v3628_v48  ;;  %v3674_v45 = vld [vmem:[%s8677_s15 + $0x368] sm:$0xff]  ;;  %v3676_v46 = vld [vmem:[%s8677_s15 + $0x378] sm:$0xff] }
 0x5ff   : > { %5962 = vmatmul.mubr.bf16.vlgmr.msra.gmra.mrb[0].mxu1 %v8914_v62  ;;  %6044 = vmatmul.mubr.bf16.vlgmr.msra.gmra.mrb[0].mxu0 %v8922_v6 }
 0x600   : > { %5971 = vmatpush1.bf16.xpose.msra.mxu1 %v7004_v5  ;;  %6053 = vmatpush1.bf16.xpose.msra.mxu0 %v7008_v9  ;;  %v7060_v5 = vcombine.low %v3622_v23, %v3626_v52  ;;  %v7064_v9 = vcombine.low %v3624_v50, %v3628_v48  ;;  %v3678_v23 = vld [vmem:[%s8677_s15 + $0x388] sm:$0xff]  ;;  %v3680_v50 = vld [vmem:[%s8677_s15 + $0x398] sm:$0xff] }
 0x601   : > { %5972 = vmatprep.subr.bf16.mxu1 %v7013_v10  ;;  %6054 = vmatprep.subr.bf16.mxu0 %v7017_v29  ;;  %v7069_v10 = vcombine.high %v3630_v58, %v3634_v60  ;;  %v7073_v29 = vcombine.high %v3632_v63, %v3636_v0  ;;  %v3682_v52 = vld [vmem:[%s8677_s15 + $0x3a8] sm:$0xff]  ;;  %v3684_v48 = vld [vmem:[%s8677_s15 + $0x3b8] sm:$0xff] }
 0x602   : > { %6002 = vmatprep.mubr.bf16.mxu1 %v8928_v20  ;;  %6084 = vmatprep.mubr.bf16.mxu0 %v8933_v15 }
 0x608   : > { %5973 = vmatpush1.bf16.xpose.msra.mxu1 %v7012_v24  ;;  %6055 = vmatpush1.bf16.xpose.msra.mxu0 %v7016_v28  ;;  %v7068_v24 = vcombine.low %v3630_v58, %v3634_v60  ;;  %v7072_v28 = vcombine.low %v3632_v63, %v3636_v0  ;;  %v3686_v58 = vld [vmem:[%s8677_s15 + $0x3c8] sm:$0xff]  ;;  %v3688_v63 = vld [vmem:[%s8677_s15 + $0x3d8] sm:$0xff] }
 0x609   : > { %5974 = vmatprep.subr.bf16.mxu1 %v7021_v32  ;;  %6056 = vmatprep.subr.bf16.mxu0 %v7025_v33  ;;  %v7077_v32 = vcombine.high %v3638_v31, %v3642_v18  ;;  %v7081_v33 = vcombine.high %v3640_v1, %v3644_v19  ;;  %v3690_v60 = vld [vmem:[%s8677_s15 + $0x3e8] sm:$0xff]  ;;  %v3692_v0 = vld [vmem:[%s8677_s15 + $0x3f8] sm:$0xff] }
 0x610   : > { %5975 = vmatpush1.bf16.xpose.msra.mxu1 %v7020_v55  ;;  %6057 = vmatpush1.bf16.xpose.msra.mxu0 %v7024_v14  ;;  %v7076_v55 = vcombine.low %v3638_v31, %v3642_v18  ;;  %v7080_v14 = vcombine.low %v3640_v1, %v3644_v19  ;;  %v3693_v31 = vld [vmem:[%s8677_s15 + $0x400] sm:$0xff] }
 0x611   : > { %5976 = vmatprep.subr.bf16.mxu1 %v7029_v37  ;;  %6058 = vmatprep.subr.bf16.mxu0 %v7033_v38  ;;  %v7085_v37 = vcombine.high %v3646_v35, %v3650_v36  ;;  %v7089_v38 = vcombine.high %v3648_v30, %v3652_v34  ;;  %v3697_v18 = vld [vmem:[%s8677_s15 + $0x420] sm:$0xff] }
 0x612   : > { %v3821_v1 = vld [vmem:[%s8677_s15 + $0x800] sm:$0xff] }
 0x613   : > { %v3825_v19 = vld [vmem:[%s8677_s15 + $0x820] sm:$0xff] }
 0x618   : > { %5977 = vmatpush1.bf16.xpose.msra.mxu1 %v7028_v12  ;;  %6059 = vmatpush1.bf16.xpose.msra.mxu0 %v7032_v41  ;;  %v7084_v12 = vcombine.low %v3646_v35, %v3650_v36  ;;  %v7088_v41 = vcombine.low %v3648_v30, %v3652_v34  ;;  %v3701_v35 = vld [vmem:[%s8677_s15 + $0x440] sm:$0xff]  ;;  %v9002_v30 = vcombine.low %v8918_v2, %v8918_v2 }
 0x619   : > { %5978 = vmatprep.subr.bf16.mxu1 %v7037_v42  ;;  %6060 = vmatprep.subr.bf16.mxu0 %v7041_v16  ;;  %v7093_v42 = vcombine.high %v3654_v11, %v3658_v13  ;;  %v7097_v16 = vcombine.high %v3656_v39, %v3660_v4  ;;  %v3705_v36 = vld [vmem:[%s8677_s15 + $0x460] sm:$0xff] }
 0x61a   : > { %v3829_v34 = vld [vmem:[%s8677_s15 + $0x840] sm:$0xff] }
 0x61b   : > { %v3709_v2 = vld [vmem:[%s8677_s15 + $0x480] sm:$0xff] }
 0x620   : > { %5979 = vmatpush1.bf16.xpose.msra.mxu1 %v7036_v59  ;;  %6061 = vmatpush1.bf16.xpose.msra.mxu0 %v7040_v26  ;;  %v7092_v59 = vcombine.low %v3654_v11, %v3658_v13  ;;  %v7096_v26 = vcombine.low %v3656_v39, %v3660_v4  ;;  %v7139_v11 = vcombine.high %v3701_v35, %v3705_v36  ;;  %v3713_v39 = vld [vmem:[%s8677_s15 + $0x4a0] sm:$0xff] }
 0x621   : > { %5980 = vmatprep.subr.bf16.mxu1 %v7045_v40  ;;  %6062 = vmatprep.subr.bf16.mxu0 %v7049_v21  ;;  %v7101_v40 = vcombine.high %v3662_v43, %v3666_v44  ;;  %v7105_v21 = vcombine.high %v3664_v25, %v3668_v17  ;;  %v3841_v4 = vld [vmem:[%s8677_s15 + $0x8a0] sm:$0xff] }
 0x628   : > { %5981 = vmatpush1.bf16.xpose.msra.mxu1 %v7044_v22  ;;  %6063 = vmatpush1.bf16.xpose.msra.mxu0 %v7048_v47  ;;  %v7100_v22 = vcombine.low %v3662_v43, %v3666_v44  ;;  %v7104_v47 = vcombine.low %v3664_v25, %v3668_v17  ;;  %v3717_v43 = vld [vmem:[%s8677_s15 + $0x4c0] sm:$0xff] }
 0x629   : > { %5982 = vmatprep.subr.bf16.mxu1 %v7053_v61  ;;  %6064 = vmatprep.subr.bf16.mxu0 %v7057_v51  ;;  %v7109_v61 = vcombine.high %v3670_v27, %v3674_v45  ;;  %v7113_v51 = vcombine.high %v3672_v49, %v3676_v46  ;;  %v3721_v44 = vld [vmem:[%s8677_s15 + $0x4e0] sm:$0xff] }
 0x62a   : > { %v3845_v25 = vld [vmem:[%s8677_s15 + $0x8c0] sm:$0xff] }
 0x62b   : > { %v3849_v17 = vld [vmem:[%s8677_s15 + $0x8e0] sm:$0xff] }
 0x630   : > { %5983 = vmatpush1.bf16.xpose.msra.mxu1 %v7052_v53  ;;  %6065 = vmatpush1.bf16.xpose.msra.mxu0 %v7056_v54  ;;  %v7108_v53 = vcombine.low %v3670_v27, %v3674_v45  ;;  %v7112_v54 = vcombine.low %v3672_v49, %v3676_v46  ;;  %v3729_v27 = vld [vmem:[%s8677_s15 + $0x520] sm:$0xff]  ;;  %v7154_v46 = vcombine.low %v3717_v43, %v3721_v44 }
 0x631   : > { %5984 = vmatprep.subr.bf16.mxu1 %v7061_v56  ;;  %6066 = vmatprep.subr.bf16.mxu0 %v7065_v57  ;;  %v7117_v56 = vcombine.high %v3678_v23, %v3682_v52  ;;  %v7121_v57 = vcombine.high %v3680_v50, %v3684_v48  ;;  %v3853_v45 = vld [vmem:[%s8677_s15 + $0x900] sm:$0xff] }
 0x632   : > { %v3857_v49 = vld [vmem:[%s8677_s15 + $0x920] sm:$0xff] }
 0x638   : > { %5985 = vmatpush1.bf16.xpose.msra.mxu1 %v7060_v5  ;;  %6067 = vmatpush1.bf16.xpose.msra.mxu0 %v7064_v9  ;;  %v7116_v5 = vcombine.low %v3678_v23, %v3682_v52  ;;  %v7120_v9 = vcombine.low %v3680_v50, %v3684_v48  ;;  %v3737_v23 = vld [vmem:[%s8677_s15 + $0x560] sm:$0xff] }
 0x639   : > { %5986 = vmatprep.subr.bf16.mxu1 %v7069_v10  ;;  %6068 = vmatprep.subr.bf16.mxu0 %v7073_v29  ;;  %v7125_v10 = vcombine.high %v3686_v58, %v3690_v60  ;;  %v7129_v29 = vcombine.high %v3688_v63, %v3692_v0  ;;  %v3861_v52 = vld [vmem:[%s8677_s15 + $0x940] sm:$0xff] }
 0x63a   : > { %v3865_v50 = vld [vmem:[%s8677_s15 + $0x960] sm:$0xff] }
 0x640   : > { %5987 = vmatpush1.bf16.xpose.msra.mxu1 %v7068_v24  ;;  %6069 = vmatpush1.bf16.xpose.msra.mxu0 %v7072_v28  ;;  %v7124_v24 = vcombine.low %v3686_v58, %v3690_v60  ;;  %v7128_v28 = vcombine.low %v3688_v63, %v3692_v0  ;;  %v3745_v58 = vld [vmem:[%s8677_s15 + $0x5a0] sm:$0xff] }
 0x641   : > { %5988 = vmatprep.subr.bf16.mxu1 %v7077_v32  ;;  %6070 = vmatprep.subr.bf16.mxu0 %v7081_v33  ;;  %v7131_v32 = vcombine.high %v3693_v31, %v3697_v18  ;;  %v7259_v33 = vcombine.high %v3821_v1, %v3825_v19  ;;  %v3869_v60 = vld [vmem:[%s8677_s15 + $0x980] sm:$0xff] }
 0x642   : > { %v3873_v63 = vld [vmem:[%s8677_s15 + $0x9a0] sm:$0xff] }
 0x648   : > { %5989 = vmatpush1.bf16.xpose.msra.mxu1 %v7076_v55  ;;  %6071 = vmatpush1.bf16.xpose.msra.mxu0 %v7080_v14  ;;  %v3833_v55 = vld [vmem:[%s8677_s15 + $0x860] sm:$0xff]  ;;  %v9008_v14 = vcombine.low %v8924_v8, %v8924_v8 }
 0x649   : > { %5990 = vmatprep.subr.bf16.mxu1 %v7085_v37  ;;  %6072 = vmatprep.subr.bf16.mxu0 %v7089_v38  ;;  %v7130_v37 = vcombine.low %v3693_v31, %v3697_v18  ;;  %v7258_v38 = vcombine.low %v3821_v1, %v3825_v19  ;;  %v7267_v13 = vcombine.high %v3829_v34, %v3833_v55  ;;  %v3837_v8 = vld [vmem:[%s8677_s15 + $0x880] sm:$0xff] }
 0x64a   : > { %v3753_v31 = vld [vmem:[%s8677_s15 + $0x5e0] sm:$0xff] }
 0x64b   : > { %v3877_v18 = vld [vmem:[%s8677_s15 + $0x9c0] sm:$0xff] }
 0x64c   : > { %v3881_v1 = vld [vmem:[%s8677_s15 + $0x9e0] sm:$0xff] }
 0x650   : > { %5991 = vmatpush1.bf16.xpose.msra.mxu1 %v7084_v12  ;;  %6073 = vmatpush1.bf16.xpose.msra.mxu0 %v7088_v41  ;;  %v7138_v12 = vcombine.low %v3701_v35, %v3705_v36  ;;  %v7266_v41 = vcombine.low %v3829_v34, %v3833_v55  ;;  %v3761_v35 = vld [vmem:[%s8677_s15 + $0x620] sm:$0xff] }
 0x651   : > { %5992 = vmatprep.subr.bf16.mxu1 %v7093_v42  ;;  %6074 = vmatprep.subr.bf16.mxu0 %v7097_v16  ;;  %v7147_v42 = vcombine.high %v3709_v2, %v3713_v39  ;;  %v7275_v16 = vcombine.high %v3837_v8, %v3841_v4  ;;  %v3885_v36 = vld [vmem:[%s8677_s15 + $0xa00] sm:$0xff] }
 0x652   : > { %v3889_v34 = vld [vmem:[%s8677_s15 + $0xa20] sm:$0xff] }
 0x658   : > { %5993 = vmatpush1.bf16.xpose.msra.mxu1 %v7092_v59  ;;  %6075 = vmatpush1.bf16.xpose.msra.mxu0 %v7096_v26  ;;  %v7146_v59 = vcombine.low %v3709_v2, %v3713_v39  ;;  %v7274_v26 = vcombine.low %v3837_v8, %v3841_v4  ;;  %v3769_v2 = vld [vmem:[%s8677_s15 + $0x660] sm:$0xff] }
 0x659   : > { %5994 = vmatprep.subr.bf16.mxu1 %v7101_v40  ;;  %6076 = vmatprep.subr.bf16.mxu0 %v7105_v21  ;;  %v7155_v40 = vcombine.high %v3717_v43, %v3721_v44  ;;  %v3725_v21 = vld [vmem:[%s8677_s15 + $0x500] sm:$0xff] }
 0x65a   : > { %v7162_v48 = vcombine.low %v3725_v21, %v3729_v27  ;;  %v3893_v39 = vld [vmem:[%s8677_s15 + $0xa40] sm:$0xff] }
 0x65b   : > { %v3897_v8 = vld [vmem:[%s8677_s15 + $0xa60] sm:$0xff] }
 0x65c   : > { %v3777_v43 = vld [vmem:[%s8677_s15 + $0x6a0] sm:$0xff] }
 0x65d   : > { %v3901_v44 = vld [vmem:[%s8677_s15 + $0xa80] sm:$0xff] }
 0x660   : > { %5995 = vmatpush1.bf16.xpose.msra.mxu1 %v7100_v22  ;;  %6077 = vmatpush1.bf16.xpose.msra.mxu0 %v7104_v47  ;;  %v7282_v22 = vcombine.low %v3845_v25, %v3849_v17  ;;  %v7163_v47 = vcombine.high %v3725_v21, %v3729_v27  ;;  %v3785_v21 = vld [vmem:[%s8677_s15 + $0x6e0] sm:$0xff] }
 0x661   : > { %5996 = vmatprep.subr.bf16.mxu1 %v7109_v61  ;;  %6078 = vmatprep.subr.bf16.mxu0 %v7113_v51  ;;  %v7291_v61 = vcombine.high %v3853_v45, %v3857_v49  ;;  %v3733_v51 = vld [vmem:[%s8677_s15 + $0x540] sm:$0xff] }
 0x662   : > { %v7170_v0 = vcombine.low %v3733_v51, %v3737_v23  ;;  %v3909_v27 = vld [vmem:[%s8677_s15 + $0xac0] sm:$0xff] }
 0x668   : > { %5997 = vmatpush1.bf16.xpose.msra.mxu1 %v7108_v53  ;;  %6079 = vmatpush1.bf16.xpose.msra.mxu0 %v7112_v54  ;;  %v7290_v53 = vcombine.low %v3853_v45, %v3857_v49  ;;  %v7171_v54 = vcombine.high %v3733_v51, %v3737_v23  ;;  %v3913_v45 = vld [vmem:[%s8677_s15 + $0xae0] sm:$0xff] }
 0x669   : > { %5998 = vmatprep.subr.bf16.mxu1 %v7117_v56  ;;  %6080 = vmatprep.subr.bf16.mxu0 %v7121_v57  ;;  %v7299_v56 = vcombine.high %v3861_v52, %v3865_v50  ;;  %v3741_v57 = vld [vmem:[%s8677_s15 + $0x580] sm:$0xff] }
 0x66a   : > { %v7178_v19 = vcombine.low %v3741_v57, %v3745_v58  ;;  %v3793_v51 = vld [vmem:[%s8677_s15 + $0x720] sm:$0xff] }
 0x66b   : > { %v3917_v23 = vld [vmem:[%s8677_s15 + $0xb00] sm:$0xff] }
 0x670   : > { %5999 = vmatpush1.bf16.xpose.msra.mxu1 %v7116_v5  ;;  %6081 = vmatpush1.bf16.xpose.msra.mxu0 %v7120_v9  ;;  %v7298_v5 = vcombine.low %v3861_v52, %v3865_v50  ;;  %v7179_v9 = vcombine.high %v3741_v57, %v3745_v58  ;;  %v3921_v52 = vld [vmem:[%s8677_s15 + $0xb20] sm:$0xff] }
 0x671   : > { %6000 = vmatprep.subr.bf16.mxu1 %v7125_v10  ;;  %6082 = vmatprep.subr.bf16.mxu0 %v7129_v29  ;;  %v7307_v10 = vcombine.high %v3869_v60, %v3873_v63  ;;  %v3749_v29 = vld [vmem:[%s8677_s15 + $0x5c0] sm:$0xff] }
 0x672   : > { %v7186_v55 = vcombine.low %v3749_v29, %v3753_v31  ;;  %v3801_v57 = vld [vmem:[%s8677_s15 + $0x760] sm:$0xff] }
 0x673   : > { %v3925_v58 = vld [vmem:[%s8677_s15 + $0xb40] sm:$0xff] }
 0x678   : > { %6001 = vmatpush1.bf16.xpose.msra.mxu1 %v7124_v24  ;;  %6083 = vmatpush1.bf16.xpose.msra.mxu0 %v7128_v28  ;;  %v7306_v24 = vcombine.low %v3869_v60, %v3873_v63  ;;  %v7187_v28 = vcombine.high %v3749_v29, %v3753_v31  ;;  %v3929_v60 = vld [vmem:[%s8677_s15 + $0xb60] sm:$0xff] }
 0x679   : > { %6093 = vmatprep.subr.bf16.mxu1 %v7131_v32  ;;  %6257 = vmatprep.subr.bf16.mxu0 %v7259_v33  ;;  %v7315_v32 = vcombine.high %v3877_v18, %v3881_v1  ;;  %v3757_v33 = vld [vmem:[%s8677_s15 + $0x600] sm:$0xff] }
 0x67a   : > { %v7194_v4 = vcombine.low %v3757_v33, %v3761_v35  ;;  %v3809_v29 = vld [vmem:[%s8677_s15 + $0x7a0] sm:$0xff] }
 0x67b   : > { %v3933_v31 = vld [vmem:[%s8677_s15 + $0xb80] sm:$0xff] }
 0x67f   : > { %6003 = vmatmul.mubr.bf16.vlgmr.msra.gmra.mrb[0].mxu1 %v9002_v30  ;;  %6085 = vmatmul.mubr.bf16.vlgmr.msra.gmra.mrb[0].mxu0 %v9008_v14 }
 0x680   : > { %6094 = vmatpush1.bf16.xpose.msra.mxu1 %v7130_v37  ;;  %6258 = vmatpush1.bf16.xpose.msra.mxu0 %v7258_v38  ;;  %v7314_v37 = vcombine.low %v3877_v18, %v3881_v1  ;;  %v7195_v38 = vcombine.high %v3757_v33, %v3761_v35  ;;  %v3937_v18 = vld [vmem:[%s8677_s15 + $0xba0] sm:$0xff] }
 0x681   : > { %6095 = vmatprep.subr.bf16.mxu1 %v7139_v11  ;;  %6259 = vmatprep.subr.bf16.mxu0 %v7267_v13  ;;  %v7323_v11 = vcombine.high %v3885_v36, %v3889_v34  ;;  %v3765_v13 = vld [vmem:[%s8677_s15 + $0x640] sm:$0xff] }
 0x682   : > { %6125 = vmatprep.mubr.bf16.mxu1 %v8850_v3  ;;  %6289 = vmatprep.mubr.bf16.mxu0 %v8850_v3  ;;  %v7283_v3 = vcombine.high %v3845_v25, %v3849_v17  ;;  %v3905_v25 = vld [vmem:[%s8677_s15 + $0xaa0] sm:$0xff]  ;;  %v7202_v17 = vcombine.low %v3765_v13, %v3769_v2 }
 0x683   : > { %v3817_v33 = vld [vmem:[%s8677_s15 + $0x7e0] sm:$0xff] }
 0x684   : > { %v3941_v35 = vld [vmem:[%s8677_s15 + $0xbc0] sm:$0xff] }
 0x688   : > { %6096 = vmatpush1.bf16.xpose.msra.mxu1 %v7138_v12  ;;  %6260 = vmatpush1.bf16.xpose.msra.mxu0 %v7266_v41  ;;  %v7322_v12 = vcombine.low %v3885_v36, %v3889_v34  ;;  %v7203_v41 = vcombine.high %v3765_v13, %v3769_v2  ;;  %v3945_v36 = vld [vmem:[%s8677_s15 + $0xbe0] sm:$0xff]  ;;  %v3698_v13 = vld [vmem:[%s8677_s15 + $0x428] sm:$0xff] }
 0x689   : > { %6097 = vmatprep.subr.bf16.mxu1 %v7147_v42  ;;  %6261 = vmatprep.subr.bf16.mxu0 %v7275_v16  ;;  %v7331_v42 = vcombine.high %v3893_v39, %v3897_v8  ;;  %v3773_v16 = vld [vmem:[%s8677_s15 + $0x680] sm:$0xff]  ;;  %v3822_v2 = vld [vmem:[%s8677_s15 + $0x808] sm:$0xff] }
 0x68a   : > { %v7210_v49 = vcombine.low %v3773_v16, %v3777_v43 }
 0x690   : > { %6098 = vmatpush1.bf16.xpose.msra.mxu1 %v7146_v59  ;;  %6262 = vmatpush1.bf16.xpose.msra.mxu0 %v7274_v26  ;;  %v7330_v59 = vcombine.low %v3893_v39, %v3897_v8  ;;  %v7211_v26 = vcombine.high %v3773_v16, %v3777_v43  ;;  %v3826_v39 = vld [vmem:[%s8677_s15 + $0x828] sm:$0xff] }
 0x691   : > { %6099 = vmatprep.subr.bf16.mxu1 %v7155_v40  ;;  %6263 = vmatprep.subr.bf16.mxu0 %v7283_v3  ;;  %v7339_v40 = vcombine.high %v3901_v44, %v3905_v25  ;;  %v3781_v3 = vld [vmem:[%s8677_s15 + $0x6c0] sm:$0xff]  ;;  %v3706_v16 = vld [vmem:[%s8677_s15 + $0x468] sm:$0xff] }
 0x692   : > { %v7218_v50 = vcombine.low %v3781_v3, %v3785_v21  ;;  %v3830_v43 = vld [vmem:[%s8677_s15 + $0x848] sm:$0xff] }
 0x698   : > { %6100 = vmatpush1.bf16.xpose.msra.mxu1 %v7154_v46  ;;  %6264 = vmatpush1.bf16.xpose.msra.mxu0 %v7282_v22  ;;  %v7338_v46 = vcombine.low %v3901_v44, %v3905_v25  ;;  %v7219_v22 = vcombine.high %v3781_v3, %v3785_v21  ;;  %v3834_v44 = vld [vmem:[%s8677_s15 + $0x868] sm:$0xff] }
 0x699   : > { %6101 = vmatprep.subr.bf16.mxu1 %v7163_v47  ;;  %6265 = vmatprep.subr.bf16.mxu0 %v7291_v61  ;;  %v7347_v47 = vcombine.high %v3909_v27, %v3913_v45  ;;  %v3789_v61 = vld [vmem:[%s8677_s15 + $0x700] sm:$0xff]  ;;  %v3714_v3 = vld [vmem:[%s8677_s15 + $0x4a8] sm:$0xff] }
 0x69a   : > { %v7226_v63 = vcombine.low %v3789_v61, %v3793_v51  ;;  %v3838_v21 = vld [vmem:[%s8677_s15 + $0x888] sm:$0xff] }
 0x6a0   : > { %6102 = vmatpush1.bf16.xpose.msra.mxu1 %v7162_v48  ;;  %6266 = vmatpush1.bf16.xpose.msra.mxu0 %v7290_v53  ;;  %v7346_v48 = vcombine.low %v3909_v27, %v3913_v45  ;;  %v7227_v53 = vcombine.high %v3789_v61, %v3793_v51  ;;  %v3842_v27 = vld [vmem:[%s8677_s15 + $0x8a8] sm:$0xff] }
 0x6a1   : > { %6103 = vmatprep.subr.bf16.mxu1 %v7171_v54  ;;  %6267 = vmatprep.subr.bf16.mxu0 %v7299_v56  ;;  %v7355_v54 = vcombine.high %v3917_v23, %v3921_v52  ;;  %v3797_v56 = vld [vmem:[%s8677_s15 + $0x740] sm:$0xff]  ;;  %v3846_v61 = vld [vmem:[%s8677_s15 + $0x8c8] sm:$0xff] }
 0x6a2   : > { %v7234_v1 = vcombine.low %v3797_v56, %v3801_v57  ;;  %v3850_v51 = vld [vmem:[%s8677_s15 + $0x8e8] sm:$0xff] }
 0x6a8   : > { %6104 = vmatpush1.bf16.xpose.msra.mxu1 %v7170_v0  ;;  %6268 = vmatpush1.bf16.xpose.msra.mxu0 %v7298_v5  ;;  %v7354_v0 = vcombine.low %v3917_v23, %v3921_v52  ;;  %v7235_v5 = vcombine.high %v3797_v56, %v3801_v57  ;;  %v7276_v52 = vcombine.low %v3838_v21, %v3842_v27  ;;  %v3858_v56 = vld [vmem:[%s8677_s15 + $0x928] sm:$0xff] }
 0x6a9   : > { %6105 = vmatprep.subr.bf16.mxu1 %v7179_v9  ;;  %6269 = vmatprep.subr.bf16.mxu0 %v7307_v10  ;;  %v7363_v9 = vcombine.high %v3925_v58, %v3929_v60  ;;  %v3805_v10 = vld [vmem:[%s8677_s15 + $0x780] sm:$0xff] }
 0x6aa   : > { %v7242_v34 = vcombine.low %v3805_v10, %v3809_v29 }
 0x6b0   : > { %6106 = vmatpush1.bf16.xpose.msra.mxu1 %v7178_v19  ;;  %6270 = vmatpush1.bf16.xpose.msra.mxu0 %v7306_v24  ;;  %v7362_v19 = vcombine.low %v3925_v58, %v3929_v60  ;;  %v7243_v24 = vcombine.high %v3805_v10, %v3809_v29  ;;  %v7284_v58 = vcombine.low %v3846_v61, %v3850_v51  ;;  %v3866_v10 = vld [vmem:[%s8677_s15 + $0x968] sm:$0xff] }
 0x6b1   : > { %6107 = vmatprep.subr.bf16.mxu1 %v7187_v28  ;;  %6271 = vmatprep.subr.bf16.mxu0 %v7315_v32  ;;  %v7371_v28 = vcombine.high %v3933_v31, %v3937_v18  ;;  %v3813_v32 = vld [vmem:[%s8677_s15 + $0x7c0] sm:$0xff] }
 0x6b2   : > { %v7250_v8 = vcombine.low %v3813_v32, %v3817_v33 }
 0x6b8   : > { %6108 = vmatpush1.bf16.xpose.msra.mxu1 %v7186_v55  ;;  %6272 = vmatpush1.bf16.xpose.msra.mxu0 %v7314_v37  ;;  %v7370_v55 = vcombine.low %v3933_v31, %v3937_v18  ;;  %v7251_v37 = vcombine.high %v3813_v32, %v3817_v33  ;;  %v3874_v32 = vld [vmem:[%s8677_s15 + $0x9a8] sm:$0xff] }
 0x6b9   : > { %6109 = vmatprep.subr.bf16.mxu1 %v7195_v38  ;;  %6273 = vmatprep.subr.bf16.mxu0 %v7323_v11  ;;  %v7379_v38 = vcombine.high %v3941_v35, %v3945_v36  ;;  %v3694_v11 = vld [vmem:[%s8677_s15 + $0x408] sm:$0xff] }
 0x6ba   : > { %v7132_v25 = vcombine.low %v3694_v11, %v3698_v13 }
 0x6c0   : > { %6110 = vmatpush1.bf16.xpose.msra.mxu1 %v7194_v4  ;;  %6274 = vmatpush1.bf16.xpose.msra.mxu0 %v7322_v12  ;;  %v7378_v4 = vcombine.low %v3941_v35, %v3945_v36  ;;  %v7133_v12 = vcombine.high %v3694_v11, %v3698_v13  ;;  %v3882_v11 = vld [vmem:[%s8677_s15 + $0x9e8] sm:$0xff] }
 0x6c1   : > { %6111 = vmatprep.subr.bf16.mxu1 %v7203_v41  ;;  %6275 = vmatprep.subr.bf16.mxu0 %v7331_v42  ;;  %v7261_v41 = vcombine.high %v3822_v2, %v3826_v39  ;;  %v3702_v42 = vld [vmem:[%s8677_s15 + $0x448] sm:$0xff] }
 0x6c2   : > { %v7140_v45 = vcombine.low %v3702_v42, %v3706_v16 }
 0x6c8   : > { %6112 = vmatpush1.bf16.xpose.msra.mxu1 %v7202_v17  ;;  %6276 = vmatpush1.bf16.xpose.msra.mxu0 %v7330_v59  ;;  %v7260_v17 = vcombine.low %v3822_v2, %v3826_v39  ;;  %v7141_v59 = vcombine.high %v3702_v42, %v3706_v16  ;;  %v3890_v42 = vld [vmem:[%s8677_s15 + $0xa28] sm:$0xff] }
 0x6c9   : > { %6113 = vmatprep.subr.bf16.mxu1 %v7211_v26  ;;  %6277 = vmatprep.subr.bf16.mxu0 %v7339_v40  ;;  %v7269_v26 = vcombine.high %v3830_v43, %v3834_v44  ;;  %v3710_v40 = vld [vmem:[%s8677_s15 + $0x488] sm:$0xff] }
 0x6ca   : > { %v7148_v23 = vcombine.low %v3710_v40, %v3714_v3 }
 0x6d0   : > { %6114 = vmatpush1.bf16.xpose.msra.mxu1 %v7210_v49  ;;  %6278 = vmatpush1.bf16.xpose.msra.mxu0 %v7338_v46  ;;  %v7268_v49 = vcombine.low %v3830_v43, %v3834_v44  ;;  %v7149_v46 = vcombine.high %v3710_v40, %v3714_v3  ;;  %v3898_v40 = vld [vmem:[%s8677_s15 + $0xa68] sm:$0xff] }
 0x6d1   : > { %6115 = vmatprep.subr.bf16.mxu1 %v7219_v22  ;;  %6279 = vmatprep.subr.bf16.mxu0 %v7347_v47  ;;  %v7277_v22 = vcombine.high %v3838_v21, %v3842_v27  ;;  %v3722_v47 = vld [vmem:[%s8677_s15 + $0x4e8] sm:$0xff] }
 0x6d8   : > { %6116 = vmatpush1.bf16.xpose.msra.mxu1 %v7218_v50  ;;  %6280 = vmatpush1.bf16.xpose.msra.mxu0 %v7346_v48  ;;  %v3726_v48 = vld [vmem:[%s8677_s15 + $0x508] sm:$0xff] }
 0x6d9   : > { %6117 = vmatprep.subr.bf16.mxu1 %v7227_v53  ;;  %6281 = vmatprep.subr.bf16.mxu0 %v7355_v54  ;;  %v3730_v53 = vld [vmem:[%s8677_s15 + $0x528] sm:$0xff] }
 0x6da   : > { %v3854_v54 = vld [vmem:[%s8677_s15 + $0x908] sm:$0xff]  ;;  %v7165_v60 = vcombine.high %v3726_v48, %v3730_v53  ;;  %v7164_v29 = vcombine.low %v3726_v48, %v3730_v53 }
 0x6db   : > { %v7292_v31 = vcombine.low %v3854_v54, %v3858_v56  ;;  %v3786_v48 = vld [vmem:[%s8677_s15 + $0x6e8] sm:$0xff] }
 0x6e0   : > { %6118 = vmatpush1.bf16.xpose.msra.mxu1 %v7226_v63  ;;  %6282 = vmatpush1.bf16.xpose.msra.mxu0 %v7354_v0  ;;  %v7293_v63 = vcombine.high %v3854_v54, %v3858_v56  ;;  %v3734_v0 = vld [vmem:[%s8677_s15 + $0x548] sm:$0xff] }
 0x6e1   : > { %6119 = vmatprep.subr.bf16.mxu1 %v7235_v5  ;;  %6283 = vmatprep.subr.bf16.mxu0 %v7363_v9  ;;  %v3738_v5 = vld [vmem:[%s8677_s15 + $0x568] sm:$0xff] }
 0x6e2   : > { %v3862_v9 = vld [vmem:[%s8677_s15 + $0x948] sm:$0xff]  ;;  %v7173_v18 = vcombine.high %v3734_v0, %v3738_v5  ;;  %v7172_v33 = vcombine.low %v3734_v0, %v3738_v5 }
 0x6e3   : > { %v7300_v35 = vcombine.low %v3862_v9, %v3866_v10  ;;  %v3910_v54 = vld [vmem:[%s8677_s15 + $0xac8] sm:$0xff] }
 0x6e4   : > { %v3914_v56 = vld [vmem:[%s8677_s15 + $0xae8] sm:$0xff] }
 0x6e5   : > { %v7349_v5 = vcombine.high %v3910_v54, %v3914_v56 }
 0x6e8   : > { %6120 = vmatpush1.bf16.xpose.msra.mxu1 %v7234_v1  ;;  %6284 = vmatpush1.bf16.xpose.msra.mxu0 %v7362_v19  ;;  %v7301_v1 = vcombine.high %v3862_v9, %v3866_v10  ;;  %v3742_v19 = vld [vmem:[%s8677_s15 + $0x588] sm:$0xff] }
 0x6e9   : > { %6121 = vmatprep.subr.bf16.mxu1 %v7243_v24  ;;  %6285 = vmatprep.subr.bf16.mxu0 %v7371_v28  ;;  %v3746_v24 = vld [vmem:[%s8677_s15 + $0x5a8] sm:$0xff] }
 0x6ea   : > { %v3870_v28 = vld [vmem:[%s8677_s15 + $0x988] sm:$0xff]  ;;  %v7181_v36 = vcombine.high %v3742_v19, %v3746_v24  ;;  %v7180_v13 = vcombine.low %v3742_v19, %v3746_v24 }
 0x6eb   : > { %v7308_v2 = vcombine.low %v3870_v28, %v3874_v32 }
 0x6f0   : > { %6122 = vmatpush1.bf16.xpose.msra.mxu1 %v7242_v34  ;;  %6286 = vmatpush1.bf16.xpose.msra.mxu0 %v7370_v55  ;;  %v7309_v34 = vcombine.high %v3870_v28, %v3874_v32  ;;  %v3750_v55 = vld [vmem:[%s8677_s15 + $0x5c8] sm:$0xff] }
 0x6f1   : > { %6123 = vmatprep.subr.bf16.mxu1 %v7251_v37  ;;  %6287 = vmatprep.subr.bf16.mxu0 %v7379_v38  ;;  %v3754_v37 = vld [vmem:[%s8677_s15 + $0x5e8] sm:$0xff] }
 0x6f2   : > { %v3878_v38 = vld [vmem:[%s8677_s15 + $0x9c8] sm:$0xff]  ;;  %v7189_v39 = vcombine.high %v3750_v55, %v3754_v37  ;;  %v7188_v16 = vcombine.low %v3750_v55, %v3754_v37 }
 0x6f3   : > { %v7316_v43 = vcombine.low %v3878_v38, %v3882_v11  ;;  %v3918_v28 = vld [vmem:[%s8677_s15 + $0xb08] sm:$0xff] }
 0x6f4   : > { %v3922_v32 = vld [vmem:[%s8677_s15 + $0xb28] sm:$0xff] }
 0x6f8   : > { %6124 = vmatpush1.bf16.xpose.msra.mxu1 %v7250_v8  ;;  %6288 = vmatpush1.bf16.xpose.msra.mxu0 %v7378_v4  ;;  %v7317_v8 = vcombine.high %v3878_v38, %v3882_v11  ;;  %v3758_v4 = vld [vmem:[%s8677_s15 + $0x608] sm:$0xff]  ;;  %v7348_v11 = vcombine.low %v3910_v54, %v3914_v56  ;;  %v3823_v54 = vld [vmem:[%s8677_s15 + $0x810] sm:$0xff] }
 0x6f9   : > { %6134 = vmatprep.subr.bf16.mxu1 %v7133_v12  ;;  %6298 = vmatprep.subr.bf16.mxu0 %v7261_v41  ;;  %v3762_v12 = vld [vmem:[%s8677_s15 + $0x628] sm:$0xff]  ;;  %v3827_v56 = vld [vmem:[%s8677_s15 + $0x830] sm:$0xff] }
 0x6fa   : > { %v3886_v41 = vld [vmem:[%s8677_s15 + $0xa08] sm:$0xff]  ;;  %v7197_v44 = vcombine.high %v3758_v4, %v3762_v12  ;;  %v7196_v3 = vcombine.low %v3758_v4, %v3762_v12 }
 0x6fb   : > { %v7324_v21 = vcombine.low %v3886_v41, %v3890_v42  ;;  %v3798_v4 = vld [vmem:[%s8677_s15 + $0x748] sm:$0xff] }
 0x6fc   : > { %v3802_v12 = vld [vmem:[%s8677_s15 + $0x768] sm:$0xff] }
 0x6ff   : > { %6126 = vmatmul.mubr.bf16.vlgmr.msra.gmra.mrb[4].mxu1 %v8914_v62  ;;  %6290 = vmatmul.mubr.bf16.vlgmr.msra.gmra.mrb[4].mxu0 %v8914_v62  ;;  %v3718_v62 = vld [vmem:[%s8677_s15 + $0x4c8] sm:$0xff] }
 0x700   : > { %6135 = vmatpush1.bf16.xpose.msra.mxu1 %v7132_v25  ;;  %6299 = vmatpush1.bf16.xpose.msra.mxu0 %v7260_v17  ;;  %v7157_v50 = vcombine.high %v3718_v62, %v3722_v47  ;;  %v7156_v57 = vcombine.low %v3718_v62, %v3722_v47  ;;  %v7325_v25 = vcombine.high %v3886_v41, %v3890_v42  ;;  %v3766_v17 = vld [vmem:[%s8677_s15 + $0x648] sm:$0xff]  ;;  %v3951_v47 = vlaneseq }
 0x701   : > { %6136 = vmatprep.subr.bf16.mxu1 %v7141_v59  ;;  %6300 = vmatprep.subr.bf16.mxu0 %v7269_v26  ;;  %v3770_v59 = vld [vmem:[%s8677_s15 + $0x668] sm:$0xff] }
 0x702   : > { %6166 = vmatprep.mubr.bf16.mxu1 %v8928_v20  ;;  %6330 = vmatprep.mubr.bf16.mxu0 %v8928_v20  ;;  %v7285_v20 = vcombine.high %v3846_v61, %v3850_v51  ;;  %v3894_v26 = vld [vmem:[%s8677_s15 + $0xa48] sm:$0xff]  ;;  %v7205_v27 = vcombine.high %v3766_v17, %v3770_v59  ;;  %v7204_v61 = vcombine.low %v3766_v17, %v3770_v59 }
 0x703   : > { %v3906_v62 = vld [vmem:[%s8677_s15 + $0xaa8] sm:$0xff]  ;;  %v7332_v51 = vcombine.low %v3894_v26, %v3898_v40 }
 0x704   : > { %v3926_v41 = vld [vmem:[%s8677_s15 + $0xb48] sm:$0xff] }
 0x705   : > { %v3930_v42 = vld [vmem:[%s8677_s15 + $0xb68] sm:$0xff] }
 0x708   : > { %6137 = vmatpush1.bf16.xpose.msra.mxu1 %v7140_v45  ;;  %6301 = vmatpush1.bf16.xpose.msra.mxu0 %v7268_v49  ;;  %v7333_v45 = vcombine.high %v3894_v26, %v3898_v40  ;;  %v3774_v49 = vld [vmem:[%s8677_s15 + $0x688] sm:$0xff] }
 0x709   : > { %6138 = vmatprep.subr.bf16.mxu1 %v7149_v46  ;;  %6302 = vmatprep.subr.bf16.mxu0 %v7277_v22  ;;  %v3778_v46 = vld [vmem:[%s8677_s15 + $0x6a8] sm:$0xff] }
 0x70a   : > { %v3902_v22 = vld [vmem:[%s8677_s15 + $0xa88] sm:$0xff] }
 0x70b   : > { %v3806_v26 = vld [vmem:[%s8677_s15 + $0x788] sm:$0xff] }
 0x70c   : > { %v3810_v40 = vld [vmem:[%s8677_s15 + $0x7a8] sm:$0xff] }
 0x710   : > { %6139 = vmatpush1.bf16.xpose.msra.mxu1 %v7148_v23  ;;  %6303 = vmatpush1.bf16.xpose.msra.mxu0 %v7276_v52  ;;  %v7213_v23 = vcombine.high %v3774_v49, %v3778_v46  ;;  %v7341_v52 = vcombine.high %v3902_v22, %v3906_v62 }
 0x711   : > { %6140 = vmatprep.subr.bf16.mxu1 %v7157_v50  ;;  %6304 = vmatprep.subr.bf16.mxu0 %v7285_v20  ;;  %v9118_v50 = vshrl.u32 %v3951_v47, 7  ;;  %v3782_v20 = vld [vmem:[%s8677_s15 + $0x6c8] sm:$0xff] }
 0x712   : > { %v7221_v0 = vcombine.high %v3782_v20, %v3786_v48  ;;  %v3942_v47 = vld [vmem:[%s8677_s15 + $0xbc8] sm:$0xff] }
 0x713   : > { %v3953_v53 = vsub.s32 0, %v9118_v50 }
 0x718   : > { %6141 = vmatpush1.bf16.xpose.msra.mxu1 %v7156_v57  ;;  %6305 = vmatpush1.bf16.xpose.msra.mxu0 %v7284_v58  ;;  %v7212_v57 = vcombine.low %v3774_v49, %v3778_v46  ;;  %v9126_v58 = vld [vmem:[%s8685_s25] sm:$0x3f]  ;;  %v7245_v49 = vcombine.high %v3806_v26, %v3810_v40 }
 0x719   : > { %6142 = vmatprep.subr.bf16.mxu1 %v7165_v60  ;;  %6306 = vmatprep.subr.bf16.mxu0 %v7293_v63  ;;  %v3957_v60 = vsub.s32 1, %v9118_v50  ;;  %v7340_v63 = vcombine.low %v3902_v22, %v3906_v62  ;;  %v3954_v9 = vrot.slane %v9126_v58, %v3953_v53  ;;  %v3814_v22 = vld [vmem:[%s8677_s15 + $0x7c8] sm:$0xff]  ;;  %v3699_v53 = vld [vmem:[%s8677_s15 + $0x430] sm:$0xff] }
 0x71a   : > { %v3818_v62 = vld [vmem:[%s8677_s15 + $0x7e8] sm:$0xff] }
 0x71b   : > { %v3958_v10 = vrot.slane %v9126_v58, %v3957_v60 }
 0x720   : > { %6143 = vmatpush1.bf16.xpose.msra.mxu1 %v7164_v29  ;;  %6307 = vmatpush1.bf16.xpose.msra.mxu0 %v7292_v31  ;;  %v3790_v31 = vld [vmem:[%s8677_s15 + $0x708] sm:$0xff] }
 0x721   : > { %6144 = vmatprep.subr.bf16.mxu1 %v7173_v18  ;;  %6308 = vmatprep.subr.bf16.mxu0 %v7301_v1  ;;  %v3794_v18 = vld [vmem:[%s8677_s15 + $0x728] sm:$0xff] }
 0x728   : > { %6145 = vmatpush1.bf16.xpose.msra.mxu1 %v7172_v33  ;;  %6309 = vmatpush1.bf16.xpose.msra.mxu0 %v7300_v35 }
 0x729   : > { %6146 = vmatprep.subr.bf16.mxu1 %v7181_v36  ;;  %6310 = vmatprep.subr.bf16.mxu0 %v7309_v34  ;;  %v7220_v34 = vcombine.low %v3782_v20, %v3786_v48  ;;  %v3695_v48 = vld [vmem:[%s8677_s15 + $0x410] sm:$0xff] }
 0x730   : > { %6147 = vmatpush1.bf16.xpose.msra.mxu1 %v7180_v13  ;;  %6311 = vmatpush1.bf16.xpose.msra.mxu0 %v7308_v2  ;;  %v7229_v13 = vcombine.high %v3790_v31, %v3794_v18 }
 0x731   : > { %6148 = vmatprep.subr.bf16.mxu1 %v7189_v39  ;;  %6312 = vmatprep.subr.bf16.mxu0 %v7317_v8  ;;  %v7357_v8 = vcombine.high %v3918_v28, %v3922_v32 }
 0x738   : > { %6149 = vmatpush1.bf16.xpose.msra.mxu1 %v7188_v16  ;;  %6313 = vmatpush1.bf16.xpose.msra.mxu0 %v7316_v43  ;;  %v7228_v16 = vcombine.low %v3790_v31, %v3794_v18  ;;  %v7356_v43 = vcombine.low %v3918_v28, %v3922_v32  ;;  %v7134_v31 = vcombine.low %v3695_v48, %v3699_v53  ;;  %v3715_v28 = vld [vmem:[%s8677_s15 + $0x4b0] sm:$0xff] }
 0x739   : > { %6150 = vmatprep.subr.bf16.mxu1 %v7197_v44  ;;  %6314 = vmatprep.subr.bf16.mxu0 %v7325_v25  ;;  %v7237_v44 = vcombine.high %v3798_v4, %v3802_v12  ;;  %v7365_v25 = vcombine.high %v3926_v41, %v3930_v42  ;;  %v7262_v18 = vcombine.low %v3823_v54, %v3827_v56  ;;  %v3839_v32 = vld [vmem:[%s8677_s15 + $0x890] sm:$0xff] }
 0x740   : > { %6151 = vmatpush1.bf16.xpose.msra.mxu1 %v7196_v3  ;;  %6315 = vmatpush1.bf16.xpose.msra.mxu0 %v7324_v21  ;;  %v3934_v3 = vld [vmem:[%s8677_s15 + $0xb88] sm:$0xff] }
 0x741   : > { %6152 = vmatprep.subr.bf16.mxu1 %v7205_v27  ;;  %6316 = vmatprep.subr.bf16.mxu0 %v7333_v45  ;;  %v3938_v21 = vld [vmem:[%s8677_s15 + $0xba8] sm:$0xff]  ;;  %v7236_v27 = vcombine.low %v3798_v4, %v3802_v12  ;;  %v7364_v45 = vcombine.low %v3926_v41, %v3930_v42  ;;  %v3731_v4 = vld [vmem:[%s8677_s15 + $0x530] sm:$0xff] }
 0x742   : > { %v7373_v46 = vcombine.high %v3934_v3, %v3938_v21  ;;  %v3855_v12 = vld [vmem:[%s8677_s15 + $0x910] sm:$0xff] }
 0x743   : > { %v3859_v41 = vld [vmem:[%s8677_s15 + $0x930] sm:$0xff] }
 0x748   : > { %6153 = vmatpush1.bf16.xpose.msra.mxu1 %v7204_v61  ;;  %6317 = vmatpush1.bf16.xpose.msra.mxu0 %v7332_v51  ;;  %v3946_v61 = vld [vmem:[%s8677_s15 + $0xbe8] sm:$0xff]  ;;  %v7244_v51 = vcombine.low %v3806_v26, %v3810_v40  ;;  %v3867_v26 = vld [vmem:[%s8677_s15 + $0x970] sm:$0xff] }
 0x749   : > { %6154 = vmatprep.subr.bf16.mxu1 %v7213_v23  ;;  %6318 = vmatprep.subr.bf16.mxu0 %v7341_v52  ;;  %v7372_v23 = vcombine.low %v3934_v3, %v3938_v21  ;;  %v7253_v52 = vcombine.high %v3814_v22, %v3818_v62  ;;  %v7381_v20 = vcombine.high %v3942_v47, %v3946_v61 }
 0x74a   : > { %v7380_v60 = vcombine.low %v3942_v47, %v3946_v61  ;;  %v7294_v3 = vcombine.low %v3855_v12, %v3859_v41 }
 0x750   : > { %6155 = vmatpush1.bf16.xpose.msra.mxu1 %v7212_v57  ;;  %6319 = vmatpush1.bf16.xpose.msra.mxu0 %v7340_v63  ;;  %v7252_v57 = vcombine.low %v3814_v22, %v3818_v62  ;;  %v7135_v63 = vcombine.high %v3695_v48, %v3699_v53  ;;  %v3875_v22 = vld [vmem:[%s8677_s15 + $0x9b0] sm:$0xff] }
 0x751   : > { %6156 = vmatprep.subr.bf16.mxu1 %v7221_v0  ;;  %6320 = vmatprep.subr.bf16.mxu0 %v7349_v5  ;;  %v7263_v0 = vcombine.high %v3823_v54, %v3827_v56  ;;  %v3703_v5 = vld [vmem:[%s8677_s15 + $0x450] sm:$0xff] }
 0x752   : > { %v6004_v29 = vpop.f32.mrb[0].mxu1  ;;  %v6086_v19 = vpop.f32.mrb[0].mxu0  ;;  %v3883_v48 = vld [vmem:[%s8677_s15 + $0x9f0] sm:$0xff] }
 0x753   : > { %v7414_v1 = vadd.f32 %v6004_v29, %v3954_v9  ;;  %v6006_v24 = vpop.f32.mrb[1].mxu1  ;;  %v6088_v35 = vpop.f32.mrb[1].mxu0  ;;  %v3707_v9 = vld [vmem:[%s8677_s15 + $0x470] sm:$0xff] }
 0x754   : > { %v7416_v33 = vadd.f32 %v6006_v24, %v3958_v10  ;;  %v6008_v36 = vpop.f32.mrb[2].mxu1  ;;  %v6090_v37 = vpop.f32.mrb[2].mxu0  ;;  %v3831_v10 = vld [vmem:[%s8677_s15 + $0x850] sm:$0xff] }
 0x755   : > { %v7415_v55 = vadd.f32 %v7414_v1, %v6086_v19  ;;  %v6009_v38 = vpop.f32.mrb[3].mxu1  ;;  %v6091_v39 = vpop.f32.mrb[3].mxu0  ;;  %v3835_v29 = vld [vmem:[%s8677_s15 + $0x870] sm:$0xff]  ;;  %v7143_v1 = vcombine.high %v3703_v5, %v3707_v9 }
 0x756   : > { %v7417_v2 = vadd.f32 %v7416_v33, %v6088_v35  ;;  %v7271_v19 = vcombine.high %v3831_v10, %v3835_v29  ;;  %v3711_v24 = vld [vmem:[%s8677_s15 + $0x490] sm:$0xff]  ;;  %v7142_v35 = vcombine.low %v3703_v5, %v3707_v9  ;;  %v7270_v36 = vcombine.low %v3831_v10, %v3835_v29 }
 0x757   : > { %7762 = vtanh.f32 %v7415_v55  ;;  %v3843_v33 = vld [vmem:[%s8677_s15 + $0x8b0] sm:$0xff] }
 0x758   : > { %7764 = vtanh.f32 %v7417_v2  ;;  %6157 = vmatpush1.bf16.xpose.msra.mxu1 %v7220_v34  ;;  %6321 = vmatpush1.bf16.xpose.msra.mxu0 %v7348_v11  ;;  %v7151_v34 = vcombine.high %v3711_v24, %v3715_v28  ;;  %v7279_v55 = vcombine.high %v3839_v32, %v3843_v33  ;;  %v3723_v37 = vld [vmem:[%s8677_s15 + $0x4f0] sm:$0xff]  ;;  %v7278_v2 = vcombine.low %v3839_v32, %v3843_v33 }
 0x759   : > { %6158 = vmatprep.subr.bf16.mxu1 %v7229_v13  ;;  %6322 = vmatprep.subr.bf16.mxu0 %v7357_v8  ;;  %v3847_v38 = vld [vmem:[%s8677_s15 + $0x8d0] sm:$0xff]  ;;  %v7150_v13 = vcombine.low %v3711_v24, %v3715_v28 }
 0x75a   : > { %v3851_v11 = vld [vmem:[%s8677_s15 + $0x8f0] sm:$0xff] }
 0x75b   : > { %v3727_v8 = vld [vmem:[%s8677_s15 + $0x510] sm:$0xff] }
 0x75c   : > { %v7166_v40 = vcombine.low %v3727_v8, %v3731_v4  ;;  %v3891_v5 = vld [vmem:[%s8677_s15 + $0xa30] sm:$0xff] }
 0x75d   : > { %v3899_v24 = vld [vmem:[%s8677_s15 + $0xa70] sm:$0xff] }
 0x760   : > { %6159 = vmatpush1.bf16.xpose.msra.mxu1 %v7228_v16  ;;  %6323 = vmatpush1.bf16.xpose.msra.mxu0 %v7356_v43  ;;  %v7286_v16 = vcombine.low %v3847_v38, %v3851_v11  ;;  %v7167_v43 = vcombine.high %v3727_v8, %v3731_v4  ;;  %v3915_v8 = vld [vmem:[%s8677_s15 + $0xaf0] sm:$0xff] }
 0x761   : > { %v7763_v17 = vpop.eup %7762  ;;  %6160 = vmatprep.subr.bf16.mxu1 %v7237_v44  ;;  %6324 = vmatprep.subr.bf16.mxu0 %v7365_v25  ;;  %v7295_v44 = vcombine.high %v3855_v12, %v3859_v41  ;;  %v3735_v25 = vld [vmem:[%s8677_s15 + $0x550] sm:$0xff] }
 0x762   : > { %v7765_v59 = vpop.eup %7764  ;;  %6427 = vst [vmem:[%s8687_s21] sm:$0xff] %v7763_v17  ;;  %v3739_v17 = vld [vmem:[%s8677_s15 + $0x570] sm:$0xff] }
 0x763   : > { %6428 = vst [vmem:[%s8687_s21 + $0x8] sm:$0xff] %v7765_v59  ;;  %v3863_v59 = vld [vmem:[%s8677_s15 + $0x950] sm:$0xff]  ;;  %v7175_v21 = vcombine.high %v3735_v25, %v3739_v17  ;;  %v7174_v62 = vcombine.low %v3735_v25, %v3739_v17 }
 0x764   : > { %v7302_v47 = vcombine.low %v3863_v59, %v3867_v26  ;;  %v3923_v25 = vld [vmem:[%s8677_s15 + $0xb30] sm:$0xff] }
 0x768   : > { %6161 = vmatpush1.bf16.xpose.msra.mxu1 %v7236_v27  ;;  %6325 = vmatpush1.bf16.xpose.msra.mxu0 %v7364_v45  ;;  %v7303_v27 = vcombine.high %v3863_v59, %v3867_v26  ;;  %v3743_v45 = vld [vmem:[%s8677_s15 + $0x590] sm:$0xff] }
 0x769   : > { %6162 = vmatprep.subr.bf16.mxu1 %v7245_v49  ;;  %6326 = vmatprep.subr.bf16.mxu0 %v7373_v46  ;;  %v3747_v49 = vld [vmem:[%s8677_s15 + $0x5b0] sm:$0xff] }
 0x76a   : > { %v3871_v46 = vld [vmem:[%s8677_s15 + $0x990] sm:$0xff]  ;;  %v7183_v61 = vcombine.high %v3743_v45, %v3747_v49  ;;  %v7182_v53 = vcombine.low %v3743_v45, %v3747_v49 }
 0x76b   : > { %v7310_v54 = vcombine.low %v3871_v46, %v3875_v22  ;;  %v3931_v45 = vld [vmem:[%s8677_s15 + $0xb70] sm:$0xff] }
 0x770   : > { %6163 = vmatpush1.bf16.xpose.msra.mxu1 %v7244_v51  ;;  %6327 = vmatpush1.bf16.xpose.msra.mxu0 %v7372_v23  ;;  %v7311_v51 = vcombine.high %v3871_v46, %v3875_v22  ;;  %v3751_v23 = vld [vmem:[%s8677_s15 + $0x5d0] sm:$0xff] }
 0x771   : > { %6164 = vmatprep.subr.bf16.mxu1 %v7253_v52  ;;  %6328 = vmatprep.subr.bf16.mxu0 %v7381_v20  ;;  %v3755_v52 = vld [vmem:[%s8677_s15 + $0x5f0] sm:$0xff] }
 0x772   : > { %v3879_v20 = vld [vmem:[%s8677_s15 + $0x9d0] sm:$0xff]  ;;  %v7191_v56 = vcombine.high %v3751_v23, %v3755_v52  ;;  %v7190_v9 = vcombine.low %v3751_v23, %v3755_v52 }
 0x773   : > { %v7318_v10 = vcombine.low %v3879_v20, %v3883_v48  ;;  %v3939_v23 = vld [vmem:[%s8677_s15 + $0xbb0] sm:$0xff] }
 0x778   : > { %6165 = vmatpush1.bf16.xpose.msra.mxu1 %v7252_v57  ;;  %6329 = vmatpush1.bf16.xpose.msra.mxu0 %v7380_v60  ;;  %v7319_v57 = vcombine.high %v3879_v20, %v3883_v48  ;;  %v3759_v60 = vld [vmem:[%s8677_s15 + $0x610] sm:$0xff] }
 0x779   : > { %6175 = vmatprep.subr.bf16.mxu1 %v7135_v63  ;;  %6339 = vmatprep.subr.bf16.mxu0 %v7263_v0  ;;  %v3763_v63 = vld [vmem:[%s8677_s15 + $0x630] sm:$0xff] }
 0x77a   : > { %v3887_v0 = vld [vmem:[%s8677_s15 + $0xa10] sm:$0xff]  ;;  %v7199_v29 = vcombine.high %v3759_v60, %v3763_v63  ;;  %v7198_v28 = vcombine.low %v3759_v60, %v3763_v63 }
 0x77b   : > { %v7326_v32 = vcombine.low %v3887_v0, %v3891_v5  ;;  %v3947_v60 = vld [vmem:[%s8677_s15 + $0xbf0] sm:$0xff] }
 0x77f   : > { %6167 = vmatmul.mubr.bf16.vlgmr.msra.gmra.mrb[4].mxu1 %v9002_v30  ;;  %6331 = vmatmul.mubr.bf16.vlgmr.msra.gmra.mrb[4].mxu0 %v9002_v30  ;;  %v3719_v30 = vld [vmem:[%s8677_s15 + $0x4d0] sm:$0xff] }
 0x780   : > { %6176 = vmatpush1.bf16.xpose.msra.mxu1 %v7134_v31  ;;  %6340 = vmatpush1.bf16.xpose.msra.mxu0 %v7262_v18  ;;  %v7159_v39 = vcombine.high %v3719_v30, %v3723_v37  ;;  %v7158_v42 = vcombine.low %v3719_v30, %v3723_v37  ;;  %v7327_v31 = vcombine.high %v3887_v0, %v3891_v5  ;;  %v3767_v18 = vld [vmem:[%s8677_s15 + $0x650] sm:$0xff] }
 0x781   : > { %6177 = vmatprep.subr.bf16.mxu1 %v7143_v1  ;;  %6341 = vmatprep.subr.bf16.mxu0 %v7271_v19  ;;  %v3771_v1 = vld [vmem:[%s8677_s15 + $0x670] sm:$0xff] }
 0x782   : > { %6207 = vmatprep.mubr.bf16.mxu1 %v8858_v7  ;;  %6371 = vmatprep.mubr.bf16.mxu0 %v8858_v7  ;;  %v7287_v7 = vcombine.high %v3847_v38, %v3851_v11  ;;  %v3895_v19 = vld [vmem:[%s8677_s15 + $0xa50] sm:$0xff]  ;;  %v7207_v33 = vcombine.high %v3767_v18, %v3771_v1  ;;  %v7206_v37 = vcombine.low %v3767_v18, %v3771_v1  ;;  %v3828_v18 = vld [vmem:[%s8677_s15 + $0x838] sm:$0xff] }
 0x783   : > { %v3907_v30 = vld [vmem:[%s8677_s15 + $0xab0] sm:$0xff]  ;;  %v7334_v38 = vcombine.low %v3895_v19, %v3899_v24 }
 0x788   : > { %6178 = vmatpush1.bf16.xpose.msra.mxu1 %v7142_v35  ;;  %6342 = vmatpush1.bf16.xpose.msra.mxu0 %v7270_v36  ;;  %v7335_v35 = vcombine.high %v3895_v19, %v3899_v24  ;;  %v3775_v36 = vld [vmem:[%s8677_s15 + $0x690] sm:$0xff] }
 0x789   : > { %6179 = vmatprep.subr.bf16.mxu1 %v7151_v34  ;;  %6343 = vmatprep.subr.bf16.mxu0 %v7279_v55  ;;  %v3779_v34 = vld [vmem:[%s8677_s15 + $0x6b0] sm:$0xff] }
 0x78a   : > { %v3903_v55 = vld [vmem:[%s8677_s15 + $0xa90] sm:$0xff]  ;;  %v7215_v11 = vcombine.high %v3775_v36, %v3779_v34  ;;  %v7214_v4 = vcombine.low %v3775_v36, %v3779_v34  ;;  %v3836_v36 = vld [vmem:[%s8677_s15 + $0x878] sm:$0xff] }
 0x78b   : > { %v7342_v12 = vcombine.low %v3903_v55, %v3907_v30 }
 0x790   : > { %6180 = vmatpush1.bf16.xpose.msra.mxu1 %v7150_v13  ;;  %6344 = vmatpush1.bf16.xpose.msra.mxu0 %v7278_v2  ;;  %v7343_v13 = vcombine.high %v3903_v55, %v3907_v30  ;;  %v3783_v2 = vld [vmem:[%s8677_s15 + $0x6d0] sm:$0xff] }
 0x791   : > { %6181 = vmatprep.subr.bf16.mxu1 %v7159_v39  ;;  %6345 = vmatprep.subr.bf16.mxu0 %v7287_v7  ;;  %v3787_v39 = vld [vmem:[%s8677_s15 + $0x6f0] sm:$0xff] }
 0x792   : > { %v3911_v7 = vld [vmem:[%s8677_s15 + $0xad0] sm:$0xff]  ;;  %v7223_v41 = vcombine.high %v3783_v2, %v3787_v39  ;;  %v7222_v17 = vcombine.low %v3783_v2, %v3787_v39  ;;  %v3844_v2 = vld [vmem:[%s8677_s15 + $0x8b8] sm:$0xff] }
 0x793   : > { %v7350_v59 = vcombine.low %v3911_v7, %v3915_v8 }
 0x798   : > { %6182 = vmatpush1.bf16.xpose.msra.mxu1 %v7158_v42  ;;  %6346 = vmatpush1.bf16.xpose.msra.mxu0 %v7286_v16  ;;  %v7351_v42 = vcombine.high %v3911_v7, %v3915_v8  ;;  %v3791_v16 = vld [vmem:[%s8677_s15 + $0x710] sm:$0xff] }
 0x799   : > { %6183 = vmatprep.subr.bf16.mxu1 %v7167_v43  ;;  %6347 = vmatprep.subr.bf16.mxu0 %v7295_v44  ;;  %v3795_v43 = vld [vmem:[%s8677_s15 + $0x730] sm:$0xff] }
 0x79a   : > { %v3919_v44 = vld [vmem:[%s8677_s15 + $0xb10] sm:$0xff]  ;;  %v7231_v26 = vcombine.high %v3791_v16, %v3795_v43  ;;  %v7230_v49 = vcombine.low %v3791_v16, %v3795_v43 }
 0x79b   : > { %v7358_v46 = vcombine.low %v3919_v44, %v3923_v25 }
 0x7a0   : > { %6184 = vmatpush1.bf16.xpose.msra.mxu1 %v7166_v40  ;;  %6348 = vmatpush1.bf16.xpose.msra.mxu0 %v7294_v3  ;;  %v7359_v40 = vcombine.high %v3919_v44, %v3923_v25  ;;  %v3799_v3 = vld [vmem:[%s8677_s15 + $0x750] sm:$0xff]  ;;  %v3728_v25 = vld [vmem:[%s8677_s15 + $0x518] sm:$0xff] }
 0x7a1   : > { %6185 = vmatprep.subr.bf16.mxu1 %v7175_v21  ;;  %6349 = vmatprep.subr.bf16.mxu0 %v7303_v27  ;;  %v3803_v21 = vld [vmem:[%s8677_s15 + $0x770] sm:$0xff] }
 0x7a2   : > { %v3927_v27 = vld [vmem:[%s8677_s15 + $0xb50] sm:$0xff]  ;;  %v7239_v22 = vcombine.high %v3799_v3, %v3803_v21  ;;  %v7238_v52 = vcombine.low %v3799_v3, %v3803_v21 }
 0x7a3   : > { %v7366_v20 = vcombine.low %v3927_v27, %v3931_v45 }
 0x7a8   : > { %6186 = vmatpush1.bf16.xpose.msra.mxu1 %v7174_v62  ;;  %6350 = vmatpush1.bf16.xpose.msra.mxu0 %v7302_v47  ;;  %v7367_v62 = vcombine.high %v3927_v27, %v3931_v45  ;;  %v3807_v47 = vld [vmem:[%s8677_s15 + $0x790] sm:$0xff]  ;;  %v3736_v45 = vld [vmem:[%s8677_s15 + $0x558] sm:$0xff] }
 0x7a9   : > { %6187 = vmatprep.subr.bf16.mxu1 %v7183_v61  ;;  %6351 = vmatprep.subr.bf16.mxu0 %v7311_v51  ;;  %v3811_v61 = vld [vmem:[%s8677_s15 + $0x7b0] sm:$0xff] }
 0x7aa   : > { %v3935_v51 = vld [vmem:[%s8677_s15 + $0xb90] sm:$0xff]  ;;  %v7247_v48 = vcombine.high %v3807_v47, %v3811_v61  ;;  %v7246_v63 = vcombine.low %v3807_v47, %v3811_v61 }
 0x7ab   : > { %v7374_v0 = vcombine.low %v3935_v51, %v3939_v23 }
 0x7b0   : > { %6188 = vmatpush1.bf16.xpose.msra.mxu1 %v7182_v53  ;;  %6352 = vmatpush1.bf16.xpose.msra.mxu0 %v7310_v54  ;;  %v7375_v53 = vcombine.high %v3935_v51, %v3939_v23  ;;  %v3815_v54 = vld [vmem:[%s8677_s15 + $0x7d0] sm:$0xff]  ;;  %v3744_v23 = vld [vmem:[%s8677_s15 + $0x598] sm:$0xff] }
 0x7b1   : > { %6189 = vmatprep.subr.bf16.mxu1 %v7191_v56  ;;  %6353 = vmatprep.subr.bf16.mxu0 %v7319_v57  ;;  %v3819_v56 = vld [vmem:[%s8677_s15 + $0x7f0] sm:$0xff] }
 0x7b2   : > { %v3943_v57 = vld [vmem:[%s8677_s15 + $0xbd0] sm:$0xff]  ;;  %v7255_v5 = vcombine.high %v3815_v54, %v3819_v56  ;;  %v7254_v1 = vcombine.low %v3815_v54, %v3819_v56 }
 0x7b3   : > { %v7382_v19 = vcombine.low %v3943_v57, %v3947_v60 }
 0x7b8   : > { %6190 = vmatpush1.bf16.xpose.msra.mxu1 %v7190_v9  ;;  %6354 = vmatpush1.bf16.xpose.msra.mxu0 %v7318_v10  ;;  %v7383_v9 = vcombine.high %v3943_v57, %v3947_v60  ;;  %v3696_v10 = vld [vmem:[%s8677_s15 + $0x418] sm:$0xff] }
 0x7b9   : > { %6191 = vmatprep.subr.bf16.mxu1 %v7199_v29  ;;  %6355 = vmatprep.subr.bf16.mxu0 %v7327_v31  ;;  %v3700_v29 = vld [vmem:[%s8677_s15 + $0x438] sm:$0xff] }
 0x7ba   : > { %v3824_v31 = vld [vmem:[%s8677_s15 + $0x818] sm:$0xff]  ;;  %v7137_v24 = vcombine.high %v3696_v10, %v3700_v29  ;;  %v7136_v34 = vcombine.low %v3696_v10, %v3700_v29 }
 0x7bb   : > { %v7264_v55 = vcombine.low %v3824_v31, %v3828_v18  ;;  %v3752_v60 = vld [vmem:[%s8677_s15 + $0x5d8] sm:$0xff] }
 0x7c0   : > { %6192 = vmatpush1.bf16.xpose.msra.mxu1 %v7198_v28  ;;  %6356 = vmatpush1.bf16.xpose.msra.mxu0 %v7326_v32  ;;  %v7265_v28 = vcombine.high %v3824_v31, %v3828_v18  ;;  %v3704_v32 = vld [vmem:[%s8677_s15 + $0x458] sm:$0xff] }
 0x7c1   : > { %6193 = vmatprep.subr.bf16.mxu1 %v7207_v33  ;;  %6357 = vmatprep.subr.bf16.mxu0 %v7335_v35  ;;  %v3708_v33 = vld [vmem:[%s8677_s15 + $0x478] sm:$0xff] }
 0x7c2   : > { %v3832_v35 = vld [vmem:[%s8677_s15 + $0x858] sm:$0xff]  ;;  %v7145_v30 = vcombine.high %v3704_v32, %v3708_v33  ;;  %v7144_v39 = vcombine.low %v3704_v32, %v3708_v33 }
 0x7c3   : > { %v7272_v7 = vcombine.low %v3832_v35, %v3836_v36  ;;  %v3760_v18 = vld [vmem:[%s8677_s15 + $0x618] sm:$0xff] }
 0x7c8   : > { %6194 = vmatpush1.bf16.xpose.msra.mxu1 %v7206_v37  ;;  %6358 = vmatpush1.bf16.xpose.msra.mxu0 %v7334_v38  ;;  %v7273_v37 = vcombine.high %v3832_v35, %v3836_v36  ;;  %v3712_v38 = vld [vmem:[%s8677_s15 + $0x498] sm:$0xff] }
 0x7c9   : > { %6195 = vmatprep.subr.bf16.mxu1 %v7215_v11  ;;  %6359 = vmatprep.subr.bf16.mxu0 %v7343_v13  ;;  %v3716_v11 = vld [vmem:[%s8677_s15 + $0x4b8] sm:$0xff] }
 0x7ca   : > { %v3840_v13 = vld [vmem:[%s8677_s15 + $0x898] sm:$0xff]  ;;  %v7153_v8 = vcombine.high %v3712_v38, %v3716_v11  ;;  %v7152_v16 = vcombine.low %v3712_v38, %v3716_v11 }
 0x7cb   : > { %v7280_v43 = vcombine.low %v3840_v13, %v3844_v2  ;;  %v3768_v36 = vld [vmem:[%s8677_s15 + $0x658] sm:$0xff] }
 0x7d0   : > { %6196 = vmatpush1.bf16.xpose.msra.mxu1 %v7214_v4  ;;  %6360 = vmatpush1.bf16.xpose.msra.mxu0 %v7342_v12  ;;  %v7281_v4 = vcombine.high %v3840_v13, %v3844_v2  ;;  %v3724_v12 = vld [vmem:[%s8677_s15 + $0x4f8] sm:$0xff] }
 0x7d1   : > { %6197 = vmatprep.subr.bf16.mxu1 %v7223_v41  ;;  %6361 = vmatprep.subr.bf16.mxu0 %v7351_v42  ;;  %v3848_v41 = vld [vmem:[%s8677_s15 + $0x8d8] sm:$0xff] }
 0x7d2   : > { %v3852_v42 = vld [vmem:[%s8677_s15 + $0x8f8] sm:$0xff] }
 0x7d3   : > { %v7288_v3 = vcombine.low %v3848_v41, %v3852_v42  ;;  %v3776_v2 = vld [vmem:[%s8677_s15 + $0x698] sm:$0xff] }
 0x7d8   : > { %6198 = vmatpush1.bf16.xpose.msra.mxu1 %v7222_v17  ;;  %6362 = vmatpush1.bf16.xpose.msra.mxu0 %v7350_v59  ;;  %v3732_v17 = vld [vmem:[%s8677_s15 + $0x538] sm:$0xff] }
 0x7d9   : > { %6199 = vmatprep.subr.bf16.mxu1 %v7231_v26  ;;  %6363 = vmatprep.subr.bf16.mxu0 %v7359_v40  ;;  %v3856_v59 = vld [vmem:[%s8677_s15 + $0x918] sm:$0xff]  ;;  %v7169_v21 = vcombine.high %v3728_v25, %v3732_v17 }
 0x7da   : > { %v3860_v26 = vld [vmem:[%s8677_s15 + $0x938] sm:$0xff] }
 0x7db   : > { %v7297_v27 = vcombine.high %v3856_v59, %v3860_v26  ;;  %v7296_v47 = vcombine.low %v3856_v59, %v3860_v26  ;;  %v3792_v26 = vld [vmem:[%s8677_s15 + $0x718] sm:$0xff] }
 0x7e0   : > { %6200 = vmatpush1.bf16.xpose.msra.mxu1 %v7230_v49  ;;  %6364 = vmatpush1.bf16.xpose.msra.mxu0 %v7358_v46  ;;  %v3740_v49 = vld [vmem:[%s8677_s15 + $0x578] sm:$0xff] }
 0x7e1   : > { %6201 = vmatprep.subr.bf16.mxu1 %v7239_v22  ;;  %6365 = vmatprep.subr.bf16.mxu0 %v7367_v62  ;;  %v3864_v46 = vld [vmem:[%s8677_s15 + $0x958] sm:$0xff]  ;;  %v7168_v62 = vcombine.low %v3728_v25, %v3732_v17  ;;  %v7177_v61 = vcombine.high %v3736_v45, %v3740_v49 }
 0x7e2   : > { %v3868_v22 = vld [vmem:[%s8677_s15 + $0x978] sm:$0xff] }
 0x7e3   : > { %v7305_v51 = vcombine.high %v3864_v46, %v3868_v22  ;;  %v7304_v54 = vcombine.low %v3864_v46, %v3868_v22  ;;  %v3800_v22 = vld [vmem:[%s8677_s15 + $0x758] sm:$0xff] }
 0x7e8   : > { %6202 = vmatpush1.bf16.xpose.msra.mxu1 %v7238_v52  ;;  %6366 = vmatpush1.bf16.xpose.msra.mxu0 %v7366_v20  ;;  %v3748_v52 = vld [vmem:[%s8677_s15 + $0x5b8] sm:$0xff] }
 0x7e9   : > { %6203 = vmatprep.subr.bf16.mxu1 %v7247_v48  ;;  %6367 = vmatprep.subr.bf16.mxu0 %v7375_v53  ;;  %v3872_v20 = vld [vmem:[%s8677_s15 + $0x998] sm:$0xff]  ;;  %v7176_v53 = vcombine.low %v3736_v45, %v3740_v49  ;;  %v7185_v56 = vcombine.high %v3744_v23, %v3748_v52 }
 0x7ea   : > { %v3876_v48 = vld [vmem:[%s8677_s15 + $0x9b8] sm:$0xff] }
 0x7eb   : > { %v7313_v57 = vcombine.high %v3872_v20, %v3876_v48  ;;  %v7312_v10 = vcombine.low %v3872_v20, %v3876_v48  ;;  %v3808_v48 = vld [vmem:[%s8677_s15 + $0x798] sm:$0xff] }
 0x7f0   : > { %6204 = vmatpush1.bf16.xpose.msra.mxu1 %v7246_v63  ;;  %6368 = vmatpush1.bf16.xpose.msra.mxu0 %v7374_v0  ;;  %v3756_v63 = vld [vmem:[%s8677_s15 + $0x5f8] sm:$0xff] }
 0x7f1   : > { %6205 = vmatprep.subr.bf16.mxu1 %v7255_v5  ;;  %6369 = vmatprep.subr.bf16.mxu0 %v7383_v9  ;;  %v3880_v0 = vld [vmem:[%s8677_s15 + $0x9d8] sm:$0xff]  ;;  %v7184_v9 = vcombine.low %v3744_v23, %v3748_v52  ;;  %v7193_v29 = vcombine.high %v3752_v60, %v3756_v63 }
 0x7f2   : > { %v3884_v5 = vld [vmem:[%s8677_s15 + $0x9f8] sm:$0xff] }
 0x7f3   : > { %v7321_v31 = vcombine.high %v3880_v0, %v3884_v5  ;;  %v7320_v32 = vcombine.low %v3880_v0, %v3884_v5  ;;  %v3816_v5 = vld [vmem:[%s8677_s15 + $0x7d8] sm:$0xff] }
 0x7f8   : > { %6206 = vmatpush1.bf16.xpose.msra.mxu1 %v7254_v1  ;;  %6370 = vmatpush1.bf16.xpose.msra.mxu0 %v7382_v19  ;;  %v3764_v1 = vld [vmem:[%s8677_s15 + $0x638] sm:$0xff] }
 0x7f9   : > { %6216 = vmatprep.subr.bf16.mxu1 %v7137_v24  ;;  %6380 = vmatprep.subr.bf16.mxu0 %v7265_v28  ;;  %v3888_v19 = vld [vmem:[%s8677_s15 + $0xa18] sm:$0xff]  ;;  %v7192_v28 = vcombine.low %v3752_v60, %v3756_v63  ;;  %v7201_v33 = vcombine.high %v3760_v18, %v3764_v1 }
 0x7fa   : > { %v3892_v24 = vld [vmem:[%s8677_s15 + $0xa38] sm:$0xff] }
 0x7fb   : > { %v7329_v35 = vcombine.high %v3888_v19, %v3892_v24  ;;  %v7328_v38 = vcombine.low %v3888_v19, %v3892_v24 }
 0x7ff   : > { %6208 = vmatmul.mubr.bf16.vlgmr.msra.gmra.mrb[4].mxu1 %v8922_v6  ;;  %6372 = vmatmul.mubr.bf16.vlgmr.msra.gmra.mrb[4].mxu0 %v8922_v6  ;;  %v3720_v6 = vld [vmem:[%s8677_s15 + $0x4d8] sm:$0xff] }
 0x800   : > { %6217 = vmatpush1.bf16.xpose.msra.mxu1 %v7136_v34  ;;  %6381 = vmatpush1.bf16.xpose.msra.mxu0 %v7264_v55  ;;  %v7161_v44 = vcombine.high %v3720_v6, %v3724_v12  ;;  %v7160_v40 = vcombine.low %v3720_v6, %v3724_v12  ;;  %v3772_v34 = vld [vmem:[%s8677_s15 + $0x678] sm:$0xff] }
 0x801   : > { %6218 = vmatprep.subr.bf16.mxu1 %v7145_v30  ;;  %6382 = vmatprep.subr.bf16.mxu0 %v7273_v37  ;;  %v3896_v55 = vld [vmem:[%s8677_s15 + $0xa58] sm:$0xff]  ;;  %v7200_v37 = vcombine.low %v3760_v18, %v3764_v1  ;;  %v7209_v11 = vcombine.high %v3768_v36, %v3772_v34 }
 0x802   : > { %6248 = vmatprep.mubr.bf16.mxu1 %v8933_v15  ;;  %6412 = vmatprep.mubr.bf16.mxu0 %v8933_v15  ;;  %v7289_v15 = vcombine.high %v3848_v41, %v3852_v42  ;;  %v3900_v30 = vld [vmem:[%s8677_s15 + $0xa78] sm:$0xff] }
 0x803   : > { %v7337_v13 = vcombine.high %v3896_v55, %v3900_v30  ;;  %v7336_v6 = vcombine.low %v3896_v55, %v3900_v30  ;;  %v3784_v42 = vld [vmem:[%s8677_s15 + $0x6d8] sm:$0xff] }
 0x808   : > { %6219 = vmatpush1.bf16.xpose.msra.mxu1 %v7144_v39  ;;  %6383 = vmatpush1.bf16.xpose.msra.mxu0 %v7272_v7  ;;  %v3780_v39 = vld [vmem:[%s8677_s15 + $0x6b8] sm:$0xff] }
 0x809   : > { %6220 = vmatprep.subr.bf16.mxu1 %v7153_v8  ;;  %6384 = vmatprep.subr.bf16.mxu0 %v7281_v4  ;;  %v3904_v7 = vld [vmem:[%s8677_s15 + $0xa98] sm:$0xff]  ;;  %v7208_v4 = vcombine.low %v3768_v36, %v3772_v34  ;;  %v7217_v12 = vcombine.high %v3776_v2, %v3780_v39  ;;  %v3973_v36 = vsub.s32 5, %v9118_v50 }
 0x80a   : > { %v3908_v8 = vld [vmem:[%s8677_s15 + $0xab8] sm:$0xff] }
 0x80b   : > { %v7345_v41 = vcombine.high %v3904_v7, %v3908_v8  ;;  %v7344_v25 = vcombine.low %v3904_v7, %v3908_v8 }
 0x810   : > { %6221 = vmatpush1.bf16.xpose.msra.mxu1 %v7152_v16  ;;  %6385 = vmatpush1.bf16.xpose.msra.mxu0 %v7280_v43  ;;  %v3788_v16 = vld [vmem:[%s8677_s15 + $0x6f8] sm:$0xff] }
 0x811   : > { %6222 = vmatprep.subr.bf16.mxu1 %v7161_v44  ;;  %6386 = vmatprep.subr.bf16.mxu0 %v7289_v15  ;;  %v3912_v43 = vld [vmem:[%s8677_s15 + $0xad8] sm:$0xff]  ;;  %v7216_v15 = vcombine.low %v3776_v2, %v3780_v39  ;;  %v7225_v17 = vcombine.high %v3784_v42, %v3788_v16 }
 0x812   : > { %v3916_v44 = vld [vmem:[%s8677_s15 + $0xaf8] sm:$0xff] }
 0x813   : > { %v7353_v59 = vcombine.high %v3912_v43, %v3916_v44  ;;  %v7352_v45 = vcombine.low %v3912_v43, %v3916_v44 }
 0x818   : > { %6223 = vmatpush1.bf16.xpose.msra.mxu1 %v7160_v40  ;;  %6387 = vmatpush1.bf16.xpose.msra.mxu0 %v7288_v3  ;;  %v3796_v40 = vld [vmem:[%s8677_s15 + $0x738] sm:$0xff] }
 0x819   : > { %6224 = vmatprep.subr.bf16.mxu1 %v7169_v21  ;;  %6388 = vmatprep.subr.bf16.mxu0 %v7297_v27  ;;  %v3920_v3 = vld [vmem:[%s8677_s15 + $0xb18] sm:$0xff]  ;;  %v7224_v27 = vcombine.low %v3784_v42, %v3788_v16  ;;  %v7233_v49 = vcombine.high %v3792_v26, %v3796_v40 }
 0x81a   : > { %v3924_v21 = vld [vmem:[%s8677_s15 + $0xb38] sm:$0xff] }
 0x81b   : > { %v7361_v46 = vcombine.high %v3920_v3, %v3924_v21  ;;  %v7360_v23 = vcombine.low %v3920_v3, %v3924_v21 }
 0x820   : > { %6225 = vmatpush1.bf16.xpose.msra.mxu1 %v7168_v62  ;;  %6389 = vmatpush1.bf16.xpose.msra.mxu0 %v7296_v47  ;;  %v3804_v62 = vld [vmem:[%s8677_s15 + $0x778] sm:$0xff] }
 0x821   : > { %6226 = vmatprep.subr.bf16.mxu1 %v7177_v61  ;;  %6390 = vmatprep.subr.bf16.mxu0 %v7305_v51  ;;  %v3928_v47 = vld [vmem:[%s8677_s15 + $0xb58] sm:$0xff]  ;;  %v7232_v51 = vcombine.low %v3792_v26, %v3796_v40  ;;  %v7241_v52 = vcombine.high %v3800_v22, %v3804_v62 }
 0x822   : > { %v3932_v61 = vld [vmem:[%s8677_s15 + $0xb78] sm:$0xff] }
 0x823   : > { %v7369_v20 = vcombine.high %v3928_v47, %v3932_v61  ;;  %v7368_v60 = vcombine.low %v3928_v47, %v3932_v61 }
 0x828   : > { %6227 = vmatpush1.bf16.xpose.msra.mxu1 %v7176_v53  ;;  %6391 = vmatpush1.bf16.xpose.msra.mxu0 %v7304_v54  ;;  %v3812_v53 = vld [vmem:[%s8677_s15 + $0x7b8] sm:$0xff] }
 0x829   : > { %6228 = vmatprep.subr.bf16.mxu1 %v7185_v56  ;;  %6392 = vmatprep.subr.bf16.mxu0 %v7313_v57  ;;  %v3936_v54 = vld [vmem:[%s8677_s15 + $0xb98] sm:$0xff]  ;;  %v7240_v57 = vcombine.low %v3800_v22, %v3804_v62  ;;  %v7249_v63 = vcombine.high %v3808_v48, %v3812_v53 }
 0x82a   : > { %v3940_v56 = vld [vmem:[%s8677_s15 + $0xbb8] sm:$0xff] }
 0x82b   : > { %v7377_v0 = vcombine.high %v3936_v54, %v3940_v56  ;;  %v7376_v18 = vcombine.low %v3936_v54, %v3940_v56 }
 0x830   : > { %6229 = vmatpush1.bf16.xpose.msra.mxu1 %v7184_v9  ;;  %6393 = vmatpush1.bf16.xpose.msra.mxu0 %v7312_v10  ;;  %v3820_v9 = vld [vmem:[%s8677_s15 + $0x7f8] sm:$0xff] }
 0x831   : > { %6230 = vmatprep.subr.bf16.mxu1 %v7193_v29  ;;  %6394 = vmatprep.subr.bf16.mxu0 %v7321_v31  ;;  %v3944_v10 = vld [vmem:[%s8677_s15 + $0xbd8] sm:$0xff]  ;;  %v7248_v31 = vcombine.low %v3808_v48, %v3812_v53  ;;  %v7257_v1 = vcombine.high %v3816_v5, %v3820_v9  ;;  %v7256_v24 = vcombine.low %v3816_v5, %v3820_v9 }
 0x832   : > { %v3948_v29 = vld [vmem:[%s8677_s15 + $0xbf8] sm:$0xff] }
 0x833   : > { %v7385_v19 = vcombine.high %v3944_v10, %v3948_v29 }
 0x838   : > { %6231 = vmatpush1.bf16.xpose.msra.mxu1 %v7192_v28  ;;  %6395 = vmatpush1.bf16.xpose.msra.mxu0 %v7320_v32  ;;  %v7384_v28 = vcombine.low %v3944_v10, %v3948_v29  ;;  %v3961_v32 = vsub.s32 2, %v9118_v50 }
 0x839   : > { %6232 = vmatprep.subr.bf16.mxu1 %v7201_v33  ;;  %6396 = vmatprep.subr.bf16.mxu0 %v7329_v35  ;;  %v3969_v33 = vsub.s32 4, %v9118_v50  ;;  %v3965_v35 = vsub.s32 3, %v9118_v50 }
 0x83a   : > { %v3962_v34 = vrot.slane %v9126_v58, %v3961_v32 }
 0x83b   : > { %v3970_v55 = vrot.slane %v9126_v58, %v3969_v33  ;;  %v3966_v30 = vrot.slane %v9126_v58, %v3965_v35 }
 0x840   : > { %6233 = vmatpush1.bf16.xpose.msra.mxu1 %v7200_v37  ;;  %6397 = vmatpush1.bf16.xpose.msra.mxu0 %v7328_v38  ;;  %v3974_v37 = vrot.slane %v9126_v58, %v3973_v36 }
 0x841   : > { %6234 = vmatprep.subr.bf16.mxu1 %v7209_v11  ;;  %6398 = vmatprep.subr.bf16.mxu0 %v7337_v13 }
 0x848   : > { %6235 = vmatpush1.bf16.xpose.msra.mxu1 %v7208_v4  ;;  %6399 = vmatpush1.bf16.xpose.msra.mxu0 %v7336_v6 }
 0x849   : > { %6236 = vmatprep.subr.bf16.mxu1 %v7217_v12  ;;  %6400 = vmatprep.subr.bf16.mxu0 %v7345_v41 }
 0x850   : > { %6237 = vmatpush1.bf16.xpose.msra.mxu1 %v7216_v15  ;;  %6401 = vmatpush1.bf16.xpose.msra.mxu0 %v7344_v25 }
 0x851   : > { %6238 = vmatprep.subr.bf16.mxu1 %v7225_v17  ;;  %6402 = vmatprep.subr.bf16.mxu0 %v7353_v59 }
 0x858   : > { %6239 = vmatpush1.bf16.xpose.msra.mxu1 %v7224_v27  ;;  %6403 = vmatpush1.bf16.xpose.msra.mxu0 %v7352_v45 }
 0x859   : > { %6240 = vmatprep.subr.bf16.mxu1 %v7233_v49  ;;  %6404 = vmatprep.subr.bf16.mxu0 %v7361_v46 }
 0x860   : > { %6241 = vmatpush1.bf16.xpose.msra.mxu1 %v7232_v51  ;;  %6405 = vmatpush1.bf16.xpose.msra.mxu0 %v7360_v23 }
 0x861   : > { %6242 = vmatprep.subr.bf16.mxu1 %v7241_v52  ;;  %6406 = vmatprep.subr.bf16.mxu0 %v7369_v20 }
 0x868   : > { %6243 = vmatpush1.bf16.xpose.msra.mxu1 %v7240_v57  ;;  %6407 = vmatpush1.bf16.xpose.msra.mxu0 %v7368_v60 }
 0x869   : > { %6244 = vmatprep.subr.bf16.mxu1 %v7249_v63  ;;  %6408 = vmatprep.subr.bf16.mxu0 %v7377_v0 }
 0x870   : > { %6245 = vmatpush1.bf16.xpose.msra.mxu1 %v7248_v31  ;;  %6409 = vmatpush1.bf16.xpose.msra.mxu0 %v7376_v18 }
 0x871   : > { %6246 = vmatprep.subr.bf16.mxu1 %v7257_v1  ;;  %6410 = vmatprep.subr.bf16.mxu0 %v7385_v19 }
 0x878   : > { %6247 = vmatpush1.bf16.xpose.msra.mxu1 %v7256_v24  ;;  %6411 = vmatpush1.bf16.xpose.msra.mxu0 %v7384_v28 }
 0x87f   : > { %6249 = vmatmul.mubr.bf16.vlgmr.msra.gmra.mrb[4].mxu1 %v9008_v14  ;;  %6413 = vmatmul.mubr.bf16.vlgmr.msra.gmra.mrb[4].mxu0 %v9008_v14 }
 0x952   : > { %v6250_v38 = vpop.f32.mrb[4].mxu1  ;;  %v6414_v14 = vpop.f32.mrb[4].mxu0 }
 0x953   : > { %v7418_v11 = vadd.f32 %v6250_v38, %v3962_v34  ;;  %v6252_v13 = vpop.f32.mrb[5].mxu1  ;;  %v7420_v2 = vadd.f32 %v6414_v14, %v3970_v55  ;;  %v6416_v7 = vpop.f32.mrb[5].mxu0 }
 0x954   : > { %v7419_v39 = vadd.f32 %v6252_v13, %v3966_v30  ;;  %v6254_v50 = vpop.f32.mrb[6].mxu1  ;;  %v7421_v8 = vadd.f32 %v6416_v7, %v3974_v37  ;;  %v6418_v4 = vpop.f32.mrb[6].mxu0 }
 0x955   : > { %7766 = vtanh.f32 %v7418_v11  ;;  %v6255_v6 = vpop.f32.mrb[7].mxu1  ;;  %v6419_v58 = vpop.f32.mrb[7].mxu0 }
 0x956   : > { %7768 = vtanh.f32 %v7420_v2 }
 0x957   : > { %7770 = vtanh.f32 %v7419_v39 }
 0x958   : > { %7772 = vtanh.f32 %v7421_v8 }
 0x95f   : > { %v7767_v12 = vpop.eup %7766 }
 0x960   : > { %v7769_v41 = vpop.eup %7768  ;;  %6429 = vst [vmem:[%s8687_s21 + $0x10] sm:$0xff] %v7767_v12 }
 0x961   : > { %v7771_v42 = vpop.eup %7770  ;;  %6431 = vst [vmem:[%s8687_s21 + $0x20] sm:$0xff] %v7769_v41 }
 0x962   : > { %v7773_v16 = vpop.eup %7772  ;;  %6430 = vst [vmem:[%s8687_s21 + $0x18] sm:$0xff] %v7771_v42 }
 0x963   : > { %6432 = vst [vmem:[%s8687_s21 + $0x28] sm:$0xff] %v7773_v16 }
 0x964   : > { %8127 = shalt.err (!%p8124_p6)
}
 0x965   : > { %s8128_s5 = scalar_lea.hbm %s9302_s19, 768  ;;  %s8132_s14 = scalar_lea.hbm %s9429_s10, 3072 }
 0x966   : > { %p8129_p8 = scmp.ne.s32.totalorder %s9302_s19, %s8128_s5  ;;  %p8133_p4 = scmp.lt.u32.totalorder %s9302_s19, %s9429_s10 }
 0x967   : > { %p8134_p12 = scmp.lt.u32.totalorder %s8132_s14, %s8128_s5  ;;  %p8136_p2 = scmp.lt.u32.totalorder %s8128_s5, %s9302_s19 }
 0x968   : > { %p8130_p3 = pnand %p8129_p8, %p9430_p7 }
 0x969   : > { %p8135_p5 = por %p8134_p12, %p8133_p4 }
 0x96a   : > { %p8131_p13 = pneg %p8130_p3 }
 0x96b   : > { %p8137_p1 = por %p8136_p2, %p8135_p5 }
 0x96d   : > { %p8138_p10 = pnand %p8137_p1, %p8131_p13 }
 0x96f   : > { %8141 = shalt.err (!%p8138_p10)
}
 0x970   : > { %7503 = dma.vmem_to_hbm [thread:$0]  (%p9430_p7), %s9304_s0, 768, %s9302_s19, %s6434_s27  }
 0x971 PF: > { %s9431_s15 = sld [smem:[#allocation31_spill]]  ;;  %s9432_s3 = sld [smem:[#allocation35_spill]] }
 0x972   : > { %p7568_p11 = scmp.ge.s32.totalorder %s8204_s24, 2 }
 0x977   : > { %s6460_s1 = sand.u32 1, %s9431_s15   ;;  %p9433_p9 = scmp.ne.s32.totalorder %s9432_s3, 0 }
 0x978   : > { %s6461_s25 = scalar_lea.sflag [#allocation5], %s6460_s1 }
 0x979   : > { %p7544_p0 = pnand %p7568_p11, %p9433_p9 }
 0x97b   : > { %8187 = dma.done.wait (!%p7544_p0), %s6461_s25, 768  }
 0x97c   : > { %8189 = vsyncadd (!%p7544_p0), %s6461_s25, 4294966528  ;;  %s9434_s24 = sld [smem:[#allocation33_spill]]  ;;  %s9435_s18 = sld [smem:[#allocation34_spill]] }
 0x97d   : > { %s9436_s21 = smov %s8196_s22  ;;  %s9437_s22 = smov %s8200_s23 }
 0x982   : > { %p28_p6 = scmp.ge.s32.totalorder %s9434_s24, 6   ;;  %s9438_s23 = smov %s9435_s18 }
 0x984   :  { %30 = sbr.rel (!%p28_p6) target bundleno = 18 (0x12), region = 167 }
 0x98b   :  { %6466 = vsyncpa [#allocation4], 1 }
 0x98c   :  { %6468 = vsyncpa [#allocation4 + $0x1], 1 }
 0x98d   :  { %6469 = vsyncpa [#allocation7], 1 }
 0x98e   :  { %6470 = vsyncpa [#allocation10], 1 }
 0x98f   :  { %6471 = vsyncpa [#allocation13], 1 }
 0x990   :  { %6472 = vsyncpa [#allocation16], 1 }
 0x991   :  { %6473 = vsyncpa [#allocation19], 1 }
 0x992   :  { %6474 = vsyncpa [#allocation5], 1 }
 0x993   :  { %6476 = vsyncpa [#allocation5 + $0x1], 1 }

</bundles_post_ra>
